<compile_context>
chip_gen: v6e
topology: v6e:2x2x1
jax: 0.10.0
libtpu: 0.0.40
codegen_flags: <defaults>
</compile_context>

<pallas_src>
import functools

import jax
import jax.numpy as jnp
from jax.experimental import pallas as pl
from jax.experimental.pallas import tpu as pltpu


def _cdiv(a, b):
    return (a + b - 1) // b


def _round_up(a, b):
    return _cdiv(a, b) * b


def _choose_time_tile(batch, t_out):
    """Lane-dense time tile: large tiles (~85% of HBM roofline at >=512 vs ~29%
    at 128), but keep >=2 parallel grid steps so v7x's two TensorCores both get
    work even at batch==1."""
    tt = min(512, _round_up(max(t_out, 128), 128))
    if batch == 1:
        while tt > 128 and _cdiv(t_out, tt) < 2:
            tt //= 2
    return tt


# ---------------------------------------------------------------------------
# Fused whole-stack kernel (one time tile of the final output per grid step)
# ---------------------------------------------------------------------------
def _make_fused_kernel(layer_cfgs, K, t_tile, t_true, halo_l, halo_r):
    n_layers = len(layer_cfgs)
    W = t_tile + halo_l + halo_r  # width of the raw-input window for this tile

    def kernel(xl_ref, xm_ref, xr_ref, *refs):
        # xl_ref/xr_ref: (Cin0, 128) halo blocks; xm_ref: (Cin0, t_tile) main tile
        # refs: w_0..w_{L-1} (K, Cout, Cin), b_0..b_{L-1} (Cout, 1), o_ref (Cout_L, t_tile)
        w_refs = refs[:n_layers]
        b_refs = refs[n_layers:2 * n_layers]
        o_ref = refs[2 * n_layers]

        ti = pl.program_id(1)

        # Assemble the raw-input window from the main tile plus thin halo slices.
        parts = [xl_ref[:, 128 - halo_l:], xm_ref[...]]
        if halo_r > 0:
            parts.append(xr_ref[:, :halo_r])
        cur = jnp.concatenate(parts, axis=-1)  # (Cin0, W)

        # Original time coordinate of every window column.  Columns outside
        # [0, t_true) must read as the exact zeros torch's Conv1d padding
        # provides between layers: the raw input is already zero-padded in HBM,
        # intermediate activations are re-zeroed below.
        pos = (jax.lax.broadcasted_iota(jnp.int32, (1, W), 1)
               + (ti * t_tile - halo_l))
        valid = jnp.logical_and(pos >= 0, pos < t_true)  # (1, W)

        off = 0  # current window offset relative to the widest (raw-input) window
        for l, (cin, cout, dil, leaky) in enumerate(layer_cfgs):
            hw = (K - 1) // 2 * dil            # dilated half-width of this conv
            w_out = W - 2 * (off + hw)
            acc = b_refs[l][...].astype(jnp.float32)          # (cout, 1), broadcast
            if K * cin <= 8:
                # Contraction too small for the MXU (first layer, Cin==1):
                # broadcast FIR on the VPU.  (On v5e consider raising this
                # threshold; measure — MXU there is 4x128x128.)
                for k in range(K):
                    wk = w_refs[l][k].astype(jnp.float32)     # (cout, cin=1)
                    acc = acc + wk * cur[:, k * dil:k * dil + w_out].astype(jnp.float32)
            else:
                # Per-tap MXU dots with f32 accumulation; avoids materialising a
                # (K*cin, W) slab concat.  Underfilled MXU is irrelevant here —
                # the kernel is HBM-bound (perf-review v6e/v7x note).
                for k in range(K):
                    wk = w_refs[l][k]                          # (cout, cin)
                    acc = acc + jnp.dot(wk, cur[:, k * dil:k * dil + w_out],
                                        preferred_element_type=jnp.float32)
            if leaky:
                acc = jnp.where(acc >= 0, acc, 0.2 * acc)      # LeakyReLU(0.2)
            # TODO(synk): nn.Dropout omitted (identity at inference).
            off += hw
            if l < n_layers - 1:
                # Zero columns outside the true sequence so the next conv sees
                # torch's exact zero padding (also keeps the values a
                # neighbouring tile's halo would correspond to consistent).
                acc = jnp.where(valid[:, off:off + w_out], acc, 0.0)
            cur = acc

        o_ref[...] = cur.astype(o_ref.dtype)

    return kernel


# ---------------------------------------------------------------------------
# Full Discriminator forward
# ---------------------------------------------------------------------------
def discriminator_forward(x, weights, biases, dilations, leakys, last_padding,
                          kernel_size):
    """x: (B, in_channels, T).  weights[l]: (Cout_l, Cin_l, K) torch Conv1d layout,
    biases[l]: (Cout_l,).  Returns (B, out_channels, T + 2*last_padding - (K-1)*d_last)."""
    B, cin0, T = x.shape
    K = kernel_size
    hw = [(K - 1) // 2 * d for d in dilations]
    extra = last_padding - hw[-1]   # leftover padding torch gives the final conv
    assert extra >= 0
    r_x = sum(hw)                   # receptive half-width back to the raw input
    halo_l, halo_r = extra + r_x, r_x - extra
    assert 0 < halo_l <= 128 and 0 <= halo_r <= 128, \
        "conv halo must fit inside one 128-column halo block"
    t_out = T + 2 * last_padding - (K - 1) * dilations[-1]

    tt = _choose_time_tile(B, t_out)
    assert tt % 128 == 0
    nt = _cdiv(t_out, tt)
    sub = tt // 128                  # 128-column subblocks per main tile

    # Zero-pad the input: one full tile of zeros on the left (realises the left
    # conv padding and keeps all halo block indices in bounds) plus enough on
    # the right for the last tile's right-halo block.
    lp = (nt + 2) * tt
    x_pad = jnp.pad(x, ((0, 0), (0, 0), (tt, lp - tt - T)))

    # torch (Cout, Cin, K) -> tap-major (K, Cout, Cin): one (Cout, Cin) matrix
    # per dilated tap.
    w_args = [jnp.transpose(w, (2, 0, 1)) for w in weights]
    b_args = [b.reshape(-1, 1) for b in biases]
    cout_last = weights[-1].shape[0]

    layer_cfgs = tuple((int(w.shape[1]), int(w.shape[0]), int(d), bool(lk))
                       for w, d, lk in zip(weights, dilations, leakys))
    kernel = _make_fused_kernel(layer_cfgs, K, tt, T, halo_l, halo_r)

    in_specs = [
        # 128-wide left-halo block, tt-wide main tile, 128-wide right-halo block
        # of the zero-padded input (input streamed ~1x instead of 3x).
        pl.BlockSpec((None, cin0, 128), lambda b, t: (b, 0, (t + 1) * sub - 1)),
        pl.BlockSpec((None, cin0, tt), lambda b, t: (b, 0, t + 1)),
        pl.BlockSpec((None, cin0, 128), lambda b, t: (b, 0, (t + 2) * sub)),
    ]
    # Weights / biases: constant block index -> DMA'd once, kept VMEM-resident.
    in_specs += [pl.BlockSpec(w.shape, lambda b, t: (0, 0, 0)) for w in w_args]
    in_specs += [pl.BlockSpec(bb.shape, lambda b, t: (0, 0)) for bb in b_args]

    out = pl.pallas_call(
        kernel,
        out_shape=jax.ShapeDtypeStruct((B, cout_last, nt * tt), x.dtype),
        grid=(B, nt),
        in_specs=in_specs,
        out_specs=pl.BlockSpec((None, cout_last, tt), lambda b, t: (b, 0, t)),
        compiler_params=pltpu.CompilerParams(
            dimension_semantics=("parallel", "parallel")),
    )(x_pad, x_pad, x_pad, *w_args, *b_args)
    return out[:, :, :t_out]


# ---------------------------------------------------------------------------
# Pure-JAX reference (independent of the Pallas math) for validation
# ---------------------------------------------------------------------------
def reference_forward(x, weights, biases, dilations, leakys, paddings):
    y = x
    for w, b, d, leaky, p in zip(weights, biases, dilations, leakys, paddings):
        y = jax.lax.conv_general_dilated(
            y, w, window_strides=(1,), padding=((p, p),), rhs_dilation=(d,),
            dimension_numbers=("NCH", "OIH", "NCH"))
        y = y + b.reshape(1, -1, 1)
        if leaky:
            y = jnp.where(y >= 0, y, 0.2 * y)
    return y


if __name__ == "__main__":
    # Small config consistent with cfg['model']['pwg']['discriminator'].
    B, T = 2, 256
    in_channels, out_channels, hidden_channels = 1, 1, 32
    n_layers, kernel_size = 5, 3

    # Per-layer (Cin, Cout, dilation, leaky, torch padding), exactly as the module builds them.
    layer_cfg = []
    padding = (kernel_size - 1) // 2
    for i in range(n_layers - 1):
        dilation = 1 if i == 0 else i
        cin = in_channels if i == 0 else hidden_channels
        padding = (kernel_size - 1) // 2 * dilation
        layer_cfg.append((cin, hidden_channels, dilation, True, padding))
    # Final conv reuses the leftover `padding` (dilation 1, no activation, no dropout).
    layer_cfg.append((hidden_channels, out_channels, 1, False, padding))

    key = jax.random.PRNGKey(0)
    weights, biases = [], []
    for cin, cout, _, _, _ in layer_cfg:
        key, kw, kb = jax.random.split(key, 3)
        weights.append(
            jax.random.normal(kw, (cout, cin, kernel_size), jnp.float32)
            / jnp.sqrt(float(kernel_size * cin)))
        biases.append(0.1 * jax.random.normal(kb, (cout,), jnp.float32))
    key, kx = jax.random.split(key)
    x = jax.random.normal(kx, (B, in_channels, T), jnp.float32)

    dilations = tuple(c[2] for c in layer_cfg)
    leakys = tuple(c[3] for c in layer_cfg)
    paddings = tuple(c[4] for c in layer_cfg)

    fwd = jax.jit(functools.partial(
        discriminator_forward, dilations=dilations, leakys=leakys,
        last_padding=paddings[-1], kernel_size=kernel_size))
    out = jax.block_until_ready(fwd(x, weights, biases))

    ref = jax.block_until_ready(
        reference_forward(x, weights, biases, dilations, leakys, paddings))

    t_out = T + 2 * paddings[-1] - (kernel_size - 1)  # last conv lengthens the output
    assert out.shape == (B, out_channels, t_out), out.shape
    assert ref.shape == out.shape, (ref.shape, out.shape)
    max_err = float(jnp.max(jnp.abs(out - ref)))
    assert max_err < 5e-4, max_err
    print("KERNEL_OK")
</pallas_src>

<mosaic_0001>
module attributes {stable_mosaic.version = 11 : i64} {
  func.func @kernel(%arg0: i32, %arg1: i32, %arg2: memref<1x1x128xf32, #tpu.memory_space<vmem>>, %arg3: memref<1x1x384xf32, #tpu.memory_space<vmem>>, %arg4: memref<1x1x128xf32, #tpu.memory_space<vmem>>, %arg5: memref<3x32x1xf32, #tpu.memory_space<vmem>>, %arg6: memref<3x32x32xf32, #tpu.memory_space<vmem>>, %arg7: memref<3x32x32xf32, #tpu.memory_space<vmem>>, %arg8: memref<3x32x32xf32, #tpu.memory_space<vmem>>, %arg9: memref<3x1x32xf32, #tpu.memory_space<vmem>>, %arg10: memref<32x1xf32, #tpu.memory_space<vmem>>, %arg11: memref<32x1xf32, #tpu.memory_space<vmem>>, %arg12: memref<32x1xf32, #tpu.memory_space<vmem>>, %arg13: memref<32x1xf32, #tpu.memory_space<vmem>>, %arg14: memref<1x1xf32, #tpu.memory_space<vmem>>, %arg15: memref<1x1x384xf32, #tpu.memory_space<vmem>>) attributes {dimension_semantics = [#tpu.dimension_semantics<parallel>, #tpu.dimension_semantics<parallel>], iteration_bounds = array<i64: 2, 1>, scalar_prefetch = 0 : i64, scratch_operands = 0 : i64, tpu.core_type = #tpu.core_type<tc>, window_params = [{transform_indices = @transform_0, window_bounds = array<i64: 1, 1, 128>}, {transform_indices = @transform_1, window_bounds = array<i64: 1, 1, 384>}, {transform_indices = @transform_2, window_bounds = array<i64: 1, 1, 128>}, {pipeline_mode = #tpu.pipeline_mode<synchronous>, transform_indices = @transform_3, window_bounds = array<i64: 3, 32, 1>}, {pipeline_mode = #tpu.pipeline_mode<synchronous>, transform_indices = @transform_4, window_bounds = array<i64: 3, 32, 32>}, {pipeline_mode = #tpu.pipeline_mode<synchronous>, transform_indices = @transform_5, window_bounds = array<i64: 3, 32, 32>}, {pipeline_mode = #tpu.pipeline_mode<synchronous>, transform_indices = @transform_6, window_bounds = array<i64: 3, 32, 32>}, {pipeline_mode = #tpu.pipeline_mode<synchronous>, transform_indices = @transform_7, window_bounds = array<i64: 3, 1, 32>}, {pipeline_mode = #tpu.pipeline_mode<synchronous>, transform_indices = @transform_8, window_bounds = array<i64: 32, 1>}, {pipeline_mode = #tpu.pipeline_mode<synchronous>, transform_indices = @transform_9, window_bounds = array<i64: 32, 1>}, {pipeline_mode = #tpu.pipeline_mode<synchronous>, transform_indices = @transform_10, window_bounds = array<i64: 32, 1>}, {pipeline_mode = #tpu.pipeline_mode<synchronous>, transform_indices = @transform_11, window_bounds = array<i64: 32, 1>}, {pipeline_mode = #tpu.pipeline_mode<synchronous>, transform_indices = @transform_12, window_bounds = array<i64: 1, 1>}, {transform_indices = @transform_13, window_bounds = array<i64: 1, 1, 384>}]} {
    %c0 = arith.constant 0 : index
    %c0_0 = arith.constant 0 : index
    %c118 = arith.constant 118 : index
    %0 = vector.load %arg2[%c0, %c0_0, %c118] : memref<1x1x128xf32, #tpu.memory_space<vmem>>, vector<1x1x10xf32>
    %1 = vector.shape_cast %0 : vector<1x1x10xf32> to vector<1x10xf32>
    %c0_1 = arith.constant 0 : index
    %c0_2 = arith.constant 0 : index
    %c0_3 = arith.constant 0 : index
    %2 = vector.load %arg3[%c0_1, %c0_2, %c0_3] : memref<1x1x384xf32, #tpu.memory_space<vmem>>, vector<1x1x384xf32>
    %3 = vector.shape_cast %2 : vector<1x1x384xf32> to vector<1x384xf32>
    %c0_4 = arith.constant 0 : index
    %c0_5 = arith.constant 0 : index
    %c0_6 = arith.constant 0 : index
    %4 = vector.load %arg4[%c0_4, %c0_5, %c0_6] : memref<1x1x128xf32, #tpu.memory_space<vmem>>, vector<1x1x6xf32>
    %5 = vector.shape_cast %4 : vector<1x1x6xf32> to vector<1x6xf32>
    %6 = tpu.concatenate %1, %3, %5 in 1 : vector<1x10xf32>, vector<1x384xf32>, vector<1x6xf32> -> vector<1x400xf32>
    %7 = tpu.iota {dimensions = array<i32: 1>} : vector<1x400xi32>
    %c384_i32 = arith.constant 384 : i32
    %8 = arith.muli %arg1, %c384_i32 : i32
    %c10_i32 = arith.constant 10 : i32
    %9 = arith.subi %8, %c10_i32 : i32
    %10 = vector.broadcast %9 : i32 to vector<1x400xi32>
    %11 = arith.addi %7, %10 : vector<1x400xi32>
    %c0_i32 = arith.constant 0 : i32
    %12 = vector.broadcast %c0_i32 : i32 to vector<1x400xi32>
    %13 = arith.cmpi sge, %11, %12 : vector<1x400xi32>
    %c256_i32 = arith.constant 256 : i32
    %14 = vector.broadcast %c256_i32 : i32 to vector<1x400xi32>
    %15 = arith.cmpi slt, %11, %14 : vector<1x400xi32>
    %16 = arith.andi %13, %15 : vector<1x400xi1>
    %c0_7 = arith.constant 0 : index
    %c0_8 = arith.constant 0 : index
    %17 = vector.load %arg10[%c0_7, %c0_8] : memref<32x1xf32, #tpu.memory_space<vmem>>, vector<32x1xf32>
    %c0_9 = arith.constant 0 : index
    %c0_10 = arith.constant 0 : index
    %c0_11 = arith.constant 0 : index
    %18 = vector.load %arg5[%c0_9, %c0_10, %c0_11] : memref<3x32x1xf32, #tpu.memory_space<vmem>>, vector<1x32x1xf32>
    %19 = vector.shape_cast %18 : vector<1x32x1xf32> to vector<32x1xf32>
    %20 = vector.extract_strided_slice %6 {offsets = [0, 0], sizes = [1, 398], strides = [1, 1]} : vector<1x400xf32> to vector<1x398xf32>
    %21 = vector.broadcast %19 : vector<32x1xf32> to vector<32x398xf32>
    %22 = vector.broadcast %20 : vector<1x398xf32> to vector<32x398xf32>
    %23 = arith.mulf %21, %22 : vector<32x398xf32>
    %24 = vector.broadcast %17 : vector<32x1xf32> to vector<32x398xf32>
    %25 = arith.addf %24, %23 : vector<32x398xf32>
    %c1 = arith.constant 1 : index
    %c0_12 = arith.constant 0 : index
    %c0_13 = arith.constant 0 : index
    %26 = vector.load %arg5[%c1, %c0_12, %c0_13] : memref<3x32x1xf32, #tpu.memory_space<vmem>>, vector<1x32x1xf32>
    %27 = vector.shape_cast %26 : vector<1x32x1xf32> to vector<32x1xf32>
    %28 = vector.extract_strided_slice %6 {offsets = [0, 1], sizes = [1, 398], strides = [1, 1]} : vector<1x400xf32> to vector<1x398xf32>
    %29 = vector.broadcast %27 : vector<32x1xf32> to vector<32x398xf32>
    %30 = vector.broadcast %28 : vector<1x398xf32> to vector<32x398xf32>
    %31 = arith.mulf %29, %30 : vector<32x398xf32>
    %32 = arith.addf %25, %31 : vector<32x398xf32>
    %c2 = arith.constant 2 : index
    %c0_14 = arith.constant 0 : index
    %c0_15 = arith.constant 0 : index
    %33 = vector.load %arg5[%c2, %c0_14, %c0_15] : memref<3x32x1xf32, #tpu.memory_space<vmem>>, vector<1x32x1xf32>
    %34 = vector.shape_cast %33 : vector<1x32x1xf32> to vector<32x1xf32>
    %35 = vector.extract_strided_slice %6 {offsets = [0, 2], sizes = [1, 398], strides = [1, 1]} : vector<1x400xf32> to vector<1x398xf32>
    %36 = vector.broadcast %34 : vector<32x1xf32> to vector<32x398xf32>
    %37 = vector.broadcast %35 : vector<1x398xf32> to vector<32x398xf32>
    %38 = arith.mulf %36, %37 : vector<32x398xf32>
    %39 = arith.addf %32, %38 : vector<32x398xf32>
    %cst = arith.constant 0.000000e+00 : f32
    %40 = vector.broadcast %cst : f32 to vector<32x398xf32>
    %41 = arith.cmpf oge, %39, %40 : vector<32x398xf32>
    %cst_16 = arith.constant 2.000000e-01 : f32
    %42 = vector.broadcast %cst_16 : f32 to vector<32x398xf32>
    %43 = arith.mulf %42, %39 : vector<32x398xf32>
    %44 = arith.select %41, %39, %43 : vector<32x398xi1>, vector<32x398xf32>
    %45 = vector.extract_strided_slice %16 {offsets = [0, 1], sizes = [1, 398], strides = [1, 1]} : vector<1x400xi1> to vector<1x398xi1>
    %cst_17 = arith.constant 0.000000e+00 : f32
    %46 = vector.shape_cast %45 : vector<1x398xi1> to vector<1x398xi1>
    %47 = vector.broadcast %46 : vector<1x398xi1> to vector<32x398xi1>
    %48 = vector.broadcast %cst_17 : f32 to vector<32x398xf32>
    %49 = arith.select %47, %44, %48 : vector<32x398xi1>, vector<32x398xf32>
    %c0_18 = arith.constant 0 : index
    %c0_19 = arith.constant 0 : index
    %50 = vector.load %arg11[%c0_18, %c0_19] : memref<32x1xf32, #tpu.memory_space<vmem>>, vector<32x1xf32>
    %c0_20 = arith.constant 0 : index
    %c0_21 = arith.constant 0 : index
    %c0_22 = arith.constant 0 : index
    %51 = vector.load %arg6[%c0_20, %c0_21, %c0_22] : memref<3x32x32xf32, #tpu.memory_space<vmem>>, vector<1x32x32xf32>
    %52 = vector.shape_cast %51 : vector<1x32x32xf32> to vector<32x32xf32>
    %53 = vector.extract_strided_slice %49 {offsets = [0, 0], sizes = [32, 396], strides = [1, 1]} : vector<32x398xf32> to vector<32x396xf32>
    %cst_23 = arith.constant dense<0.000000e+00> : vector<32x396xf32>
    %54 = tpu.matmul %52, %53, %cst_23 {dimension_numbers = #tpu.dot_dimension_numbers<[1], [0], [0], [1], [0, 0, 1, 1], [], []>} : vector<32x32xf32>, vector<32x396xf32>, vector<32x396xf32> -> vector<32x396xf32>
    %55 = vector.broadcast %50 : vector<32x1xf32> to vector<32x396xf32>
    %56 = arith.addf %55, %54 : vector<32x396xf32>
    %c1_24 = arith.constant 1 : index
    %c0_25 = arith.constant 0 : index
    %c0_26 = arith.constant 0 : index
    %57 = vector.load %arg6[%c1_24, %c0_25, %c0_26] : memref<3x32x32xf32, #tpu.memory_space<vmem>>, vector<1x32x32xf32>
    %58 = vector.shape_cast %57 : vector<1x32x32xf32> to vector<32x32xf32>
    %59 = vector.extract_strided_slice %49 {offsets = [0, 1], sizes = [32, 396], strides = [1, 1]} : vector<32x398xf32> to vector<32x396xf32>
    %cst_27 = arith.constant dense<0.000000e+00> : vector<32x396xf32>
    %60 = tpu.matmul %58, %59, %cst_27 {dimension_numbers = #tpu.dot_dimension_numbers<[1], [0], [0], [1], [0, 0, 1, 1], [], []>} : vector<32x32xf32>, vector<32x396xf32>, vector<32x396xf32> -> vector<32x396xf32>
    %61 = arith.addf %56, %60 : vector<32x396xf32>
    %c2_28 = arith.constant 2 : index
    %c0_29 = arith.constant 0 : index
    %c0_30 = arith.constant 0 : index
    %62 = vector.load %arg6[%c2_28, %c0_29, %c0_30] : memref<3x32x32xf32, #tpu.memory_space<vmem>>, vector<1x32x32xf32>
    %63 = vector.shape_cast %62 : vector<1x32x32xf32> to vector<32x32xf32>
    %64 = vector.extract_strided_slice %49 {offsets = [0, 2], sizes = [32, 396], strides = [1, 1]} : vector<32x398xf32> to vector<32x396xf32>
    %cst_31 = arith.constant dense<0.000000e+00> : vector<32x396xf32>
    %65 = tpu.matmul %63, %64, %cst_31 {dimension_numbers = #tpu.dot_dimension_numbers<[1], [0], [0], [1], [0, 0, 1, 1], [], []>} : vector<32x32xf32>, vector<32x396xf32>, vector<32x396xf32> -> vector<32x396xf32>
    %66 = arith.addf %61, %65 : vector<32x396xf32>
    %cst_32 = arith.constant 0.000000e+00 : f32
    %67 = vector.broadcast %cst_32 : f32 to vector<32x396xf32>
    %68 = arith.cmpf oge, %66, %67 : vector<32x396xf32>
    %cst_33 = arith.constant 2.000000e-01 : f32
    %69 = vector.broadcast %cst_33 : f32 to vector<32x396xf32>
    %70 = arith.mulf %69, %66 : vector<32x396xf32>
    %71 = arith.select %68, %66, %70 : vector<32x396xi1>, vector<32x396xf32>
    %72 = vector.extract_strided_slice %16 {offsets = [0, 2], sizes = [1, 396], strides = [1, 1]} : vector<1x400xi1> to vector<1x396xi1>
    %cst_34 = arith.constant 0.000000e+00 : f32
    %73 = vector.shape_cast %72 : vector<1x396xi1> to vector<1x396xi1>
    %74 = vector.broadcast %73 : vector<1x396xi1> to vector<32x396xi1>
    %75 = vector.broadcast %cst_34 : f32 to vector<32x396xf32>
    %76 = arith.select %74, %71, %75 : vector<32x396xi1>, vector<32x396xf32>
    %c0_35 = arith.constant 0 : index
    %c0_36 = arith.constant 0 : index
    %77 = vector.load %arg12[%c0_35, %c0_36] : memref<32x1xf32, #tpu.memory_space<vmem>>, vector<32x1xf32>
    %c0_37 = arith.constant 0 : index
    %c0_38 = arith.constant 0 : index
    %c0_39 = arith.constant 0 : index
    %78 = vector.load %arg7[%c0_37, %c0_38, %c0_39] : memref<3x32x32xf32, #tpu.memory_space<vmem>>, vector<1x32x32xf32>
    %79 = vector.shape_cast %78 : vector<1x32x32xf32> to vector<32x32xf32>
    %80 = vector.extract_strided_slice %76 {offsets = [0, 0], sizes = [32, 392], strides = [1, 1]} : vector<32x396xf32> to vector<32x392xf32>
    %cst_40 = arith.constant dense<0.000000e+00> : vector<32x392xf32>
    %81 = tpu.matmul %79, %80, %cst_40 {dimension_numbers = #tpu.dot_dimension_numbers<[1], [0], [0], [1], [0, 0, 1, 1], [], []>} : vector<32x32xf32>, vector<32x392xf32>, vector<32x392xf32> -> vector<32x392xf32>
    %82 = vector.broadcast %77 : vector<32x1xf32> to vector<32x392xf32>
    %83 = arith.addf %82, %81 : vector<32x392xf32>
    %c1_41 = arith.constant 1 : index
    %c0_42 = arith.constant 0 : index
    %c0_43 = arith.constant 0 : index
    %84 = vector.load %arg7[%c1_41, %c0_42, %c0_43] : memref<3x32x32xf32, #tpu.memory_space<vmem>>, vector<1x32x32xf32>
    %85 = vector.shape_cast %84 : vector<1x32x32xf32> to vector<32x32xf32>
    %86 = vector.extract_strided_slice %76 {offsets = [0, 2], sizes = [32, 392], strides = [1, 1]} : vector<32x396xf32> to vector<32x392xf32>
    %cst_44 = arith.constant dense<0.000000e+00> : vector<32x392xf32>
    %87 = tpu.matmul %85, %86, %cst_44 {dimension_numbers = #tpu.dot_dimension_numbers<[1], [0], [0], [1], [0, 0, 1, 1], [], []>} : vector<32x32xf32>, vector<32x392xf32>, vector<32x392xf32> -> vector<32x392xf32>
    %88 = arith.addf %83, %87 : vector<32x392xf32>
    %c2_45 = arith.constant 2 : index
    %c0_46 = arith.constant 0 : index
    %c0_47 = arith.constant 0 : index
    %89 = vector.load %arg7[%c2_45, %c0_46, %c0_47] : memref<3x32x32xf32, #tpu.memory_space<vmem>>, vector<1x32x32xf32>
    %90 = vector.shape_cast %89 : vector<1x32x32xf32> to vector<32x32xf32>
    %91 = vector.extract_strided_slice %76 {offsets = [0, 4], sizes = [32, 392], strides = [1, 1]} : vector<32x396xf32> to vector<32x392xf32>
    %cst_48 = arith.constant dense<0.000000e+00> : vector<32x392xf32>
    %92 = tpu.matmul %90, %91, %cst_48 {dimension_numbers = #tpu.dot_dimension_numbers<[1], [0], [0], [1], [0, 0, 1, 1], [], []>} : vector<32x32xf32>, vector<32x392xf32>, vector<32x392xf32> -> vector<32x392xf32>
    %93 = arith.addf %88, %92 : vector<32x392xf32>
    %cst_49 = arith.constant 0.000000e+00 : f32
    %94 = vector.broadcast %cst_49 : f32 to vector<32x392xf32>
    %95 = arith.cmpf oge, %93, %94 : vector<32x392xf32>
    %cst_50 = arith.constant 2.000000e-01 : f32
    %96 = vector.broadcast %cst_50 : f32 to vector<32x392xf32>
    %97 = arith.mulf %96, %93 : vector<32x392xf32>
    %98 = arith.select %95, %93, %97 : vector<32x392xi1>, vector<32x392xf32>
    %99 = vector.extract_strided_slice %16 {offsets = [0, 4], sizes = [1, 392], strides = [1, 1]} : vector<1x400xi1> to vector<1x392xi1>
    %cst_51 = arith.constant 0.000000e+00 : f32
    %100 = vector.shape_cast %99 : vector<1x392xi1> to vector<1x392xi1>
    %101 = vector.broadcast %100 : vector<1x392xi1> to vector<32x392xi1>
    %102 = vector.broadcast %cst_51 : f32 to vector<32x392xf32>
    %103 = arith.select %101, %98, %102 : vector<32x392xi1>, vector<32x392xf32>
    %c0_52 = arith.constant 0 : index
    %c0_53 = arith.constant 0 : index
    %104 = vector.load %arg13[%c0_52, %c0_53] : memref<32x1xf32, #tpu.memory_space<vmem>>, vector<32x1xf32>
    %c0_54 = arith.constant 0 : index
    %c0_55 = arith.constant 0 : index
    %c0_56 = arith.constant 0 : index
    %105 = vector.load %arg8[%c0_54, %c0_55, %c0_56] : memref<3x32x32xf32, #tpu.memory_space<vmem>>, vector<1x32x32xf32>
    %106 = vector.shape_cast %105 : vector<1x32x32xf32> to vector<32x32xf32>
    %107 = vector.extract_strided_slice %103 {offsets = [0, 0], sizes = [32, 386], strides = [1, 1]} : vector<32x392xf32> to vector<32x386xf32>
    %cst_57 = arith.constant dense<0.000000e+00> : vector<32x386xf32>
    %108 = tpu.matmul %106, %107, %cst_57 {dimension_numbers = #tpu.dot_dimension_numbers<[1], [0], [0], [1], [0, 0, 1, 1], [], []>} : vector<32x32xf32>, vector<32x386xf32>, vector<32x386xf32> -> vector<32x386xf32>
    %109 = vector.broadcast %104 : vector<32x1xf32> to vector<32x386xf32>
    %110 = arith.addf %109, %108 : vector<32x386xf32>
    %c1_58 = arith.constant 1 : index
    %c0_59 = arith.constant 0 : index
    %c0_60 = arith.constant 0 : index
    %111 = vector.load %arg8[%c1_58, %c0_59, %c0_60] : memref<3x32x32xf32, #tpu.memory_space<vmem>>, vector<1x32x32xf32>
    %112 = vector.shape_cast %111 : vector<1x32x32xf32> to vector<32x32xf32>
    %113 = vector.extract_strided_slice %103 {offsets = [0, 3], sizes = [32, 386], strides = [1, 1]} : vector<32x392xf32> to vector<32x386xf32>
    %cst_61 = arith.constant dense<0.000000e+00> : vector<32x386xf32>
    %114 = tpu.matmul %112, %113, %cst_61 {dimension_numbers = #tpu.dot_dimension_numbers<[1], [0], [0], [1], [0, 0, 1, 1], [], []>} : vector<32x32xf32>, vector<32x386xf32>, vector<32x386xf32> -> vector<32x386xf32>
    %115 = arith.addf %110, %114 : vector<32x386xf32>
    %c2_62 = arith.constant 2 : index
    %c0_63 = arith.constant 0 : index
    %c0_64 = arith.constant 0 : index
    %116 = vector.load %arg8[%c2_62, %c0_63, %c0_64] : memref<3x32x32xf32, #tpu.memory_space<vmem>>, vector<1x32x32xf32>
    %117 = vector.shape_cast %116 : vector<1x32x32xf32> to vector<32x32xf32>
    %118 = vector.extract_strided_slice %103 {offsets = [0, 6], sizes = [32, 386], strides = [1, 1]} : vector<32x392xf32> to vector<32x386xf32>
    %cst_65 = arith.constant dense<0.000000e+00> : vector<32x386xf32>
    %119 = tpu.matmul %117, %118, %cst_65 {dimension_numbers = #tpu.dot_dimension_numbers<[1], [0], [0], [1], [0, 0, 1, 1], [], []>} : vector<32x32xf32>, vector<32x386xf32>, vector<32x386xf32> -> vector<32x386xf32>
    %120 = arith.addf %115, %119 : vector<32x386xf32>
    %cst_66 = arith.constant 0.000000e+00 : f32
    %121 = vector.broadcast %cst_66 : f32 to vector<32x386xf32>
    %122 = arith.cmpf oge, %120, %121 : vector<32x386xf32>
    %cst_67 = arith.constant 2.000000e-01 : f32
    %123 = vector.broadcast %cst_67 : f32 to vector<32x386xf32>
    %124 = arith.mulf %123, %120 : vector<32x386xf32>
    %125 = arith.select %122, %120, %124 : vector<32x386xi1>, vector<32x386xf32>
    %126 = vector.extract_strided_slice %16 {offsets = [0, 7], sizes = [1, 386], strides = [1, 1]} : vector<1x400xi1> to vector<1x386xi1>
    %cst_68 = arith.constant 0.000000e+00 : f32
    %127 = vector.shape_cast %126 : vector<1x386xi1> to vector<1x386xi1>
    %128 = vector.broadcast %127 : vector<1x386xi1> to vector<32x386xi1>
    %129 = vector.broadcast %cst_68 : f32 to vector<32x386xf32>
    %130 = arith.select %128, %125, %129 : vector<32x386xi1>, vector<32x386xf32>
    %c0_69 = arith.constant 0 : index
    %c0_70 = arith.constant 0 : index
    %131 = vector.load %arg14[%c0_69, %c0_70] : memref<1x1xf32, #tpu.memory_space<vmem>>, vector<1x1xf32>
    %c0_71 = arith.constant 0 : index
    %c0_72 = arith.constant 0 : index
    %c0_73 = arith.constant 0 : index
    %132 = vector.load %arg9[%c0_71, %c0_72, %c0_73] : memref<3x1x32xf32, #tpu.memory_space<vmem>>, vector<1x1x32xf32>
    %133 = vector.shape_cast %132 : vector<1x1x32xf32> to vector<1x32xf32>
    %134 = vector.extract_strided_slice %130 {offsets = [0, 0], sizes = [32, 384], strides = [1, 1]} : vector<32x386xf32> to vector<32x384xf32>
    %cst_74 = arith.constant dense<0.000000e+00> : vector<1x384xf32>
    %135 = tpu.matmul %133, %134, %cst_74 {dimension_numbers = #tpu.dot_dimension_numbers<[1], [0], [0], [1], [0, 0, 1, 1], [], []>} : vector<1x32xf32>, vector<32x384xf32>, vector<1x384xf32> -> vector<1x384xf32>
    %136 = vector.broadcast %131 : vector<1x1xf32> to vector<1x384xf32>
    %137 = arith.addf %136, %135 : vector<1x384xf32>
    %c1_75 = arith.constant 1 : index
    %c0_76 = arith.constant 0 : index
    %c0_77 = arith.constant 0 : index
    %138 = vector.load %arg9[%c1_75, %c0_76, %c0_77] : memref<3x1x32xf32, #tpu.memory_space<vmem>>, vector<1x1x32xf32>
    %139 = vector.shape_cast %138 : vector<1x1x32xf32> to vector<1x32xf32>
    %140 = vector.extract_strided_slice %130 {offsets = [0, 1], sizes = [32, 384], strides = [1, 1]} : vector<32x386xf32> to vector<32x384xf32>
    %cst_78 = arith.constant dense<0.000000e+00> : vector<1x384xf32>
    %141 = tpu.matmul %139, %140, %cst_78 {dimension_numbers = #tpu.dot_dimension_numbers<[1], [0], [0], [1], [0, 0, 1, 1], [], []>} : vector<1x32xf32>, vector<32x384xf32>, vector<1x384xf32> -> vector<1x384xf32>
    %142 = arith.addf %137, %141 : vector<1x384xf32>
    %c2_79 = arith.constant 2 : index
    %c0_80 = arith.constant 0 : index
    %c0_81 = arith.constant 0 : index
    %143 = vector.load %arg9[%c2_79, %c0_80, %c0_81] : memref<3x1x32xf32, #tpu.memory_space<vmem>>, vector<1x1x32xf32>
    %144 = vector.shape_cast %143 : vector<1x1x32xf32> to vector<1x32xf32>
    %145 = vector.extract_strided_slice %130 {offsets = [0, 2], sizes = [32, 384], strides = [1, 1]} : vector<32x386xf32> to vector<32x384xf32>
    %cst_82 = arith.constant dense<0.000000e+00> : vector<1x384xf32>
    %146 = tpu.matmul %144, %145, %cst_82 {dimension_numbers = #tpu.dot_dimension_numbers<[1], [0], [0], [1], [0, 0, 1, 1], [], []>} : vector<1x32xf32>, vector<32x384xf32>, vector<1x384xf32> -> vector<1x384xf32>
    %147 = arith.addf %142, %146 : vector<1x384xf32>
    %c0_83 = arith.constant 0 : index
    %c0_84 = arith.constant 0 : index
    %c0_85 = arith.constant 0 : index
    %148 = vector.load %arg15[%c0_83, %c0_84, %c0_85] : memref<1x1x384xf32, #tpu.memory_space<vmem>>, vector<1x1x384xf32>
    %149 = vector.shape_cast %148 : vector<1x1x384xf32> to vector<1x384xf32>
    %150 = vector.shape_cast %147 : vector<1x384xf32> to vector<1x1x384xf32>
    tpu.vector_store %arg15[%c0_83, %c0_84, %c0_85], %150 {strides = array<i32>} : memref<1x1x384xf32, #tpu.memory_space<vmem>>, vector<1x1x384xf32>,
    return
  }
  func.func @transform_0(%arg0: i32, %arg1: i32) -> (i32, i32, i32) {
    %c1_i32 = arith.constant 1 : i32
    %0 = arith.addi %arg1, %c1_i32 : i32
    %c3_i32 = arith.constant 3 : i32
    %1 = arith.muli %0, %c3_i32 : i32
    %c1_i32_0 = arith.constant 1 : i32
    %2 = arith.subi %1, %c1_i32_0 : i32
    %c0_i32 = arith.constant 0 : i32
    %c0_i32_1 = arith.constant 0 : i32
    return %arg0, %c0_i32, %2 : i32, i32, i32
  }
  func.func @transform_1(%arg0: i32, %arg1: i32) -> (i32, i32, i32) {
    %c1_i32 = arith.constant 1 : i32
    %0 = arith.addi %arg1, %c1_i32 : i32
    %c0_i32 = arith.constant 0 : i32
    %c0_i32_0 = arith.constant 0 : i32
    return %arg0, %c0_i32, %0 : i32, i32, i32
  }
  func.func @transform_2(%arg0: i32, %arg1: i32) -> (i32, i32, i32) {
    %c2_i32 = arith.constant 2 : i32
    %0 = arith.addi %arg1, %c2_i32 : i32
    %c3_i32 = arith.constant 3 : i32
    %1 = arith.muli %0, %c3_i32 : i32
    %c0_i32 = arith.constant 0 : i32
    %c0_i32_0 = arith.constant 0 : i32
    return %arg0, %c0_i32, %1 : i32, i32, i32
  }
  func.func @transform_3(%arg0: i32, %arg1: i32) -> (i32, i32, i32) {
    %c0_i32 = arith.constant 0 : i32
    %c0_i32_0 = arith.constant 0 : i32
    %c0_i32_1 = arith.constant 0 : i32
    %c0_i32_2 = arith.constant 0 : i32
    return %c0_i32, %c0_i32_0, %c0_i32_1 : i32, i32, i32
  }
  func.func @transform_4(%arg0: i32, %arg1: i32) -> (i32, i32, i32) {
    %c0_i32 = arith.constant 0 : i32
    %c0_i32_0 = arith.constant 0 : i32
    %c0_i32_1 = arith.constant 0 : i32
    %c0_i32_2 = arith.constant 0 : i32
    return %c0_i32, %c0_i32_0, %c0_i32_1 : i32, i32, i32
  }
  func.func @transform_5(%arg0: i32, %arg1: i32) -> (i32, i32, i32) {
    %c0_i32 = arith.constant 0 : i32
    %c0_i32_0 = arith.constant 0 : i32
    %c0_i32_1 = arith.constant 0 : i32
    %c0_i32_2 = arith.constant 0 : i32
    return %c0_i32, %c0_i32_0, %c0_i32_1 : i32, i32, i32
  }
  func.func @transform_6(%arg0: i32, %arg1: i32) -> (i32, i32, i32) {
    %c0_i32 = arith.constant 0 : i32
    %c0_i32_0 = arith.constant 0 : i32
    %c0_i32_1 = arith.constant 0 : i32
    %c0_i32_2 = arith.constant 0 : i32
    return %c0_i32, %c0_i32_0, %c0_i32_1 : i32, i32, i32
  }
  func.func @transform_7(%arg0: i32, %arg1: i32) -> (i32, i32, i32) {
    %c0_i32 = arith.constant 0 : i32
    %c0_i32_0 = arith.constant 0 : i32
    %c0_i32_1 = arith.constant 0 : i32
    %c0_i32_2 = arith.constant 0 : i32
    return %c0_i32, %c0_i32_0, %c0_i32_1 : i32, i32, i32
  }
  func.func @transform_8(%arg0: i32, %arg1: i32) -> (i32, i32) {
    %c0_i32 = arith.constant 0 : i32
    %c0_i32_0 = arith.constant 0 : i32
    %c0_i32_1 = arith.constant 0 : i32
    return %c0_i32, %c0_i32_0 : i32, i32
  }
  func.func @transform_9(%arg0: i32, %arg1: i32) -> (i32, i32) {
    %c0_i32 = arith.constant 0 : i32
    %c0_i32_0 = arith.constant 0 : i32
    %c0_i32_1 = arith.constant 0 : i32
    return %c0_i32, %c0_i32_0 : i32, i32
  }
  func.func @transform_10(%arg0: i32, %arg1: i32) -> (i32, i32) {
    %c0_i32 = arith.constant 0 : i32
    %c0_i32_0 = arith.constant 0 : i32
    %c0_i32_1 = arith.constant 0 : i32
    return %c0_i32, %c0_i32_0 : i32, i32
  }
  func.func @transform_11(%arg0: i32, %arg1: i32) -> (i32, i32) {
    %c0_i32 = arith.constant 0 : i32
    %c0_i32_0 = arith.constant 0 : i32
    %c0_i32_1 = arith.constant 0 : i32
    return %c0_i32, %c0_i32_0 : i32, i32
  }
  func.func @transform_12(%arg0: i32, %arg1: i32) -> (i32, i32) {
    %c0_i32 = arith.constant 0 : i32
    %c0_i32_0 = arith.constant 0 : i32
    %c0_i32_1 = arith.constant 0 : i32
    return %c0_i32, %c0_i32_0 : i32, i32
  }
  func.func @transform_13(%arg0: i32, %arg1: i32) -> (i32, i32, i32) {
    %c0_i32 = arith.constant 0 : i32
    %c0_i32_0 = arith.constant 0 : i32
    return %arg0, %c0_i32, %arg1 : i32, i32, i32
  }
}

</mosaic_0001>

<bundles_post_ra>
// kernel: discriminator_forward.1
= control target key start
LH: loop header
LB: loop body
LE: loop exit
PB: predicated region body
PF: predicated region fallthrough
CT: control target
= control target key end

     0   :  { %s6926_s0 = inlined_call_operand.vmem [shape: f32[2,1,1152], index: 0, kind: input, shape index: {}, may-alias: {0,1,2}]   ;;  %s6927_s1 = inlined_call_operand.vmem [shape: f32[2,1,1152], index: 1, kind: input, shape index: {}, may-alias: {0,1,2}]   ;;  %s6928_s2 = inlined_call_operand.vmem [shape: f32[2,1,1152], index: 2, kind: input, shape index: {}, may-alias: {0,1,2}]   ;;  %s6929_s3 = inlined_call_operand.vmem [shape: f32[3,32,1], index: 3, kind: input, shape index: {}]   ;;  %s6930_s4 = inlined_call_operand.vmem [shape: f32[3,32,32], index: 4, kind: input, shape index: {}]   ;;  %s6931_s5 = inlined_call_operand.vmem [shape: f32[3,32,32], index: 5, kind: input, shape index: {}]   ;;  %s6932_s6 = inlined_call_operand.hbm [shape: f32[3,32,32], index: 6, kind: input, shape index: {}]   ;;  %s6933_s7 = inlined_call_operand.vmem [shape: f32[3,1,32], index: 7, kind: input, shape index: {}]   ;;  %s6934_s8 = inlined_call_operand.vmem [shape: f32[32,1], index: 8, kind: input, shape index: {}]   ;;  %s6935_s9 = inlined_call_operand.vmem [shape: f32[32,1], index: 9, kind: input, shape index: {}]   ;;  %s6936_s10 = inlined_call_operand.vmem [shape: f32[32,1], index: 10, kind: input, shape index: {}]   ;;  %s6937_s11 = inlined_call_operand.vmem [shape: f32[32,1], index: 11, kind: input, shape index: {}]   ;;  %s6938_s12 = inlined_call_operand.<no memory space> [shape: f32[1,1], index: 12, kind: input, shape index: {}]   ;;  %s6939_s13 = inlined_call_operand.hbm [shape: f32[2,1,384], index: 13, kind: output, shape index: {}]  }
   0x1   :  { %6943 = sst [smem:[#allocation13_spill]] %s6932_s6  ;;  %v18_v0 = vstv %s6938_s12 }
   0x2   :  { %19 = vst [vmem:[#allocation2] sm:$0x1] %v18_v0 }
   0x3   :  { %20 = vsyncpa [#allocation4], 0 }
   0x4   :  { %21 = vsyncpa [#allocation5], 0 }
   0x5   :  { %23 = vsyncpa [#allocation5 + $0x1], 0  ;;  %s5510_s27 = smov 0   ;;  %s5512_s28 = smov 0  }
   0x6   :  { %s5514_s29 = smov 0   ;;  %s5516_s30 = smov 0  }
   0x7   :  { %s5518_s14 = smov 0   ;;  %s5520_s15 = smov 0  }
   0x8 LB: > { %6944 = sst [smem:[#allocation9_spill]] %s5401_s29  ;;  %s4957_s12 = sadd.s32 4294967295, %s5413_s15   ;;  %s5413_s15 = sphi %s5520_s15, %s29_s15   ;;  %s5409_s14 = sphi %s5518_s14, %s6956_s14   ;;  %s5405_s30 = sphi %s5516_s30, %s6955_s30   ;;  %s5401_s29 = sphi %s5514_s29, %s6954_s29   ;;  %s5397_s28 = sphi %s5512_s28, %s6958_s28   ;;  %s5393_s27 = sphi %s5510_s27, %s6957_s27  }
   0x9   : > { %6945 = sst [smem:[#allocation10_spill]] %s5409_s14  ;;  %s4958_s16 = sadd.s32 4294967294, %s5413_s15  }
   0xa   : > { %s41_s17 = sadd.s32 1, %s5409_s14  ;;  %s356_s18 = sadd.s32 1, %s5401_s29 }
   0xb   : > { %p43_p0 = scmp.ge.s32.totalorder %s41_s17, 2  ;;  %p366_p1 = scmp.ne.s32.totalorder %s5401_s29, %s5397_s28 }
   0xc   : > { %p367_p2 = scmp.eq.s32.totalorder %s4957_s12, 1  ;;  %p372_p3 = scmp.ne.s32.totalorder %s5397_s28, %s5393_s27 }
   0xd   : > { %s6960_s17 = smov (%p43_p0, %s41_s17), 0  ;;  %p373_p5 = scmp.eq.s32.totalorder %s4958_s16, 1 }
   0xe   : > { %6946 = sst [smem:[#allocation11_spill]] %s6960_s17  ;;  %p5550_p4 = por %p367_p2, %p366_p1 }
   0xf   : > { %s351_s20 = ssub.s32 %s5409_s14, %s6960_s17  ;;  %p4959_p6 = scmp.ge.s32.totalorder %s5413_s15, 1 }
  0x10   : > { %p354_p7 = scmp.eq.s32.totalorder %s351_s20, 0  ;;  %p5557_p8 = por %p373_p5, %p372_p3 }
  0x11   : > { %p380_p9 = scmp.lt.s32.totalorder %s5413_s15, 3  ;;  %p5569_p11 = scmp.eq.s32.totalorder %s4957_s12, 0 }
  0x12   : > { %s5563_s22 = scalar_select %p354_p7, %s5401_s29, %s356_s18  }
  0x13   : > { %p5565_p10 = pnand %p4959_p6, %p380_p9  ;;  %s5415_s25 = smov [#allocation3]  }
  0x14   : > { %6949 = sst [smem:[#allocation12_spill]] %s5563_s22  ;;  %s401_s26 = sshll.u32 %s5415_s25, 4  ;;  %s402_s26 = int_to_ptr.vmem [resolvable:$true] %s401_s26 }
  0x15   : > { %p5130_p12 = pneg %p5565_p10  ;;  %s5318_s16 = scalar_lea.vmem %s402_s26, 1536 }
  0x16   : > { %p5319_p1 = scmp.ne.s32.totalorder %s402_s26, %s5318_s16  ;;  %p5326_p5 = scmp.lt.s32.totalorder %s402_s26, %s402_s26 }
  0x17   : > { %p5131_p13 = pnand %p5569_p11, %p5130_p12  ;;  %p5327_p6 = scmp.lt.s32.totalorder %s5318_s16, %s5318_s16 }
  0x19   : > { %p5309_p0 = pneg %p5131_p13  ;;  %p5328_p7 = por %p5327_p6, %p5326_p5 }
  0x1b   : > { %p5321_p2 = pnand %p5319_p1, %p5309_p0 }
  0x1d   : > { %p5322_p3 = pneg %p5321_p2 }
  0x1f   : > { %p5329_p9 = pnand %p5328_p7, %p5322_p3 }
  0x21   : > { %5332 = shalt.err (!%p5329_p9)
}
  0x22   : > { %s5416_s12 = smov 128   ;;  %s5417_s18 = smov 8  }
  0x23   : > { %s6952_s6 = sld [smem:[#allocation13_spill]] }
  0x25   : > { %479 = sbr.rel (%p5565_p10) target bundleno = 2468 (0x9a4), region = 72 }
  0x29   : > { %5133 = dma.hbm_to_vmem [thread:$0]  (!%p5131_p13), %s6952_s6, 1536, %s402_s26, [#allocation4], %s5416_s12, %s5416_s12, %s5417_s18  }
  0x2a   : > { %5384 = dma.done.wait (%p5569_p11), [#allocation4], 1536  }
  0x2b   : > { %5386 = vsyncadd (%p5569_p11), [#allocation4], 4294965760  ;;  %p549_p12 = scmp.lt.s32.totalorder %s5405_s30, 1  ;;  %v594_v1 = vlaneseq  ;;  %v5418_v2 = vmov 0   ;;  %v4969_v5 = vld [vmem:[%s6929_s3 + $0x38] sm:$0xff]  ;;  %v4968_v6 = vld [vmem:[%s6929_s3 + $0x30] sm:$0xff] }
  0x2c   : > { %5211 = vset.pattern.permute.xlu1 %v5418_v2  ;;  %5210 = vset.pattern.permute.xlu0 %v5418_v2  ;;  %s5419_s12 = smov 10   ;;  %v4973_v14 = vld [vmem:[%s6929_s3 + $0x58] sm:$0xff]  ;;  %v4967_v16 = vld [vmem:[%s6929_s3 + $0x28] sm:$0xff]  ;;  %v4972_v17 = vld [vmem:[%s6929_s3 + $0x50] sm:$0xff]  ;;  %vm612_vm0 = vcmask 80896   ;;  %vm838_vm1 = vcmask 1039360  }
  0x2d   : > { %s550_s25 = scalar_select %p549_p12, %s5405_s30, 1  ;;  %v5589_v3 = vshrl.u32 %v594_v1, 7  ;;  %771 = vperm.xlu0 %5210, %v4969_v5   ;;  %766 = vperm.xlu1 %5211, %v4968_v6   ;;  %v4966_v18 = vld [vmem:[%s6929_s3 + $0x20] sm:$0xff]  ;;  %v4971_v19 = vld [vmem:[%s6929_s3 + $0x48] sm:$0xff]  ;;  %v660_v21 = vld [vmem:[%s6929_s3 + $0x18] sm:$0xff]  ;;  %vm972_vm2 = vcmask 1031168  }
  0x2e   : > { %v4970_v20 = vld [vmem:[%s6929_s3 + $0x40] sm:$0xff]  ;;  %v659_v22 = vld [vmem:[%s6929_s3 + $0x10] sm:$0xff]  ;;  %v656_v23 = vld [vmem:[%s6934_s8 + $0x18] sm:$0xff]  ;;  %s5423_s24 = smov 1   ;;  %vm1121_vm15 = vcmask 7168   ;;  %s5424_s18 = smov 125  }
  0x2f   : > { %s5122_s17 = smul.u32 9, %s550_s25  ;;  %v600_v4 = vsub.s32 1, %v5589_v3  ;;  %v604_v8 = vsub.s32 2, %v5589_v3  ;;  %v5606_v9 = vsub.s32 0, %v5589_v3  ;;  %v658_v24 = vld [vmem:[%s6929_s3 + $0x8] sm:$0xff]  ;;  %v655_v25 = vld [vmem:[%s6934_s8 + $0x10] sm:$0xff] }
  0x30   : > { %v657_v26 = vld [vmem:[%s6929_s3] sm:$0xff]  ;;  %v654_v27 = vld [vmem:[%s6934_s8 + $0x8] sm:$0xff]  ;;  %s5432_s29 = smov 120   ;;  %s543_s20 = sand.u32 1, %s5397_s28  }
  0x31   : > { %s577_s23 = sadd.s32 6, %s5122_s17  ;;  %s566_s26 = sadd.s32 3, %s5122_s17  ;;  %v653_v28 = vld [vmem:[%s6934_s8] sm:$0xff] }
  0x32   : > { %s578_s14 = scalar_lea.vmem %s6928_s2, %s577_s23  ;;  %s567_s25 = scalar_lea.vmem %s6927_s1, %s566_s26 }
  0x33   : > { %v583_v7 = vld [vmem:[%s567_s25] sm:$0x7]  ;;  %s554_s16 = sadd.s32 2, %s5122_s17  ;;  %s5421_s17 = smov 126  }
  0x34   : > { %v4965_v10 = vld [vmem:[%s578_s14] ss:$0 sm:$0xff]  ;;  %v601_v11 = vrot.slane %v583_v7, %v600_v4  ;;  %v605_v12 = vrot.slane %v583_v7, %v604_v8  ;;  %v597_v13 = vrot.slane %v583_v7, %v5606_v9  ;;  %s555_s22 = scalar_lea.vmem %s6926_s0, %s554_s16  ;;  %s5420_s14 = smov 127  }
  0x35   : > { %624 = vrot.lane.b32.xlu0 %v4965_v10, %s5419_s12  ;;  %v4964_v15 = vld [vmem:[%s555_s22] ss:$0 sm:$0xff]  ;;  %s5425_s26 = smov 2   ;;  %s5428_s22 = smov 4  }
  0x36   : > { %608 = vrot.lane.b32.xlu1 %v601_v11, %s5419_s12  ;;  %s5429_s23 = smov 121   ;;  %s5121_s25 = smul.u32 3, %s543_s20 }
  0x37   : > { %s5123_s16 = smul.u32 48, %s5405_s30 }
  0x38   : > { %s545_s6 = scalar_lea.vmem [#allocation6], %s5121_s25 }
  0x39   : > { %606 = vrot.lane.b32.xlu0 %v597_v13, %s5419_s12 }
  0x3a   : > { %610 = vrot.lane.b32.xlu1 %v605_v12, %s5419_s12 }
  0x3d   : > { %905 = vperm.xlu0 %5210, %v4973_v14  }
  0x3e   : > { %590 = vrot.lane.b32.xlu1 %v4964_v15, %s5419_s12  ;;  %s5431_s12 = smov 7  }
  0x41   : > { %761 = vperm.xlu0 %5210, %v4967_v16  }
  0x42   : > { %900 = vperm.xlu1 %5211, %v4972_v17  }
  0x45   : > { %756 = vperm.xlu0 %5210, %v4966_v18  }
  0x46   : > { %895 = vperm.xlu1 %5211, %v4971_v19   ;;  %v5422_v19 = vmov 0.0  }
  0x47   : > { %1416 = vmatprep.mubr.f32.mxu1 %v5422_v19  ;;  %1327 = vmatprep.mubr.f32.mxu0 %v5422_v19 }
  0x49   : > { %890 = vperm.xlu0 %5210, %v4970_v20  }
  0x4a   : > { %678 = vperm.xlu1 %5211, %v660_v21  }
  0x4d   : > { %673 = vperm.xlu0 %5210, %v659_v22  }
  0x4e   : > { %730 = vperm.xlu1 %5211, %v656_v23  }
  0x51   : > { %668 = vperm.xlu0 %5210, %v658_v24  }
  0x52   : > { %725 = vperm.xlu1 %5211, %v655_v25  }
  0x55   : > { %663 = vperm.xlu0 %5210, %v657_v26  }
  0x56   : > { %720 = vperm.xlu1 %5211, %v654_v27  }
  0x59   : > { %715 = vperm.xlu0 %5210, %v653_v28  }
  0xa8   : > { %v772_v29 = vpop.permute.xlu0 %771  ;;  %v767_v30 = vpop.permute.xlu1 %766 }
  0xac   : > { %v625_v31 = vpop.permute.xlu0 %624  ;;  %v609_v32 = vpop.permute.xlu1 %608 }
  0xb0   : > { %v611_v33 = vpop.permute.xlu1 %610  ;;  %v607_v34 = vpop.permute.xlu0 %606 }
  0xb1   : > { %v614_v35 = vsel %vm612_vm0, %v609_v32, %v611_v33  ;;  %v628_v36 = vsel %vm612_vm0, %v611_v33, %v625_v31  ;;  %v613_v37 = vsel %vm612_vm0, %v607_v34, %v609_v32 }
  0xb2   : > { %v5655_v38 = vrot.slane %v614_v35, %v5606_v9  ;;  %v5658_v39 = vrot.slane %v613_v37, %v5606_v9  ;;  %v5661_v40 = vrot.slane %v628_v36, %v5606_v9 }
  0xb4   : > { %v591_v41 = vpop.permute.xlu1 %590  ;;  %v788_v42 = vmul.f32 %v772_v29, %v5655_v38  ;;  %v787_v43 = vmul.f32 %v772_v29, %v5658_v39  ;;  %v789_v46 = vmul.f32 %v772_v29, %v5661_v40  ;;  %v783_v48 = vmul.f32 %v767_v30, %v5658_v39 }
  0xb5   : > { %v627_v44 = vsel %vm612_vm0, %v591_v41, %v607_v34  ;;  %v784_v49 = vmul.f32 %v767_v30, %v5655_v38  ;;  %v785_v51 = vmul.f32 %v767_v30, %v5661_v40 }
  0xb6   : > { %v5666_v45 = vrot.slane %v627_v44, %v5606_v9  ;;  %834 = vrot.lane.b32.xlu0 %v788_v42, %s5420_s14  ;;  %832 = vrot.lane.b32.xlu1 %v787_v43, %s5420_s14 }
  0xb8   : > { %v786_v47 = vmul.f32 %v772_v29, %v5666_v45  ;;  %v906_v50 = vpop.permute.xlu0 %905  ;;  %v782_v56 = vmul.f32 %v767_v30, %v5666_v45 }
  0xb9   : > { %v921_v52 = vmul.f32 %v906_v50, %v5658_v39  ;;  %v922_v53 = vmul.f32 %v906_v50, %v5655_v38  ;;  %v923_v54 = vmul.f32 %v906_v50, %v5661_v40  ;;  %v920_v55 = vmul.f32 %v906_v50, %v5666_v45 }
  0xba   : > { %836 = vrot.lane.b32.xlu1 %v789_v46, %s5420_s14  ;;  %830 = vrot.lane.b32.xlu0 %v786_v47, %s5420_s14 }
  0xbc   : > { %v762_v57 = vpop.permute.xlu0 %761 }
  0xbd   : > { %v780_v58 = vmul.f32 %v762_v57, %v5655_v38  ;;  %v779_v59 = vmul.f32 %v762_v57, %v5658_v39  ;;  %v901_v60 = vpop.permute.xlu1 %900  ;;  %v781_v61 = vmul.f32 %v762_v57, %v5661_v40  ;;  %v778_v2 = vmul.f32 %v762_v57, %v5666_v45 }
  0xbe   : > { %824 = vrot.lane.b32.xlu1 %v783_v48, %s5420_s14  ;;  %826 = vrot.lane.b32.xlu0 %v784_v49, %s5420_s14  ;;  %v917_v62 = vmul.f32 %v901_v60, %v5658_v39  ;;  %v918_v63 = vmul.f32 %v901_v60, %v5655_v38  ;;  %v919_v0 = vmul.f32 %v901_v60, %v5661_v40 }
  0xbf   : > { %v916_v4 = vmul.f32 %v901_v60, %v5666_v45 }
  0xc0   : > { %v757_v5 = vpop.permute.xlu0 %756 }
  0xc1   : > { %v775_v6 = vmul.f32 %v757_v5, %v5658_v39  ;;  %v776_v7 = vmul.f32 %v757_v5, %v5655_v38  ;;  %v896_v8 = vpop.permute.xlu1 %895  ;;  %v777_v10 = vmul.f32 %v757_v5, %v5661_v40  ;;  %v774_v14 = vmul.f32 %v757_v5, %v5666_v45 }
  0xc2   : > { %828 = vrot.lane.b32.xlu1 %v785_v51, %s5420_s14  ;;  %966 = vrot.lane.b32.xlu0 %v921_v52, %s5421_s17  ;;  %v913_v11 = vmul.f32 %v896_v8, %v5658_v39  ;;  %v914_v12 = vmul.f32 %v896_v8, %v5655_v38  ;;  %v915_v13 = vmul.f32 %v896_v8, %v5661_v40 }
  0xc3   : > { %v912_v15 = vmul.f32 %v896_v8, %v5666_v45 }
  0xc4   : > { %v891_v16 = vpop.permute.xlu0 %890 }
  0xc5   : > { %v909_v17 = vmul.f32 %v891_v16, %v5658_v39  ;;  %v910_v18 = vmul.f32 %v891_v16, %v5655_v38  ;;  %v911_v20 = vmul.f32 %v891_v16, %v5661_v40  ;;  %v908_v21 = vmul.f32 %v891_v16, %v5666_v45  ;;  %v679_v22 = vpop.permute.xlu1 %678 }
  0xc6   : > { %968 = vrot.lane.b32.xlu1 %v922_v53, %s5421_s17  ;;  %970 = vrot.lane.b32.xlu0 %v923_v54, %s5421_s17  ;;  %v710_v36 = vmul.f32 %v5658_v39, %v679_v22  ;;  %v711_v37 = vmul.f32 %v5655_v38, %v679_v22  ;;  %v709_v47 = vmul.f32 %v5666_v45, %v679_v22 }
  0xc8   : > { %v674_v23 = vpop.permute.xlu0 %673 }
  0xc9   : > { %v731_v24 = vpop.permute.xlu1 %730 }
  0xca   : > { %964 = vrot.lane.b32.xlu0 %v920_v55, %s5421_s17  ;;  %822 = vrot.lane.b32.xlu1 %v782_v56, %s5420_s14  ;;  %v746_v44 = vadd.f32 %v731_v24, %v710_v36  ;;  %v747_v46 = vadd.f32 %v731_v24, %v711_v37  ;;  %v745_v53 = vadd.f32 %v731_v24, %v709_v47 }
  0xcc   : > { %v5732_v25 = vpop.permute.xlu0 %668 }
  0xcd   : > { %v5734_v26 = vpop.permute.xlu1 %725 }
  0xce   : > { %818 = vrot.lane.b32.xlu0 %v780_v58, %s5420_s14  ;;  %816 = vrot.lane.b32.xlu1 %v779_v59, %s5420_s14 }
  0xd0   : > { %v5736_v27 = vpop.permute.xlu0 %663 }
  0xd1   : > { %v5738_v28 = vpop.permute.xlu1 %720 }
  0xd2   : > { %820 = vrot.lane.b32.xlu1 %v781_v61, %s5420_s14  ;;  %958 = vrot.lane.b32.xlu0 %v917_v62, %s5421_s17 }
  0xd4   : > { %v5740_v29 = vpop.permute.xlu0 %715 }
  0xd6   : > { %960 = vrot.lane.b32.xlu1 %v918_v63, %s5421_s17  ;;  %962 = vrot.lane.b32.xlu0 %v919_v0, %s5421_s17 }
  0xda   : > { %814 = vrot.lane.b32.xlu1 %v778_v2, %s5420_s14  ;;  %956 = vrot.lane.b32.xlu0 %v916_v4, %s5421_s17 }
  0xde   : > { %808 = vrot.lane.b32.xlu1 %v775_v6, %s5420_s14  ;;  %810 = vrot.lane.b32.xlu0 %v776_v7, %s5420_s14 }
  0xe2   : > { %812 = vrot.lane.b32.xlu1 %v777_v10, %s5420_s14  ;;  %950 = vrot.lane.b32.xlu0 %v913_v11, %s5421_s17  ;;  %v706_v10 = vmul.f32 %v5658_v39, %v674_v23  ;;  %v707_v11 = vmul.f32 %v5655_v38, %v674_v23 }
  0xe4   : > { %v742_v16 = vadd.f32 %v5734_v26, %v706_v10 }
  0xe6   : > { %952 = vrot.lane.b32.xlu1 %v914_v12, %s5421_s17  ;;  %954 = vrot.lane.b32.xlu0 %v915_v13, %s5421_s17 }
  0xea   : > { %806 = vrot.lane.b32.xlu1 %v774_v14, %s5420_s14  ;;  %948 = vrot.lane.b32.xlu0 %v912_v15, %s5421_s17 }
  0xee   : > { %942 = vrot.lane.b32.xlu1 %v909_v17, %s5421_s17  ;;  %944 = vrot.lane.b32.xlu0 %v910_v18, %s5421_s17  ;;  %v743_v17 = vadd.f32 %v5734_v26, %v707_v11  ;;  %v705_v18 = vmul.f32 %v5666_v45, %v674_v23 }
  0xf2   : > { %946 = vrot.lane.b32.xlu1 %v911_v20, %s5421_s17  ;;  %940 = vrot.lane.b32.xlu0 %v908_v21, %s5421_s17 }
 0x128   : > { %v835_v30 = vpop.permute.xlu0 %834  ;;  %v833_v31 = vpop.permute.xlu1 %832 }
 0x129   : > { %v849_v42 = vsel %vm838_vm1, %v833_v31, %v835_v30 }
 0x12a   : > { %v880_v48 = vadd.f32 %v849_v42, %v746_v44 }
 0x12c   : > { %v831_v32 = vpop.permute.xlu0 %830  ;;  %v837_v33 = vpop.permute.xlu1 %836 }
 0x12d   : > { %v850_v43 = vsel %vm838_vm1, %v835_v30, %v837_v33  ;;  %v848_v49 = vsel %vm838_vm1, %v831_v32, %v833_v31  ;;  %v741_v31 = vadd.f32 %v5734_v26, %v705_v18  ;;  %v697_v18 = vmul.f32 %v5666_v45, %v5736_v27 }
 0x12e   : > { %v881_v50 = vadd.f32 %v850_v43, %v747_v46  ;;  %v879_v58 = vadd.f32 %v848_v49, %v745_v53 }
 0x130   : > { %v827_v34 = vpop.permute.xlu0 %826  ;;  %v825_v35 = vpop.permute.xlu1 %824 }
 0x131   : > { %v846_v14 = vsel %vm838_vm1, %v825_v35, %v827_v34 }
 0x132   : > { %v876_v20 = vadd.f32 %v846_v14, %v742_v16 }
 0x134   : > { %v967_v40 = vpop.permute.xlu0 %966  ;;  %v829_v41 = vpop.permute.xlu1 %828 }
 0x135   : > { %v847_v15 = vsel %vm838_vm1, %v827_v34, %v829_v41 }
 0x136   : > { %v877_v21 = vadd.f32 %v847_v15, %v743_v17 }
 0x138   : > { %v971_v51 = vpop.permute.xlu0 %970  ;;  %v969_v52 = vpop.permute.xlu1 %968 }
 0x139   : > { %v983_v54 = vsel %vm972_vm2, %v967_v40, %v969_v52  ;;  %v984_v55 = vsel %vm972_vm2, %v969_v52, %v971_v51  ;;  %v703_v51 = vmul.f32 %v5655_v38, %v5732_v25 }
 0x13a   : > { %v1014_v56 = vadd.f32 %v983_v54, %v880_v48  ;;  %v1015_v57 = vadd.f32 %v984_v55, %v881_v50  ;;  %v702_v50 = vmul.f32 %v5658_v39, %v5732_v25 }
 0x13c   : > { %v965_v59 = vpop.permute.xlu0 %964  ;;  %v823_v60 = vpop.permute.xlu1 %822  ;;  %vm1031_vm3 = vcmp.ge.f32.partialorder %v1015_v57, 0.0  ;;  %v1047_v61 = vmul.f32 0.2, %v1015_v57  ;;  %vm1030_vm4 = vcmp.ge.f32.partialorder %v1014_v56, 0.0  ;;  %v1046_v62 = vmul.f32 0.2, %v1014_v56 }
 0x13d   : > { %v982_v63 = vsel %vm972_vm2, %v965_v59, %v967_v40  ;;  %v845_v22 = vsel %vm838_vm1, %v823_v60, %v825_v35 }
 0x13e   : > { %v1013_v0 = vadd.f32 %v982_v63, %v879_v58  ;;  %v1063_v2 = vsel %vm1031_vm3, %v1015_v57, %v1047_v61  ;;  %v1062_v4 = vsel %vm1030_vm4, %v1014_v56, %v1046_v62  ;;  %v875_v37 = vadd.f32 %v845_v22, %v741_v31 }
 0x13f   : > { %1117 = vrot.lane.b32.xlu0 %v1063_v2, %s5423_s24  ;;  %1115 = vrot.lane.b32.xlu1 %v1062_v4, %s5423_s24  ;;  %v738_v56 = vadd.f32 %v5738_v28, %v702_v50  ;;  %v739_v57 = vadd.f32 %v5738_v28, %v703_v51  ;;  %v701_v58 = vmul.f32 %v5666_v45, %v5732_v25  ;;  %vm1250_vm4 = vcmask 261120  }
 0x140   : > { %v819_v5 = vpop.permute.xlu0 %818  ;;  %v817_v6 = vpop.permute.xlu1 %816  ;;  %vm1029_vm5 = vcmp.ge.f32.partialorder %v1013_v0, 0.0  ;;  %v1045_v7 = vmul.f32 0.2, %v1013_v0 }
 0x141   : > { %v843_v54 = vsel %vm838_vm1, %v817_v6, %v819_v5 }
 0x142   : > { %v1061_v8 = vsel %vm1029_vm5, %v1013_v0, %v1045_v7  ;;  %v872_v59 = vadd.f32 %v843_v54, %v738_v56  ;;  %v737_v0 = vadd.f32 %v5738_v28, %v701_v58 }
 0x143   : > { %1113 = vrot.lane.b32.xlu1 %v1061_v8, %s5423_s24  ;;  %v698_v8 = vmul.f32 %v5658_v39, %v5736_v27  ;;  %v699_v39 = vmul.f32 %v5655_v38, %v5736_v27 }
 0x144   : > { %v959_v12 = vpop.permute.xlu0 %958  ;;  %v821_v13 = vpop.permute.xlu1 %820 }
 0x145   : > { %v844_v55 = vsel %vm838_vm1, %v819_v5, %v821_v13  ;;  %v734_v14 = vadd.f32 %v5740_v29, %v698_v8  ;;  %v735_v45 = vadd.f32 %v5740_v29, %v699_v39  ;;  %v1169_v39 = vld [vmem:[%s6935_s9 + $0x18] sm:$0xff] }
 0x146   : > { %v873_v60 = vadd.f32 %v844_v55, %v739_v57 }
 0x148   : > { %v963_v24 = vpop.permute.xlu0 %962  ;;  %v961_v30 = vpop.permute.xlu1 %960 }
 0x149   : > { %v980_v32 = vsel %vm972_vm2, %v959_v12, %v961_v30  ;;  %v981_v33 = vsel %vm972_vm2, %v961_v30, %v963_v24 }
 0x14a   : > { %v1010_v36 = vadd.f32 %v980_v32, %v876_v20  ;;  %v1011_v34 = vadd.f32 %v981_v33, %v877_v21  ;;  %v733_v33 = vadd.f32 %v5740_v29, %v697_v18 }
 0x14c   : > { %v957_v40 = vpop.permute.xlu0 %956  ;;  %v815_v41 = vpop.permute.xlu1 %814  ;;  %vm1027_vm6 = vcmp.ge.f32.partialorder %v1011_v34, 0.0  ;;  %v1043_v42 = vmul.f32 0.2, %v1011_v34  ;;  %vm1026_vm7 = vcmp.ge.f32.partialorder %v1010_v36, 0.0  ;;  %v1042_v23 = vmul.f32 0.2, %v1010_v36 }
 0x14d   : > { %v979_v43 = vsel %vm972_vm2, %v957_v40, %v959_v12  ;;  %v842_v61 = vsel %vm838_vm1, %v815_v41, %v817_v6 }
 0x14e   : > { %v1009_v35 = vadd.f32 %v979_v43, %v875_v37  ;;  %v1059_v44 = vsel %vm1027_vm6, %v1011_v34, %v1043_v42  ;;  %v1058_v46 = vsel %vm1026_vm7, %v1010_v36, %v1042_v23  ;;  %v871_v10 = vadd.f32 %v842_v61, %v737_v0 }
 0x14f   : > { %1109 = vrot.lane.b32.xlu1 %v1059_v44, %s5423_s24  ;;  %1107 = vrot.lane.b32.xlu0 %v1058_v46, %s5423_s24 }
 0x150   : > { %v811_v26 = vpop.permute.xlu0 %810  ;;  %v809_v47 = vpop.permute.xlu1 %808  ;;  %vm1025_vm8 = vcmp.ge.f32.partialorder %v1009_v35, 0.0  ;;  %v1041_v48 = vmul.f32 0.2, %v1009_v35 }
 0x151   : > { %v840_v13 = vsel %vm838_vm1, %v809_v47, %v811_v26 }
 0x152   : > { %v1057_v49 = vsel %vm1025_vm8, %v1009_v35, %v1041_v48  ;;  %v868_v20 = vadd.f32 %v840_v13, %v734_v14  ;;  %v630_v48 = vand.u32 127, %v594_v1 }
 0x153   : > { %1105 = vrot.lane.b32.xlu0 %v1057_v49, %s5423_s24 }
 0x154   : > { %v951_v52 = vpop.permute.xlu0 %950  ;;  %v813_v53 = vpop.permute.xlu1 %812  ;;  %v5814_v50 = vadd.s32 4294967286, %v630_v48 }
 0x155   : > { %v841_v30 = vsel %vm838_vm1, %v811_v26, %v813_v53 }
 0x156   : > { %v869_v38 = vadd.f32 %v841_v30, %v735_v45  ;;  %vm641_vm0 = vcmp.ge.s32.totalorder %v5814_v50, 0  ;;  %v4151_v50 = vld [vmem:[#allocation2] sm:$0x1] }
 0x158   : > { %v955_v62 = vpop.permute.xlu0 %954  ;;  %v953_v63 = vpop.permute.xlu1 %952 }
 0x159   : > { %v977_v2 = vsel %vm972_vm2, %v951_v52, %v953_v63  ;;  %v978_v4 = vsel %vm972_vm2, %v953_v63, %v955_v62 }
 0x15a   : > { %v1006_v5 = vadd.f32 %v977_v2, %v872_v59  ;;  %v1007_v7 = vadd.f32 %v978_v4, %v873_v60 }
 0x15c   : > { %v949_v11 = vpop.permute.xlu0 %948  ;;  %v807_v25 = vpop.permute.xlu1 %806  ;;  %vm1023_vm9 = vcmp.ge.f32.partialorder %v1007_v7, 0.0  ;;  %v1039_v12 = vmul.f32 0.2, %v1007_v7  ;;  %vm1022_vm10 = vcmp.ge.f32.partialorder %v1006_v5, 0.0  ;;  %v1038_v6 = vmul.f32 0.2, %v1006_v5 }
 0x15d   : > { %v976_v28 = vsel %vm972_vm2, %v949_v11, %v951_v52  ;;  %v839_v31 = vsel %vm838_vm1, %v807_v25, %v809_v47  ;;  %v632_v25 = vadd.s32 256, %v630_v48 }
 0x15e   : > { %v1005_v15 = vadd.f32 %v976_v28, %v871_v10  ;;  %v1055_v16 = vsel %vm1023_vm9, %v1007_v7, %v1039_v12  ;;  %v1054_v17 = vsel %vm1022_vm10, %v1006_v5, %v1038_v6  ;;  %v867_v27 = vadd.f32 %v839_v31, %v733_v33 }
 0x15f   : > { %1101 = vrot.lane.b32.xlu0 %v1055_v16, %s5423_s24  ;;  %1099 = vrot.lane.b32.xlu1 %v1054_v17, %s5423_s24  ;;  %v5844_v12 = vadd.s32 4294967286, %v632_v25 }
 0x160   : > { %v945_v21 = vpop.permute.xlu0 %944  ;;  %v943_v22 = vpop.permute.xlu1 %942  ;;  %vm1021_vm11 = vcmp.ge.f32.partialorder %v1005_v15, 0.0  ;;  %v1037_v24 = vmul.f32 0.2, %v1005_v15 }
 0x161   : > { %v974_v32 = vsel %vm972_vm2, %v943_v22, %v945_v21  ;;  %vm647_vm3 = vcmp.lt.s32.totalorder %v5844_v12, 256 }
 0x162   : > { %v1002_v36 = vadd.f32 %v974_v32, %v868_v20  ;;  %v1053_v34 = vsel %vm1021_vm11, %v1005_v15, %v1037_v24  ;;  %v1167_v20 = vld [vmem:[%s6935_s9 + $0x8] sm:$0xff] }
 0x163   : > { %1097 = vrot.lane.b32.xlu1 %v1053_v34, %s5423_s24 }
 0x164   : > { %v941_v37 = vpop.permute.xlu0 %940  ;;  %v947_v40 = vpop.permute.xlu1 %946  ;;  %vm1018_vm12 = vcmp.ge.f32.partialorder %v1002_v36, 0.0  ;;  %v1034_v41 = vmul.f32 0.2, %v1002_v36 }
 0x165   : > { %v973_v42 = vsel %vm972_vm2, %v941_v37, %v943_v22  ;;  %v975_v23 = vsel %vm972_vm2, %v945_v21, %v947_v40  ;;  %v1168_v21 = vld [vmem:[%s6935_s9 + $0x10] sm:$0xff]  ;;  %v1166_v22 = vld [vmem:[%s6935_s9] sm:$0xff] }
 0x166   : > { %v1001_v43 = vadd.f32 %v973_v42, %v867_v27  ;;  %v1003_v35 = vadd.f32 %v975_v23, %v869_v38  ;;  %v1050_v44 = vsel %vm1018_vm12, %v1002_v36, %v1034_v41 }
 0x167   : > { %1091 = vrot.lane.b32.xlu0 %v1050_v44, %s5423_s24 }
 0x168   : > { %vm1017_vm13 = vcmp.ge.f32.partialorder %v1001_v43, 0.0  ;;  %v1033_v29 = vmul.f32 0.2, %v1001_v43  ;;  %vm1019_vm14 = vcmp.ge.f32.partialorder %v1003_v35, 0.0  ;;  %v1035_v46 = vmul.f32 0.2, %v1003_v35 }
 0x16a   : > { %v1049_v26 = vsel %vm1017_vm13, %v1001_v43, %v1033_v29  ;;  %v1051_v47 = vsel %vm1019_vm14, %v1003_v35, %v1035_v46 }
 0x16b   : > { %1089 = vrot.lane.b32.xlu0 %v1049_v26, %s5423_s24  ;;  %1093 = vrot.lane.b32.xlu1 %v1051_v47, %s5423_s24  ;;  %s5427_s24 = smov 122  }
 0x16f   : > { %5213 = vrot.lane.b32.xlu1 %v5422_v19, %s5420_s14  ;;  %5218 = vrot.lane.b32.xlu0 %v5422_v19, %s5420_s14 }
 0x173   : > { %5223 = vrot.lane.b32.xlu1 %v5422_v19, %s5421_s17  ;;  %5228 = vrot.lane.b32.xlu0 %v5422_v19, %s5421_s17 }
 0x1b1   : > { %v1116_v49 = vpop.permute.xlu1 %1115  ;;  %v1118_v54 = vpop.permute.xlu0 %1117 }
 0x1b2   : > { %v1132_v6 = vsel %vm1121_vm15, %v1116_v49, %v1118_v54 }
 0x1b3   : > { %v1164_v13 = vsel %vm647_vm3, %v1132_v6, 0.0 }
 0x1b5   : > { %v1114_v51 = vpop.permute.xlu1 %1113 }
 0x1b6   : > { %v1131_v52 = vsel %vm1121_vm15, %v1114_v51, %v1116_v49  ;;  %v1162_v53 = vsel %vm641_vm0, %v1114_v51, 0.0 }
 0x1b7   : > { %1216 = vrot.lane.b32.xlu1 %v1131_v52, %s5420_s14 }
 0x1bb   : > { %1214 = vrot.lane.b32.xlu1 %v1162_v53, %s5420_s14 }
 0x1c1   : > { %v1108_v55 = vpop.permute.xlu0 %1107  ;;  %v1110_v59 = vpop.permute.xlu1 %1109 }
 0x1c2   : > { %v1129_v15 = vsel %vm1121_vm15, %v1108_v55, %v1110_v59 }
 0x1c3   : > { %v1160_v16 = vsel %vm647_vm3, %v1129_v15, 0.0 }
 0x1c5   : > { %v1106_v56 = vpop.permute.xlu0 %1105 }
 0x1c6   : > { %v1128_v57 = vsel %vm1121_vm15, %v1106_v56, %v1108_v55  ;;  %v1158_v58 = vsel %vm641_vm0, %v1106_v56, 0.0 }
 0x1c7   : > { %1208 = vrot.lane.b32.xlu0 %v1128_v57, %s5420_s14 }
 0x1cb   : > { %1206 = vrot.lane.b32.xlu0 %v1158_v58, %s5420_s14 }
 0x1d1   : > { %v1100_v60 = vpop.permute.xlu1 %1099  ;;  %v1102_v61 = vpop.permute.xlu0 %1101 }
 0x1d2   : > { %v1126_v17 = vsel %vm1121_vm15, %v1100_v60, %v1102_v61 }
 0x1d3   : > { %v1156_v18 = vsel %vm647_vm3, %v1126_v17, 0.0 }
 0x1d5   : > { %v1098_v62 = vpop.permute.xlu1 %1097 }
 0x1d6   : > { %v1125_v63 = vsel %vm1121_vm15, %v1098_v62, %v1100_v60  ;;  %v1154_v2 = vsel %vm641_vm0, %v1098_v62, 0.0 }
 0x1d7   : > { %1200 = vrot.lane.b32.xlu0 %v1125_v63, %s5420_s14 }
 0x1d9   : > { %v1092_v0 = vpop.permute.xlu0 %1091 }
 0x1db   : > { %1198 = vrot.lane.b32.xlu0 %v1154_v2, %s5420_s14 }
 0x1dd   : > { %v1090_v4 = vpop.permute.xlu0 %1089  ;;  %v1094_v5 = vpop.permute.xlu1 %1093 }
 0x1de   : > { %v1122_v7 = vsel %vm1121_vm15, %v1090_v4, %v1092_v0  ;;  %v1150_v10 = vsel %vm641_vm0, %v1090_v4, 0.0  ;;  %v1123_v28 = vsel %vm1121_vm15, %v1092_v0, %v1094_v5  ;;  %v1170_v0 = vld [vmem:[%s6930_s4] sm:$0xff] }
 0x1df   : > { %1192 = vrot.lane.b32.xlu1 %v1122_v7, %s5420_s14  ;;  %1500 = vrot.lane.b32.xlu0 %v1128_v57, %s5421_s17  ;;  %v1152_v14 = vsel %vm647_vm3, %v1123_v28, 0.0  ;;  %v1171_v28 = vld [vmem:[%s6930_s4 + $0x8] sm:$0xff] }
 0x1e1   : > { %v5835_v8 = vpop.permute.xlu1 %5213  ;;  %v5219_v24 = vpop.permute.xlu0 %5218 }
 0x1e2   : > { %v5215_v11 = vunpack.i.l.bf16 %v5835_v8  ;;  %v5216_v46 = vunpack.i.h.bf16 %v5835_v8  ;;  %v5220_v54 = vunpack.i.l.bf16 %v5219_v24  ;;  %v5221_v60 = vunpack.i.h.bf16 %v5219_v24  ;;  %v1173_v24 = vld [vmem:[%s6930_s4 + $0x18] sm:$0xff] }
 0x1e3   : > { %1190 = vrot.lane.b32.xlu1 %v1150_v10, %s5420_s14  ;;  %1498 = vrot.lane.b32.xlu0 %v1158_v58, %s5421_s17 }
 0x1e4   : > { %1376 = vmatprep.subr.mxu1 %v5215_v11 }
 0x1e5   : > { %v5888_v30 = vpop.permute.xlu0 %5228  ;;  %v5890_v32 = vpop.permute.xlu1 %5223 }
 0x1e6   : > { %v5226_v6 = vunpack.i.h.bf16 %v5890_v32 }
 0x1e7   : > { %1508 = vrot.lane.b32.xlu1 %v1131_v52, %s5421_s17  ;;  %1492 = vrot.lane.b32.xlu0 %v1125_v63, %s5421_s17 }
 0x1eb   : > { %1506 = vrot.lane.b32.xlu1 %v1162_v53, %s5421_s17  ;;  %1490 = vrot.lane.b32.xlu0 %v1154_v2, %s5421_s17 }
 0x1ef   : > { %1484 = vrot.lane.b32.xlu1 %v1122_v7, %s5421_s17  ;;  %1218 = vrot.lane.b32.xlu0 %v1164_v13, %s5420_s14 }
 0x1f3   : > { %1482 = vrot.lane.b32.xlu1 %v1150_v10, %s5421_s17  ;;  %1194 = vrot.lane.b32.xlu0 %v1152_v14, %s5420_s14 }
 0x1f7   : > { %1210 = vrot.lane.b32.xlu1 %v1160_v16, %s5420_s14  ;;  %1771 = vrot.lane.b32.xlu0 %v1128_v57, %s5424_s18 }
 0x1fb   : > { %1202 = vrot.lane.b32.xlu1 %v1156_v18, %s5420_s14  ;;  %1769 = vrot.lane.b32.xlu0 %v1158_v58, %s5424_s18  ;;  %s5426_s14 = smov 124  }
 0x1ff   : > { %1779 = vrot.lane.b32.xlu1 %v1131_v52, %s5424_s18  ;;  %1510 = vrot.lane.b32.xlu0 %v1164_v13, %s5421_s17 }
 0x203   : > { %1777 = vrot.lane.b32.xlu1 %v1162_v53, %s5424_s18  ;;  %1486 = vrot.lane.b32.xlu0 %v1152_v14, %s5421_s17 }
 0x207   : > { %1502 = vrot.lane.b32.xlu1 %v1160_v16, %s5421_s17  ;;  %1763 = vrot.lane.b32.xlu0 %v1125_v63, %s5424_s18 }
 0x20b   : > { %1494 = vrot.lane.b32.xlu1 %v1156_v18, %s5421_s17  ;;  %1761 = vrot.lane.b32.xlu0 %v1154_v2, %s5424_s18  ;;  %v5225_v2 = vunpack.i.l.bf16 %v5890_v32 }
 0x20f   : > { %5233 = vrot.lane.b32.xlu1 %v5422_v19, %s5424_s18  ;;  %1781 = vrot.lane.b32.xlu0 %v1164_v13, %s5424_s18 }
 0x213   : > { %1755 = vrot.lane.b32.xlu1 %v1122_v7, %s5424_s18  ;;  %1757 = vrot.lane.b32.xlu0 %v1152_v14, %s5424_s18 }
 0x217   : > { %1773 = vrot.lane.b32.xlu1 %v1160_v16, %s5424_s18  ;;  %1767 = vrot.lane.b32.xlu0 %v5422_v19, %s5424_s18  ;;  %v1172_v16 = vld [vmem:[%s6930_s4 + $0x10] sm:$0xff] }
 0x21b   : > { %1765 = vrot.lane.b32.xlu1 %v1156_v18, %s5424_s18  ;;  %1458 = vperm.xlu0 %5210, %v1169_v39  }
 0x21f   : > { %1753 = vrot.lane.b32.xlu1 %v1150_v10, %s5424_s18  ;;  %1448 = vperm.xlu0 %5210, %v1167_v20  }
 0x223   : > { %1759 = vrot.lane.b32.xlu1 %v5422_v19, %s5424_s18 }
 0x227   : > { %1453 = vperm.xlu1 %5211, %v1168_v21   ;;  %v5230_v21 = vunpack.i.l.bf16 %v5888_v30 }
 0x229   : > { %v1217_v33 = vpop.permute.xlu1 %1216 }
 0x22b   : > { %1443 = vperm.xlu1 %5211, %v1166_v22  }
 0x22d   : > { %v1215_v34 = vpop.permute.xlu1 %1214 }
 0x22e   : > { %v1231_v48 = vsel %vm838_vm1, %v1215_v34, %v1217_v33 }
 0x239   : > { %v1209_v31 = vpop.permute.xlu0 %1208 }
 0x23d   : > { %v1207_v45 = vpop.permute.xlu0 %1206 }
 0x23e   : > { %v1228_v57 = vsel %vm838_vm1, %v1207_v45, %v1209_v31 }
 0x249   : > { %v1201_v36 = vpop.permute.xlu0 %1200 }
 0x24d   : > { %v1199_v38 = vpop.permute.xlu0 %1198 }
 0x24e   : > { %v1225_v63 = vsel %vm838_vm1, %v1199_v38, %v1201_v36 }
 0x251   : > { %v5892_v27 = vpop.permute.xlu0 %1500  ;;  %v1193_v37 = vpop.permute.xlu1 %1192 }
 0x255   : > { %v5894_v40 = vpop.permute.xlu0 %1498  ;;  %v1191_v41 = vpop.permute.xlu1 %1190 }
 0x256   : > { %v1222_v10 = vsel %vm838_vm1, %v1191_v41, %v1193_v37  ;;  %v1520_v22 = vsel %vm972_vm2, %v5894_v40, %v5892_v27  ;;  %v4982_v40 = vld [vmem:[%s6930_s4 + $0x20] sm:$0xff] }
 0x259   : > { %v5896_v42 = vpop.permute.xlu0 %1492  ;;  %v1509_v23 = vpop.permute.xlu1 %1508 }
 0x25d   : > { %v5898_v43 = vpop.permute.xlu0 %1490  ;;  %v1507_v35 = vpop.permute.xlu1 %1506 }
 0x25e   : > { %v1523_v13 = vsel %vm972_vm2, %v1507_v35, %v1509_v23  ;;  %v1517_v34 = vsel %vm972_vm2, %v5898_v43, %v5896_v42 }
 0x261   : > { %v1219_v44 = vpop.permute.xlu0 %1218  ;;  %v5900_v29 = vpop.permute.xlu1 %1484 }
 0x262   : > { %v1232_v26 = vsel %vm838_vm1, %v1217_v33, %v1219_v44  ;;  %v1233_v47 = vsel %vm838_vm1, %v1219_v44, %v5215_v11 }
 0x263   : > { %1287 = vmatprep.subr.mxu0 %v1232_v26  ;;  %1377 = vmatpush1.msra.mxu1 %v1233_v47 }
 0x264   : > { %1288 = vmatpush1.msra.mxu0 %v1231_v48  ;;  %1378 = vmatprep.subr.mxu1 %v5216_v46  ;;  %v4984_v48 = vld [vmem:[%s6930_s4 + $0x30] sm:$0xff] }
 0x265   : > { %v1195_v49 = vpop.permute.xlu0 %1194  ;;  %v5908_v51 = vpop.permute.xlu1 %1482 }
 0x266   : > { %v1223_v4 = vsel %vm838_vm1, %v1193_v37, %v1195_v49  ;;  %v1224_v5 = vsel %vm838_vm1, %v1195_v49, %v5221_v60  ;;  %v1514_v41 = vsel %vm972_vm2, %v5908_v51, %v5900_v29 }
 0x269   : > { %v5910_v52 = vpop.permute.xlu0 %1771  ;;  %v1211_v53 = vpop.permute.xlu1 %1210 }
 0x26a   : > { %v1229_v55 = vsel %vm838_vm1, %v1209_v31, %v1211_v53  ;;  %v1230_v56 = vsel %vm838_vm1, %v1211_v53, %v5216_v46 }
 0x26b   : > { %1289 = vmatprep.subr.mxu0 %v1229_v55  ;;  %1379 = vmatpush1.msra.mxu1 %v1230_v56  ;;  %v4985_v56 = vld [vmem:[%s6930_s4 + $0x38] sm:$0xff] }
 0x26c   : > { %1290 = vmatpush1.msra.mxu0 %v1228_v57  ;;  %1380 = vmatprep.subr.mxu1 %v5220_v54 }
 0x26d   : > { %v5915_v58 = vpop.permute.xlu0 %1769  ;;  %v1203_v59 = vpop.permute.xlu1 %1202 }
 0x26e   : > { %v1226_v61 = vsel %vm838_vm1, %v1201_v36, %v1203_v59  ;;  %v1227_v62 = vsel %vm838_vm1, %v1203_v59, %v5220_v54  ;;  %v5231_v36 = vunpack.i.h.bf16 %v5888_v30  ;;  %vm1785_vm1 = vcmask 1022976  }
 0x26f   : > { %1291 = vmatprep.subr.mxu0 %v1226_v61  ;;  %1381 = vmatpush1.msra.mxu1 %v1227_v62  ;;  %v1792_v53 = vsel %vm1785_vm1, %v5915_v58, %v5910_v52  ;;  %v4994_v62 = vld [vmem:[%s6930_s4 + $0x40] sm:$0xff] }
 0x270   : > { %1292 = vmatpush1.msra.mxu0 %v1225_v63  ;;  %1382 = vmatprep.subr.mxu1 %v5221_v60 }
 0x271   : > { %v1511_v7 = vpop.permute.xlu0 %1510  ;;  %1293 = vmatprep.subr.mxu0 %v1223_v4  ;;  %v5926_v8 = vpop.permute.xlu1 %1779  ;;  %1383 = vmatpush1.msra.mxu1 %v1224_v5  ;;  %v4996_v4 = vld [vmem:[%s6930_s4 + $0x50] sm:$0xff]  ;;  %v4997_v5 = vld [vmem:[%s6930_s4 + $0x58] sm:$0xff] }
 0x272   : > { %1294 = vmatpush1.msra.mxu0 %v1222_v10  ;;  %4978 = vmatmul.mubr.msk.f32.vlgmr.msra.gmra.mxu1 %vm1250_vm4, %v1170_v0  ;;  %v1524_v11 = vsel %vm972_vm2, %v1509_v23, %v1511_v7  ;;  %v1525_v25 = vsel %vm972_vm2, %v1511_v7, %v5225_v2 }
 0x273   : > { %1667 = vmatprep.subr.mxu1 %v5225_v2  ;;  %4974 = vmatmul.mubr.msk.f32.vlgmr.msra.gmra.mxu0 %vm1250_vm4, %v1170_v0  ;;  %v4995_v2 = vld [vmem:[%s6930_s4 + $0x48] sm:$0xff] }
 0x274   : > { %1578 = vmatprep.subr.mxu0 %v1524_v11  ;;  %1668 = vmatpush1.msra.mxu1 %v1525_v25 }
 0x275   : > { %1579 = vmatpush1.msra.mxu0 %v1523_v13  ;;  %1669 = vmatprep.subr.mxu1 %v5226_v6  ;;  %v1487_v14 = vpop.permute.xlu0 %1486  ;;  %v1778_v15 = vpop.permute.xlu1 %1777 }
 0x276   : > { %1422 = vmatprep.mubr.f32.mxu1 %v5422_v19  ;;  %1333 = vmatprep.mubr.f32.mxu0 %v5422_v19  ;;  %v1516_v30 = vsel %vm972_vm2, %v1487_v14, %v5231_v36  ;;  %v1795_v35 = vsel %vm1785_vm1, %v1778_v15, %v5926_v8 }
 0x277   : > { %4979 = vmatmul.mubr.msk.f32.gmra.mxu1 %vm1250_vm4, %v1171_v28  ;;  %4975 = vmatmul.mubr.msk.f32.gmra.mxu0 %vm1250_vm4, %v1171_v28 }
 0x278   : > { %1428 = vmatprep.mubr.f32.mxu1 %v5422_v19  ;;  %1339 = vmatprep.mubr.f32.mxu0 %v5422_v19 }
 0x279   : > { %v5947_v17 = vpop.permute.xlu0 %1763  ;;  %v1503_v18 = vpop.permute.xlu1 %1502 }
 0x27a   : > { %v1521_v39 = vsel %vm972_vm2, %v5892_v27, %v1503_v18  ;;  %v1522_v20 = vsel %vm972_vm2, %v1503_v18, %v5226_v6  ;;  %v1515_v27 = vsel %vm972_vm2, %v5900_v29, %v1487_v14  ;;  %v4983_v29 = vld [vmem:[%s6930_s4 + $0x28] sm:$0xff] }
 0x27b   : > { %4980 = vmatmul.mubr.msk.f32.gmra.mxu1 %vm1250_vm4, %v1172_v16  ;;  %4976 = vmatmul.mubr.msk.f32.gmra.mxu0 %vm1250_vm4, %v1172_v16 }
 0x27c   : > { %1580 = vmatprep.subr.mxu0 %v1521_v39  ;;  %1670 = vmatpush1.msra.mxu1 %v1522_v20 }
 0x27d   : > { %1581 = vmatpush1.msra.mxu0 %v1520_v22  ;;  %1671 = vmatprep.subr.mxu1 %v5230_v21  ;;  %v5961_v31 = vpop.permute.xlu0 %1761  ;;  %v1495_v32 = vpop.permute.xlu1 %1494 }
 0x27e   : > { %1434 = vmatprep.mubr.f32.mxu1 %v5422_v19  ;;  %1345 = vmatprep.mubr.f32.mxu0 %v5422_v19  ;;  %v1518_v45 = vsel %vm972_vm2, %v5896_v42, %v1495_v32  ;;  %v1519_v33 = vsel %vm972_vm2, %v1495_v32, %v5230_v21  ;;  %v1789_v58 = vsel %vm1785_vm1, %v5961_v31, %v5947_v17 }
 0x27f   : > { %4981 = vmatmul.mubr.msk.f32.gmra.mxu1 %vm1250_vm4, %v1173_v24  ;;  %4977 = vmatmul.mubr.msk.f32.gmra.mxu0 %vm1250_vm4, %v1173_v24 }
 0x280   : > { %1582 = vmatprep.subr.mxu0 %v1518_v45  ;;  %1672 = vmatpush1.msra.mxu1 %v1519_v33 }
 0x281   : > { %1583 = vmatpush1.msra.mxu0 %v1517_v34  ;;  %1673 = vmatprep.subr.mxu1 %v5231_v36  ;;  %v1782_v38 = vpop.permute.xlu0 %1781  ;;  %v5234_v37 = vpop.permute.xlu1 %5233 }
 0x282   : > { %1584 = vmatprep.subr.mxu0 %v1515_v27  ;;  %v5235_v42 = vunpack.i.l.bf16 %v5234_v37  ;;  %1674 = vmatpush1.msra.mxu1 %v1516_v30  ;;  %v1796_v23 = vsel %vm1785_vm1, %v5926_v8, %v1782_v38  ;;  %v5236_v46 = vunpack.i.h.bf16 %v5234_v37 }
 0x283   : > { %1707 = vmatprep.mubr.f32.mxu1 %v5422_v19  ;;  %1585 = vmatpush1.msra.mxu0 %v1514_v41 }
 0x284   : > { %1618 = vmatprep.mubr.f32.mxu0 %v5422_v19  ;;  %4990 = vmatmul.mubr.msk.f32.vlgmr.msra.gmra.mxu1 %vm1250_vm4, %v4982_v40  ;;  %v1797_v43 = vsel %vm1785_vm1, %v1782_v38, %v5235_v42 }
 0x285   : > { %4986 = vmatmul.mubr.msk.f32.vlgmr.msra.gmra.mxu0 %vm1250_vm4, %v4982_v40  ;;  %1850 = vmatprep.subr.mxu0 %v1796_v23  ;;  %v1756_v44 = vpop.permute.xlu1 %1755  ;;  %v1758_v26 = vpop.permute.xlu0 %1757 }
 0x286   : > { %1851 = vmatpush1.msra.mxu0 %v1795_v35  ;;  %1939 = vmatprep.subr.mxu1 %v5235_v42  ;;  %v1787_v59 = vsel %vm1785_vm1, %v1756_v44, %v1758_v26 }
 0x287   : > { %1713 = vmatprep.mubr.f32.mxu1 %v5422_v19  ;;  %1940 = vmatpush1.msra.mxu1 %v1797_v43 }
 0x288   : > { %1624 = vmatprep.mubr.f32.mxu0 %v5422_v19  ;;  %4991 = vmatmul.mubr.msk.f32.gmra.mxu1 %vm1250_vm4, %v4983_v29 }
 0x289   : > { %1941 = vmatprep.subr.mxu1 %v5236_v46  ;;  %4987 = vmatmul.mubr.msk.f32.gmra.mxu0 %vm1250_vm4, %v4983_v29  ;;  %v1774_v47 = vpop.permute.xlu1 %1773  ;;  %v1768_v54 = vpop.permute.xlu0 %1767 }
 0x28a   : > { %1719 = vmatprep.mubr.f32.mxu1 %v5422_v19  ;;  %1630 = vmatprep.mubr.f32.mxu0 %v5422_v19  ;;  %v1793_v49 = vsel %vm1785_vm1, %v5910_v52, %v1774_v47  ;;  %v1794_v51 = vsel %vm1785_vm1, %v1774_v47, %v5236_v46 }
 0x28b   : > { %1852 = vmatprep.subr.mxu0 %v1793_v49  ;;  %1942 = vmatpush1.msra.mxu1 %v1794_v51 }
 0x28c   : > { %4992 = vmatmul.mubr.msk.f32.gmra.mxu1 %vm1250_vm4, %v4984_v48  ;;  %1853 = vmatpush1.msra.mxu0 %v1792_v53 }
 0x28d   : > { %4988 = vmatmul.mubr.msk.f32.gmra.mxu0 %vm1250_vm4, %v4984_v48  ;;  %v1766_v55 = vpop.permute.xlu1 %1765  ;;  %1725 = vmatprep.mubr.f32.mxu1 %v5422_v19 }
 0x28e   : > { %1636 = vmatprep.mubr.f32.mxu0 %v5422_v19  ;;  %1943 = vmatprep.subr.mxu1 %v1768_v54  ;;  %v1790_v52 = vsel %vm1785_vm1, %v5947_v17, %v1766_v55  ;;  %v1791_v57 = vsel %vm1785_vm1, %v1766_v55, %v1768_v54 }
 0x28f   : > { %1854 = vmatprep.subr.mxu0 %v1790_v52  ;;  %1944 = vmatpush1.msra.mxu1 %v1791_v57 }
 0x290   : > { %4993 = vmatmul.mubr.msk.f32.gmra.mxu1 %vm1250_vm4, %v4985_v56  ;;  %1855 = vmatpush1.msra.mxu0 %v1789_v58 }
 0x291   : > { %4989 = vmatmul.mubr.msk.f32.gmra.mxu0 %vm1250_vm4, %v4985_v56  ;;  %1856 = vmatprep.subr.mxu0 %v1787_v59  ;;  %v1754_v60 = vpop.permute.xlu1 %1753 }
 0x292   : > { %v1786_v61 = vsel %vm1785_vm1, %v1754_v60, %v1756_v44  ;;  %1890 = vmatprep.mubr.f32.mxu0 %v5422_v19  ;;  %1979 = vmatprep.mubr.f32.mxu1 %v5422_v19 }
 0x293   : > { %1857 = vmatpush1.msra.mxu0 %v1786_v61 }
 0x295   : > { %4998 = vmatmul.mubr.msk.f32.vlgmr.msra.gmra.mxu0 %vm1250_vm4, %v4994_v62  ;;  %v1760_v63 = vpop.permute.xlu1 %1759 }
 0x296   : > { %1945 = vmatprep.subr.mxu1 %v1760_v63  ;;  %1896 = vmatprep.mubr.f32.mxu0 %v5422_v19  ;;  %v1788_v0 = vsel %vm1785_vm1, %v1758_v26, %v1760_v63  ;;  %v1459_v41 = vpop.permute.xlu0 %1458 }
 0x297   : > { %1946 = vmatpush1.msra.mxu1 %v1788_v0 }
 0x298   : > { %5002 = vmatmul.mubr.msk.f32.vlgmr.msra.gmra.mxu1 %vm1250_vm4, %v4994_v62 }
 0x299   : > { %4999 = vmatmul.mubr.msk.f32.gmra.mxu0 %vm1250_vm4, %v4995_v2  ;;  %1985 = vmatprep.mubr.f32.mxu1 %v5422_v19 }
 0x29a   : > { %1902 = vmatprep.mubr.f32.mxu0 %v5422_v19  ;;  %v1449_v44 = vpop.permute.xlu0 %1448 }
 0x29c   : > { %5003 = vmatmul.mubr.msk.f32.gmra.mxu1 %vm1250_vm4, %v4995_v2 }
 0x29d   : > { %5000 = vmatmul.mubr.msk.f32.gmra.mxu0 %vm1250_vm4, %v4996_v4  ;;  %1991 = vmatprep.mubr.f32.mxu1 %v5422_v19 }
 0x29e   : > { %1908 = vmatprep.mubr.f32.mxu0 %v5422_v19 }
 0x2a0   : > { %5004 = vmatmul.mubr.msk.f32.gmra.mxu1 %vm1250_vm4, %v4996_v4 }
 0x2a1   : > { %5001 = vmatmul.mubr.msk.f32.gmra.mxu0 %vm1250_vm4, %v4997_v5  ;;  %1997 = vmatprep.mubr.f32.mxu1 %v5422_v19 }
 0x2a2   : > { %2321 = vmatprep.mubr.f32.mxu0 %v5422_v19  ;;  %v1454_v47 = vpop.permute.xlu1 %1453 }
 0x2a4   : > { %5005 = vmatmul.mubr.msk.f32.gmra.mxu1 %vm1250_vm4, %v4997_v5 }
 0x2a5   : > { %2410 = vmatprep.mubr.f32.mxu1 %v5422_v19 }
 0x332   : > { %v6058_v7 = vpop.f32.mrf.mxu1 }
 0x333   : > { %v6060_v8 = vpop.f32.mrf.mxu0 }
 0x334   : > { %v1420_v10 = vpop.f32.mrf.mxu1 }
 0x335   : > { %v6062_v11 = vpop.f32.mrf.mxu0 }
 0x337   : > { %v1424_v25 = vpop.f32.mrf.mxu1  ;;  %v6064_v6 = vpop.f32.mrf.mxu0 }
 0x338   : > { %v1467_v48 = vadd.f32 %v1449_v44, %v1424_v25 }
 0x339   : > { %v1426_v13 = vpop.f32.mrf.mxu1  ;;  %v1337_v28 = vpop.f32.mrf.mxu0 }
 0x33a   : > { %v1466_v46 = vadd.f32 %v1449_v44, %v1337_v28 }
 0x33b   : > { %v1430_v14 = vpop.f32.mrf.mxu1  ;;  %v1341_v15 = vpop.f32.mrf.mxu0 }
 0x33c   : > { %v1469_v51 = vadd.f32 %v1454_v47, %v1341_v15  ;;  %v1471_v60 = vadd.f32 %v1454_v47, %v1430_v14 }
 0x33d   : > { %v1432_v16 = vpop.f32.mrf.mxu1  ;;  %v1343_v17 = vpop.f32.mrf.mxu0 }
 0x33e   : > { %v1470_v52 = vadd.f32 %v1454_v47, %v1343_v17 }
 0x33f   : > { %v1436_v18 = vpop.f32.mrf.mxu1  ;;  %v1347_v39 = vpop.f32.mrf.mxu0 }
 0x340   : > { %v1473_v61 = vadd.f32 %v1459_v41, %v1347_v39  ;;  %v1475_v10 = vadd.f32 %v1459_v41, %v1436_v18 }
 0x341   : > { %v1438_v20 = vpop.f32.mrf.mxu1  ;;  %v1349_v21 = vpop.f32.mrf.mxu0 }
 0x344   : > { %v6066_v22 = vpop.f32.mrf.mxu1 }
 0x345   : > { %v6068_v24 = vpop.f32.mrf.mxu0 }
 0x346   : > { %v1711_v31 = vpop.f32.mrf.mxu1 }
 0x347   : > { %v6070_v32 = vpop.f32.mrf.mxu0 }
 0x348   : > { %v1715_v45 = vpop.f32.mrf.mxu1 }
 0x349   : > { %v6072_v33 = vpop.f32.mrf.mxu0  ;;  %v1738_v55 = vadd.f32 %v1715_v45, %v1467_v48  ;;  %v1474_v45 = vadd.f32 %v1459_v41, %v1349_v21  ;;  %v1465_v21 = vadd.f32 %v1449_v44, %v6064_v6 }
 0x34a   : > { %v1717_v36 = vpop.f32.mrf.mxu1 }
 0x34b   : > { %v1628_v34 = vpop.f32.mrf.mxu0 }
 0x34c   : > { %v1721_v38 = vpop.f32.mrf.mxu1  ;;  %v1737_v53 = vadd.f32 %v1628_v34, %v1466_v46 }
 0x34d   : > { %v1632_v27 = vpop.f32.mrf.mxu0  ;;  %v1742_v25 = vadd.f32 %v1721_v38, %v1471_v60  ;;  %v1444_v38 = vpop.permute.xlu1 %1443 }
 0x34e   : > { %v1723_v37 = vpop.f32.mrf.mxu1  ;;  %v1740_v57 = vadd.f32 %v1632_v27, %v1469_v51  ;;  %v1463_v6 = vadd.f32 %v1444_v38, %v6058_v7 }
 0x34f   : > { %v1634_v30 = vpop.f32.mrf.mxu0 }
 0x350   : > { %v1727_v40 = vpop.f32.mrf.mxu1  ;;  %v1741_v0 = vadd.f32 %v1634_v30, %v1470_v52 }
 0x351   : > { %v1638_v42 = vpop.f32.mrf.mxu0  ;;  %v1746_v27 = vadd.f32 %v1727_v40, %v1475_v10  ;;  %v1736_v40 = vadd.f32 %v6072_v33, %v1465_v21  ;;  %v1734_v33 = vadd.f32 %v6066_v22, %v1463_v6 }
 0x352   : > { %v1729_v23 = vpop.f32.mrf.mxu1  ;;  %v1744_v15 = vadd.f32 %v1638_v42, %v1473_v61 }
 0x353   : > { %v1640_v43 = vpop.f32.mrf.mxu0  ;;  %v1462_v23 = vadd.f32 %v1444_v38, %v6062_v11 }
 0x354   : > { %v1745_v37 = vadd.f32 %v1640_v43, %v1474_v45  ;;  %v1461_v43 = vadd.f32 %v1444_v38, %v6060_v8 }
 0x355   : > { %v6074_v35 = vpop.f32.mrf.mxu0 }
 0x357   : > { %v6076_v29 = vpop.f32.mrf.mxu0 }
 0x358   : > { %v6078_v26 = vpop.f32.mrf.mxu1 }
 0x359   : > { %v6080_v49 = vpop.f32.mrf.mxu0  ;;  %v2006_v8 = vadd.f32 %v6078_v26, %v1734_v33 }
 0x35a   : > { %v1983_v54 = vpop.f32.mrf.mxu1 }
 0x35b   : > { %v1900_v56 = vpop.f32.mrf.mxu0  ;;  %vm2022_vm1 = vcmp.ge.f32.partialorder %v2006_v8, 0.0 }
 0x35c   : > { %v2009_v58 = vadd.f32 %v1900_v56, %v1737_v53  ;;  %v1987_v59 = vpop.f32.mrf.mxu1  ;;  %v2008_v56 = vadd.f32 %v6080_v49, %v1736_v40 }
 0x35d   : > { %v1904_v62 = vpop.f32.mrf.mxu0  ;;  %v2010_v63 = vadd.f32 %v1987_v59, %v1738_v55  ;;  %v1733_v55 = vadd.f32 %v6070_v32, %v1462_v23  ;;  %v1732_v59 = vadd.f32 %v6068_v24, %v1461_v43  ;;  %v2038_v24 = vmul.f32 0.2, %v2006_v8 }
 0x35e   : > { %vm2025_vm5 = vcmp.ge.f32.partialorder %v2009_v58, 0.0  ;;  %v2041_v2 = vmul.f32 0.2, %v2009_v58  ;;  %v2012_v4 = vadd.f32 %v1904_v62, %v1740_v57  ;;  %v1989_v5 = vpop.f32.mrf.mxu1  ;;  %v2040_v49 = vmul.f32 0.2, %v2008_v56 }
 0x35f   : > { %vm2026_vm6 = vcmp.ge.f32.partialorder %v2010_v63, 0.0  ;;  %v2042_v13 = vmul.f32 0.2, %v2010_v63  ;;  %v1906_v28 = vpop.f32.mrf.mxu0  ;;  %v2005_v44 = vadd.f32 %v6076_v29, %v1733_v55  ;;  %v2004_v7 = vadd.f32 %v6074_v35, %v1732_v59  ;;  %v2162_v55 = vld [vmem:[%s6936_s10 + $0x8] sm:$0xff] }
 0x360   : > { %v2044_v16 = vmul.f32 0.2, %v2012_v4  ;;  %v2013_v17 = vadd.f32 %v1906_v28, %v1741_v0  ;;  %v2057_v20 = vsel %vm2025_vm5, %v2009_v58, %v2041_v2  ;;  %v1993_v31 = vpop.f32.mrf.mxu1  ;;  %vm2028_vm7 = vcmp.ge.f32.partialorder %v2012_v4, 0.0 }
 0x361   : > { %2094 = vrot.lane.b32.xlu0 %v2057_v20, %s5425_s26  ;;  %v1910_v14 = vpop.f32.mrf.mxu0  ;;  %v2014_v39 = vadd.f32 %v1993_v31, %v1742_v25  ;;  %v2058_v36 = vsel %vm2026_vm6, %v2010_v63, %v2042_v13  ;;  %v2037_v29 = vmul.f32 0.2, %v2005_v44  ;;  %vm2021_vm13 = vcmp.ge.f32.partialorder %v2005_v44, 0.0 }
 0x362   : > { %v2016_v34 = vadd.f32 %v1910_v14, %v1744_v15  ;;  %2096 = vrot.lane.b32.xlu1 %v2058_v36, %s5425_s26  ;;  %v1995_v18 = vpop.f32.mrf.mxu1  ;;  %v2045_v41 = vmul.f32 0.2, %v2013_v17  ;;  %v2060_v47 = vsel %vm2028_vm7, %v2012_v4, %v2044_v16  ;;  %vm2029_vm9 = vcmp.ge.f32.partialorder %v2013_v17, 0.0 }
 0x363   : > { %vm2030_vm8 = vcmp.ge.f32.partialorder %v2014_v39, 0.0  ;;  %v2046_v30 = vmul.f32 0.2, %v2014_v39  ;;  %v1912_v42 = vpop.f32.mrf.mxu0  ;;  %vm2024_vm14 = vcmp.ge.f32.partialorder %v2008_v56, 0.0  ;;  %v2036_v22 = vmul.f32 0.2, %v2004_v7 }
 0x364   : > { %v1999_v46 = vpop.f32.mrf.mxu1  ;;  %v2048_v48 = vmul.f32 0.2, %v2016_v34  ;;  %v2017_v51 = vadd.f32 %v1912_v42, %v1745_v37  ;;  %vm2032_vm10 = vcmp.ge.f32.partialorder %v2016_v34, 0.0  ;;  %v2061_v32 = vsel %vm2029_vm9, %v2013_v17, %v2045_v41 }
 0x365   : > { %v2018_v53 = vadd.f32 %v1999_v46, %v1746_v27  ;;  %v2062_v54 = vsel %vm2030_vm8, %v2014_v39, %v2046_v30  ;;  %v2056_v62 = vsel %vm2024_vm14, %v2008_v56, %v2040_v49  ;;  %v2053_v63 = vsel %vm2021_vm13, %v2005_v44, %v2037_v29 }
 0x366   : > { %2100 = vrot.lane.b32.xlu1 %v2060_v47, %s5425_s26  ;;  %2104 = vrot.lane.b32.xlu0 %v2062_v54, %s5425_s26  ;;  %v2001_v11 = vpop.f32.mrf.mxu1  ;;  %v2049_v52 = vmul.f32 0.2, %v2017_v51  ;;  %v2064_v58 = vsel %vm2032_vm10, %v2016_v34, %v2048_v48  ;;  %vm2033_vm11 = vcmp.ge.f32.partialorder %v2017_v51, 0.0  ;;  %vm2020_vm15 = vcmp.ge.f32.partialorder %v2004_v7, 0.0  ;;  %v2161_v54 = vld [vmem:[%s6936_s10] sm:$0xff] }
 0x367   : > { %v2050_v57 = vmul.f32 0.2, %v2018_v53  ;;  %vm2034_vm12 = vcmp.ge.f32.partialorder %v2018_v53, 0.0  ;;  %v2054_v35 = vsel %vm2022_vm1, %v2006_v8, %v2038_v24  ;;  %v2052_v26 = vsel %vm2020_vm15, %v2004_v7, %v2036_v22 }
 0x368   : > { %v2065_v60 = vsel %vm2033_vm11, %v2017_v51, %v2049_v52  ;;  %vm2116_vm5 = vcmask 15360   ;;  %v2163_v51 = vld [vmem:[%s6936_s10 + $0x10] sm:$0xff]  ;;  %vm2780_vm6 = vcmask 998400  }
 0x369   : > { %v2066_v61 = vsel %vm2034_vm12, %v2018_v53, %v2050_v57  ;;  %v2164_v53 = vld [vmem:[%s6936_s10 + $0x18] sm:$0xff] }
 0x36a   : > { %2102 = vrot.lane.b32.xlu1 %v2061_v32, %s5425_s26  ;;  %2108 = vrot.lane.b32.xlu0 %v2064_v58, %s5425_s26 }
 0x36e   : > { %2110 = vrot.lane.b32.xlu0 %v2065_v60, %s5425_s26  ;;  %2112 = vrot.lane.b32.xlu1 %v2066_v61, %s5425_s26 }
 0x372   : > { %2092 = vrot.lane.b32.xlu0 %v2056_v62, %s5425_s26  ;;  %2086 = vrot.lane.b32.xlu1 %v2053_v63, %s5425_s26 }
 0x376   : > { %2088 = vrot.lane.b32.xlu0 %v2054_v35, %s5425_s26  ;;  %2084 = vrot.lane.b32.xlu1 %v2052_v26, %s5425_s26  ;;  %s5430_s26 = smov 118  }
 0x37a   : > { %5238 = vrot.lane.b32.xlu0 %v5422_v19, %s5421_s17  ;;  %5243 = vrot.lane.b32.xlu1 %v5422_v19, %s5421_s17 }
 0x37e   : > { %5248 = vrot.lane.b32.xlu0 %v5422_v19, %s5426_s14 }
 0x3d3   : > { %v2095_v0 = vpop.permute.xlu0 %2094 }
 0x3d4   : > { %v2097_v2 = vpop.permute.xlu1 %2096 }
 0x3d5   : > { %v2121_v18 = vsel %vm2116_vm5, %v2095_v0, %v2097_v2 }
 0x3d6   : > { %v2151_v27 = vsel %vm647_vm3, %v2121_v18, 0.0 }
 0x3d8   : > { %v2101_v4 = vpop.permute.xlu1 %2100  ;;  %v2105_v5 = vpop.permute.xlu0 %2104 }
 0x3d9   : > { %v2153_v23 = vsel %vm641_vm0, %v2101_v4, 0.0 }
 0x3dc   : > { %v2103_v10 = vpop.permute.xlu1 %2102  ;;  %v2109_v25 = vpop.permute.xlu0 %2108 }
 0x3dd   : > { %v2124_v37 = vsel %vm2116_vm5, %v2103_v10, %v2105_v5  ;;  %v2157_v21 = vsel %vm641_vm0, %v2109_v25, 0.0  ;;  %v2123_v41 = vsel %vm2116_vm5, %v2101_v4, %v2103_v10 }
 0x3de   : > { %v2155_v42 = vsel %vm647_vm3, %v2124_v37, 0.0 }
 0x3e0   : > { %v2111_v13 = vpop.permute.xlu0 %2110  ;;  %v2113_v28 = vpop.permute.xlu1 %2112 }
 0x3e1   : > { %v2126_v46 = vsel %vm2116_vm5, %v2109_v25, %v2111_v13  ;;  %v2127_v47 = vsel %vm2116_vm5, %v2111_v13, %v2113_v28 }
 0x3e2   : > { %v2159_v48 = vsel %vm647_vm3, %v2127_v47, 0.0 }
 0x3e4   : > { %v2093_v15 = vpop.permute.xlu0 %2092  ;;  %v2087_v16 = vpop.permute.xlu1 %2086 }
 0x3e5   : > { %v2149_v38 = vsel %vm641_vm0, %v2093_v15, 0.0  ;;  %v2120_v30 = vsel %vm2116_vm5, %v2093_v15, %v2095_v0 }
 0x3e8   : > { %v2089_v17 = vpop.permute.xlu0 %2088  ;;  %v2085_v20 = vpop.permute.xlu1 %2084 }
 0x3e9   : > { %v2118_v31 = vsel %vm2116_vm5, %v2087_v16, %v2089_v17  ;;  %v2145_v45 = vsel %vm641_vm0, %v2085_v20, 0.0  ;;  %v2117_v36 = vsel %vm2116_vm5, %v2085_v20, %v2087_v16 }
 0x3ea   : > { %v2147_v14 = vsel %vm647_vm3, %v2118_v31, 0.0  ;;  %2185 = vrot.lane.b32.xlu0 %v2145_v45, %s5421_s17  ;;  %v2165_v31 = vld [vmem:[%s6931_s5] sm:$0xff] }
 0x3eb   : > { %2189 = vrot.lane.b32.xlu1 %v2147_v14, %s5421_s17 }
 0x3ec   : > { %v6120_v39 = vpop.permute.xlu0 %5238  ;;  %v5244_v11 = vpop.permute.xlu1 %5243 }
 0x3ed   : > { %v5240_v34 = vunpack.i.l.bf16 %v6120_v39  ;;  %v5241_v35 = vunpack.i.h.bf16 %v6120_v39  ;;  %v5245_v4 = vunpack.i.l.bf16 %v5244_v11  ;;  %v5246_v15 = vunpack.i.h.bf16 %v5244_v11 }
 0x3ee   : > { %2187 = vrot.lane.b32.xlu0 %v2117_v36, %s5421_s17 }
 0x3ef   : > { %2193 = vrot.lane.b32.xlu1 %v2149_v38, %s5421_s17  ;;  %2370 = vmatprep.subr.mxu1 %v5240_v34 }
 0x3f0   : > { %v6183_v40 = vpop.permute.xlu0 %5248 }
 0x3f2   : > { %2197 = vrot.lane.b32.xlu0 %v2151_v27, %s5421_s17 }
 0x3f3   : > { %2484 = vrot.lane.b32.xlu1 %v2149_v38, %s5426_s14 }
 0x3f6   : > { %2488 = vrot.lane.b32.xlu0 %v2151_v27, %s5426_s14 }
 0x3f7   : > { %2195 = vrot.lane.b32.xlu1 %v2120_v30, %s5421_s17 }
 0x3fa   : > { %2205 = vrot.lane.b32.xlu0 %v2155_v42, %s5421_s17 }
 0x3fb   : > { %2486 = vrot.lane.b32.xlu1 %v2120_v30, %s5426_s14 }
 0x3fe   : > { %2496 = vrot.lane.b32.xlu0 %v2155_v42, %s5426_s14 }
 0x3ff   : > { %2201 = vrot.lane.b32.xlu1 %v2153_v23, %s5421_s17 }
 0x402   : > { %2209 = vrot.lane.b32.xlu0 %v2157_v21, %s5421_s17 }
 0x403   : > { %2492 = vrot.lane.b32.xlu1 %v2153_v23, %s5426_s14 }
 0x406   : > { %2500 = vrot.lane.b32.xlu0 %v2157_v21, %s5426_s14 }
 0x407   : > { %2203 = vrot.lane.b32.xlu1 %v2123_v41, %s5421_s17 }
 0x40a   : > { %2211 = vrot.lane.b32.xlu0 %v2126_v46, %s5421_s17 }
 0x40b   : > { %2494 = vrot.lane.b32.xlu1 %v2123_v41, %s5426_s14 }
 0x40e   : > { %2478 = vrot.lane.b32.xlu0 %v2117_v36, %s5426_s14 }
 0x40f   : > { %2213 = vrot.lane.b32.xlu1 %v2159_v48, %s5421_s17 }
 0x412   : > { %2502 = vrot.lane.b32.xlu0 %v2126_v46, %s5426_s14 }
 0x413   : > { %2480 = vrot.lane.b32.xlu1 %v2147_v14, %s5426_s14 }
 0x416   : > { %2476 = vrot.lane.b32.xlu0 %v2145_v45, %s5426_s14 }
 0x417   : > { %5253 = vrot.lane.b32.xlu1 %v5422_v19, %s5426_s14 }
 0x41a   : > { %2774 = vrot.lane.b32.xlu0 %v2126_v46, %s5427_s24  ;;  %v5251_v46 = vunpack.i.h.bf16 %v6183_v40 }
 0x41b   : > { %2766 = vrot.lane.b32.xlu1 %v2123_v41, %s5427_s24 }
 0x41e   : > { %2772 = vrot.lane.b32.xlu0 %v2157_v21, %s5427_s24 }
 0x41f   : > { %2504 = vrot.lane.b32.xlu1 %v2159_v48, %s5426_s14 }
 0x422   : > { %2768 = vrot.lane.b32.xlu0 %v2155_v42, %s5427_s24 }
 0x423   : > { %2764 = vrot.lane.b32.xlu1 %v2153_v23, %s5427_s24 }
 0x426   : > { %5258 = vrot.lane.b32.xlu0 %v5422_v19, %s5427_s24 }
 0x427   : > { %2758 = vrot.lane.b32.xlu1 %v2120_v30, %s5427_s24  ;;  %v2167_v30 = vld [vmem:[%s6931_s5 + $0x10] sm:$0xff] }
 0x42a   : > { %2760 = vrot.lane.b32.xlu0 %v2151_v27, %s5427_s24 }
 0x42b   : > { %2756 = vrot.lane.b32.xlu1 %v2149_v38, %s5427_s24  ;;  %v2166_v38 = vld [vmem:[%s6931_s5 + $0x8] sm:$0xff] }
 0x42e   : > { %2750 = vrot.lane.b32.xlu0 %v2117_v36, %s5427_s24  ;;  %v5250_v36 = vunpack.i.l.bf16 %v6183_v40 }
 0x42f   : > { %2776 = vrot.lane.b32.xlu1 %v2159_v48, %s5427_s24 }
 0x432   : > { %2748 = vrot.lane.b32.xlu0 %v2145_v45, %s5427_s24 }
 0x433   : > { %2752 = vrot.lane.b32.xlu1 %v2147_v14, %s5427_s24 }
 0x436   : > { %2754 = vrot.lane.b32.xlu0 %v5422_v19, %s5427_s24 }
 0x437   : > { %2762 = vrot.lane.b32.xlu1 %v5422_v19, %s5427_s24  ;;  %s5436_s24 = smov [#allocation6]  }
 0x438   : > { %s5337_s30 = sshll.u32 %s5436_s24, 4  ;;  %s5338_s30 = int_to_ptr.vmem [resolvable:$false] %s5337_s30 }
 0x439   : > { %s5339_s17 = scalar_lea.vmem %s5338_s30, 96 }
 0x43a   : > { %2447 = vperm.xlu0 %5210, %v2163_v51  }
 0x43b   : > { %2452 = vperm.xlu1 %5211, %v2164_v53   ;;  %v2168_v53 = vld [vmem:[%s6931_s5 + $0x18] sm:$0xff] }
 0x43e   : > { %2437 = vperm.xlu0 %5210, %v2161_v54  }
 0x43f   : > { %2442 = vperm.xlu1 %5211, %v2162_v55  }
 0x45c   : > { %v2186_v6 = vpop.permute.xlu0 %2185 }
 0x45d   : > { %v2190_v43 = vpop.permute.xlu1 %2189 }
 0x45e   : > { %v2219_v39 = vsel %vm972_vm2, %v2190_v43, %v5246_v15 }
 0x460   : > { %v2188_v44 = vpop.permute.xlu0 %2187 }
 0x461   : > { %v2194_v56 = vpop.permute.xlu1 %2193  ;;  %v2218_v14 = vsel %vm972_vm2, %v2188_v44, %v2190_v43  ;;  %v2217_v18 = vsel %vm972_vm2, %v2186_v6, %v2188_v44 }
 0x464   : > { %v2198_v52 = vpop.permute.xlu0 %2197 }
 0x465   : > { %v6185_v57 = vpop.permute.xlu1 %2484  ;;  %v2222_v17 = vsel %vm972_vm2, %v2198_v52, %v5245_v4 }
 0x468   : > { %v6187_v32 = vpop.permute.xlu0 %2488 }
 0x469   : > { %v2196_v58 = vpop.permute.xlu1 %2195 }
 0x46a   : > { %v2221_v16 = vsel %vm972_vm2, %v2196_v58, %v2198_v52  ;;  %v2220_v20 = vsel %vm972_vm2, %v2194_v56, %v2196_v58 }
 0x46c   : > { %v2206_v33 = vpop.permute.xlu0 %2205 }
 0x46d   : > { %v6189_v59 = vpop.permute.xlu1 %2486  ;;  %v2225_v25 = vsel %vm972_vm2, %v2206_v33, %v5241_v35 }
 0x470   : > { %v6191_v7 = vpop.permute.xlu0 %2496 }
 0x471   : > { %v2202_v8 = vpop.permute.xlu1 %2201 }
 0x474   : > { %v2210_v29 = vpop.permute.xlu0 %2209 }
 0x475   : > { %v6193_v49 = vpop.permute.xlu1 %2492 }
 0x478   : > { %v6195_v60 = vpop.permute.xlu0 %2500 }
 0x479   : > { %v2204_v61 = vpop.permute.xlu1 %2203 }
 0x47a   : > { %v2224_v10 = vsel %vm972_vm2, %v2204_v61, %v2206_v33  ;;  %v2223_v28 = vsel %vm972_vm2, %v2202_v8, %v2204_v61 }
 0x47c   : > { %v2212_v22 = vpop.permute.xlu0 %2211 }
 0x47d   : > { %v6197_v24 = vpop.permute.xlu1 %2494  ;;  %v2226_v2 = vsel %vm972_vm2, %v2210_v29, %v2212_v22 }
 0x480   : > { %v6199_v62 = vpop.permute.xlu0 %2478 }
 0x481   : > { %v2214_v63 = vpop.permute.xlu1 %2213 }
 0x482   : > { %v2227_v26 = vsel %vm972_vm2, %v2212_v22, %v2214_v63  ;;  %v2228_v0 = vsel %vm972_vm2, %v2214_v63, %v5240_v34  ;;  %vm2508_vm2 = vcmask 1014784   ;;  %v5016_v63 = vld [vmem:[%s6931_s5 + $0x30] sm:$0xff] }
 0x483   : > { %2281 = vmatprep.subr.mxu0 %v2227_v26  ;;  %2371 = vmatpush1.msra.mxu1 %v2228_v0  ;;  %v2516_v51 = vsel %vm2508_vm2, %v6197_v24, %v6191_v7  ;;  %v2517_v40 = vsel %vm2508_vm2, %v6191_v7, %v5251_v46  ;;  %v2515_v6 = vsel %vm2508_vm2, %v6193_v49, %v6197_v24  ;;  %v5015_v49 = vld [vmem:[%s6931_s5 + $0x28] sm:$0xff] }
 0x484   : > { %v2503_v5 = vpop.permute.xlu0 %2502  ;;  %2282 = vmatpush1.msra.mxu0 %v2226_v2  ;;  %2372 = vmatprep.subr.mxu1 %v5241_v35  ;;  %v2513_v43 = vsel %vm2508_vm2, %v6189_v59, %v6187_v32  ;;  %v2512_v52 = vsel %vm2508_vm2, %v6185_v57, %v6189_v59 }
 0x485   : > { %2283 = vmatprep.subr.mxu0 %v2224_v10  ;;  %2373 = vmatpush1.msra.mxu1 %v2225_v25  ;;  %v6209_v13 = vpop.permute.xlu1 %2480  ;;  %v2518_v47 = vsel %vm2508_vm2, %v6195_v60, %v2503_v5 }
 0x486   : > { %2284 = vmatpush1.msra.mxu0 %v2223_v28  ;;  %2374 = vmatprep.subr.mxu1 %v5245_v4  ;;  %v2510_v33 = vsel %vm2508_vm2, %v6199_v62, %v6209_v13 }
 0x487   : > { %2285 = vmatprep.subr.mxu0 %v2221_v16  ;;  %2375 = vmatpush1.msra.mxu1 %v2222_v17 }
 0x488   : > { %v6218_v45 = vpop.permute.xlu0 %2476  ;;  %2286 = vmatpush1.msra.mxu0 %v2220_v20  ;;  %2376 = vmatprep.subr.mxu1 %v5246_v15  ;;  %v5026_v20 = vld [vmem:[%s6931_s5 + $0x40] sm:$0xff] }
 0x489   : > { %2287 = vmatprep.subr.mxu0 %v2218_v14  ;;  %v5254_v34 = vpop.permute.xlu1 %5253  ;;  %2377 = vmatpush1.msra.mxu1 %v2219_v39  ;;  %v2509_v57 = vsel %vm2508_vm2, %v6218_v45, %v6199_v62  ;;  %v5027_v14 = vld [vmem:[%s6931_s5 + $0x48] sm:$0xff]  ;;  %v5028_v39 = vld [vmem:[%s6931_s5 + $0x50] sm:$0xff] }
 0x48a   : > { %2288 = vmatpush1.msra.mxu0 %v2217_v18  ;;  %5010 = vmatmul.mubr.msk.f32.vlgmr.msra.gmra.mxu1 %vm1250_vm4, %v2165_v31  ;;  %v5255_v54 = vunpack.i.l.bf16 %v5254_v34  ;;  %v5256_v11 = vunpack.i.h.bf16 %v5254_v34 }
 0x48b   : > { %2662 = vmatprep.subr.mxu1 %v5250_v36  ;;  %5006 = vmatmul.mubr.msk.f32.vlgmr.msra.gmra.mxu0 %vm1250_vm4, %v2165_v31 }
 0x48c   : > { %v6229_v27 = vpop.permute.xlu0 %2774  ;;  %2416 = vmatprep.mubr.f32.mxu1 %v5422_v19  ;;  %2327 = vmatprep.mubr.f32.mxu0 %v5422_v19  ;;  %v2514_v56 = vsel %vm2508_vm2, %v6187_v32, %v5255_v54  ;;  %v2511_v7 = vsel %vm2508_vm2, %v6209_v13, %v5256_v11  ;;  %v5014_v32 = vld [vmem:[%s6931_s5 + $0x20] sm:$0xff] }
 0x48d   : > { %v6233_v37 = vpop.permute.xlu1 %2766 }
 0x48e   : > { %5011 = vmatmul.mubr.msk.f32.gmra.mxu1 %vm1250_vm4, %v2166_v38 }
 0x48f   : > { %5007 = vmatmul.mubr.msk.f32.gmra.mxu0 %vm1250_vm4, %v2166_v38  ;;  %2422 = vmatprep.mubr.f32.mxu1 %v5422_v19 }
 0x490   : > { %v6241_v42 = vpop.permute.xlu0 %2772  ;;  %2333 = vmatprep.mubr.f32.mxu0 %v5422_v19 }
 0x491   : > { %v2505_v23 = vpop.permute.xlu1 %2504  ;;  %v2790_v35 = vsel %vm2780_vm6, %v6241_v42, %v6229_v27 }
 0x492   : > { %5012 = vmatmul.mubr.msk.f32.gmra.mxu1 %vm1250_vm4, %v2167_v30  ;;  %v2519_v21 = vsel %vm2508_vm2, %v2503_v5, %v2505_v23  ;;  %v2520_v41 = vsel %vm2508_vm2, %v2505_v23, %v5250_v36  ;;  %v5017_v5 = vld [vmem:[%s6931_s5 + $0x38] sm:$0xff] }
 0x493   : > { %5008 = vmatmul.mubr.msk.f32.gmra.mxu0 %vm1250_vm4, %v2167_v30  ;;  %2573 = vmatprep.subr.mxu0 %v2519_v21  ;;  %v5029_v36 = vld [vmem:[%s6931_s5 + $0x58] sm:$0xff] }
 0x494   : > { %2663 = vmatpush1.msra.mxu1 %v2520_v41  ;;  %v6251_v48 = vpop.permute.xlu0 %2768  ;;  %2574 = vmatpush1.msra.mxu0 %v2518_v47 }
 0x495   : > { %2664 = vmatprep.subr.mxu1 %v5251_v46  ;;  %2575 = vmatprep.subr.mxu0 %v2516_v51  ;;  %v6259_v55 = vpop.permute.xlu1 %2764  ;;  %v2788_v2 = vsel %vm2780_vm6, %v6233_v37, %v6251_v48 }
 0x496   : > { %2428 = vmatprep.mubr.f32.mxu1 %v5422_v19  ;;  %2665 = vmatpush1.msra.mxu1 %v2517_v40  ;;  %v2787_v10 = vsel %vm2780_vm6, %v6259_v55, %v6233_v37 }
 0x497   : > { %2339 = vmatprep.mubr.f32.mxu0 %v5422_v19  ;;  %5013 = vmatmul.mubr.msk.f32.gmra.mxu1 %vm1250_vm4, %v2168_v53 }
 0x498   : > { %2576 = vmatpush1.msra.mxu0 %v2515_v6  ;;  %2666 = vmatprep.subr.mxu1 %v5255_v54  ;;  %v5259_v44 = vpop.permute.xlu0 %5258 }
 0x499   : > { %5009 = vmatmul.mubr.msk.f32.gmra.mxu0 %vm1250_vm4, %v2168_v53  ;;  %2577 = vmatprep.subr.mxu0 %v2513_v43  ;;  %v2759_v58 = vpop.permute.xlu1 %2758  ;;  %v5260_v59 = vunpack.i.l.bf16 %v5259_v44  ;;  %v5261_v62 = vunpack.i.h.bf16 %v5259_v44 }
 0x49a   : > { %2667 = vmatpush1.msra.mxu1 %v2514_v56  ;;  %2578 = vmatpush1.msra.mxu0 %v2512_v52 }
 0x49b   : > { %2668 = vmatprep.subr.mxu1 %v5256_v11  ;;  %2579 = vmatprep.subr.mxu0 %v2510_v33  ;;  %v2789_v4 = vsel %vm2780_vm6, %v6251_v48, %v5261_v62 }
 0x49c   : > { %2669 = vmatpush1.msra.mxu1 %v2511_v7  ;;  %2702 = vmatprep.mubr.f32.mxu1 %v5422_v19  ;;  %v2761_v8 = vpop.permute.xlu0 %2760 }
 0x49d   : > { %2580 = vmatpush1.msra.mxu0 %v2509_v57  ;;  %2613 = vmatprep.mubr.f32.mxu0 %v5422_v19  ;;  %v2757_v29 = vpop.permute.xlu1 %2756  ;;  %v2785_v13 = vsel %vm2780_vm6, %v2759_v58, %v2761_v8 }
 0x49e   : > { %5022 = vmatmul.mubr.msk.f32.vlgmr.msra.gmra.mxu1 %vm1250_vm4, %v5014_v32  ;;  %5018 = vmatmul.mubr.msk.f32.vlgmr.msra.gmra.mxu0 %vm1250_vm4, %v5014_v32  ;;  %v2784_v15 = vsel %vm2780_vm6, %v2757_v29, %v2759_v58 }
 0x49f   : > { %2708 = vmatprep.mubr.f32.mxu1 %v5422_v19  ;;  %2619 = vmatprep.mubr.f32.mxu0 %v5422_v19 }
 0x4a0   : > { %2934 = vmatprep.subr.mxu1 %v5260_v59  ;;  %v2751_v60 = vpop.permute.xlu0 %2750 }
 0x4a1   : > { %v2777_v61 = vpop.permute.xlu1 %2776 }
 0x4a2   : > { %5023 = vmatmul.mubr.msk.f32.gmra.mxu1 %vm1250_vm4, %v5015_v49  ;;  %5019 = vmatmul.mubr.msk.f32.gmra.mxu0 %vm1250_vm4, %v5015_v49  ;;  %v2791_v22 = vsel %vm2780_vm6, %v6229_v27, %v2777_v61  ;;  %v2792_v24 = vsel %vm2780_vm6, %v2777_v61, %v5260_v59 }
 0x4a3   : > { %2714 = vmatprep.mubr.f32.mxu1 %v5422_v19  ;;  %2625 = vmatprep.mubr.f32.mxu0 %v5422_v19 }
 0x4a4   : > { %2845 = vmatprep.subr.mxu0 %v2791_v22  ;;  %2935 = vmatpush1.msra.mxu1 %v2792_v24  ;;  %v2749_v26 = vpop.permute.xlu0 %2748 }
 0x4a5   : > { %2846 = vmatpush1.msra.mxu0 %v2790_v35  ;;  %2936 = vmatprep.subr.mxu1 %v5261_v62  ;;  %v2753_v0 = vpop.permute.xlu1 %2752  ;;  %v2781_v31 = vsel %vm2780_vm6, %v2749_v26, %v2751_v60 }
 0x4a6   : > { %5024 = vmatmul.mubr.msk.f32.gmra.mxu1 %vm1250_vm4, %v5016_v63  ;;  %5020 = vmatmul.mubr.msk.f32.gmra.mxu0 %vm1250_vm4, %v5016_v63  ;;  %v2782_v17 = vsel %vm2780_vm6, %v2751_v60, %v2753_v0 }
 0x4a7   : > { %2847 = vmatprep.subr.mxu0 %v2788_v2  ;;  %2720 = vmatprep.mubr.f32.mxu1 %v5422_v19 }
 0x4a8   : > { %2937 = vmatpush1.msra.mxu1 %v2789_v4  ;;  %2631 = vmatprep.mubr.f32.mxu0 %v5422_v19  ;;  %v2755_v16 = vpop.permute.xlu0 %2754 }
 0x4a9   : > { %2848 = vmatpush1.msra.mxu0 %v2787_v10  ;;  %v2763_v25 = vpop.permute.xlu1 %2762  ;;  %v2783_v45 = vsel %vm2780_vm6, %v2753_v0, %v2755_v16 }
 0x4aa   : > { %5025 = vmatmul.mubr.msk.f32.gmra.mxu1 %vm1250_vm4, %v5017_v5  ;;  %5021 = vmatmul.mubr.msk.f32.gmra.mxu0 %vm1250_vm4, %v5017_v5  ;;  %v2786_v28 = vsel %vm2780_vm6, %v2761_v8, %v2763_v25 }
 0x4ab   : > { %2849 = vmatprep.subr.mxu0 %v2785_v13  ;;  %2885 = vmatprep.mubr.f32.mxu0 %v5422_v19 }
 0x4ac   : > { %2850 = vmatpush1.msra.mxu0 %v2784_v15  ;;  %2938 = vmatprep.subr.mxu1 %v2763_v25 }
 0x4ad   : > { %2851 = vmatprep.subr.mxu0 %v2782_v17  ;;  %2939 = vmatpush1.msra.mxu1 %v2786_v28 }
 0x4ae   : > { %2852 = vmatpush1.msra.mxu0 %v2781_v31  ;;  %2940 = vmatprep.subr.mxu1 %v2755_v16 }
 0x4af   : > { %5030 = vmatmul.mubr.msk.f32.vlgmr.msra.gmra.mxu0 %vm1250_vm4, %v5026_v20  ;;  %2941 = vmatpush1.msra.mxu1 %v2783_v45 }
 0x4b0   : > { %2974 = vmatprep.mubr.f32.mxu1 %v5422_v19  ;;  %2891 = vmatprep.mubr.f32.mxu0 %v5422_v19 }
 0x4b1   : > { %5034 = vmatmul.mubr.msk.f32.vlgmr.msra.gmra.mxu1 %vm1250_vm4, %v5026_v20 }
 0x4b2   : > { %2980 = vmatprep.mubr.f32.mxu1 %v5422_v19 }
 0x4b3   : > { %5031 = vmatmul.mubr.msk.f32.gmra.mxu0 %vm1250_vm4, %v5027_v14 }
 0x4b4   : > { %2897 = vmatprep.mubr.f32.mxu0 %v5422_v19 }
 0x4b5   : > { %5035 = vmatmul.mubr.msk.f32.gmra.mxu1 %vm1250_vm4, %v5027_v14  ;;  %v2448_v0 = vpop.permute.xlu0 %2447 }
 0x4b6   : > { %2986 = vmatprep.mubr.f32.mxu1 %v5422_v19  ;;  %v2453_v57 = vpop.permute.xlu1 %2452 }
 0x4b7   : > { %5032 = vmatmul.mubr.msk.f32.gmra.mxu0 %vm1250_vm4, %v5028_v39 }
 0x4b8   : > { %2903 = vmatprep.mubr.f32.mxu0 %v5422_v19 }
 0x4b9   : > { %5036 = vmatmul.mubr.msk.f32.gmra.mxu1 %vm1250_vm4, %v5028_v39 }
 0x4ba   : > { %2992 = vmatprep.mubr.f32.mxu1 %v5422_v19  ;;  %v2443_v61 = vpop.permute.xlu1 %2442 }
 0x4bb   : > { %5033 = vmatmul.mubr.msk.f32.gmra.mxu0 %vm1250_vm4, %v5029_v36 }
 0x4bc   : > { %3316 = vmatprep.mubr.f32.mxu0 %v5422_v19 }
 0x4bd   : > { %5037 = vmatmul.mubr.msk.f32.gmra.mxu1 %vm1250_vm4, %v5029_v36 }
 0x4be   : > { %3405 = vmatprep.mubr.f32.mxu1 %v5422_v19 }
 0x54a   : > { %v6364_v34 = vpop.f32.mrf.mxu1 }
 0x54b   : > { %v6366_v18 = vpop.f32.mrf.mxu0 }
 0x54c   : > { %v2414_v38 = vpop.f32.mrf.mxu1 }
 0x54d   : > { %v6368_v27 = vpop.f32.mrf.mxu0 }
 0x54e   : > { %v2418_v37 = vpop.f32.mrf.mxu1 }
 0x54f   : > { %v6370_v30 = vpop.f32.mrf.mxu0  ;;  %v2461_v62 = vadd.f32 %v2443_v61, %v2418_v37 }
 0x550   : > { %v2420_v42 = vpop.f32.mrf.mxu1 }
 0x551   : > { %v2331_v23 = vpop.f32.mrf.mxu0 }
 0x552   : > { %v2424_v21 = vpop.f32.mrf.mxu1  ;;  %v2460_v63 = vadd.f32 %v2443_v61, %v2331_v23 }
 0x553   : > { %v2335_v41 = vpop.f32.mrf.mxu0  ;;  %v2465_v5 = vadd.f32 %v2448_v0, %v2424_v21 }
 0x554   : > { %v2426_v46 = vpop.f32.mrf.mxu1  ;;  %v2463_v10 = vadd.f32 %v2448_v0, %v2335_v41 }
 0x555   : > { %v2337_v47 = vpop.f32.mrf.mxu0  ;;  %v2438_v46 = vpop.permute.xlu0 %2437 }
 0x556   : > { %v2464_v25 = vadd.f32 %v2448_v0, %v2337_v47 }
 0x557   : > { %v2430_v48 = vpop.f32.mrf.mxu1 }
 0x558   : > { %v2469_v38 = vadd.f32 %v2453_v57, %v2430_v48 }
 0x559   : > { %v2341_v51 = vpop.f32.mrf.mxu0  ;;  %v2432_v53 = vpop.f32.mrf.mxu1 }
 0x55a   : > { %v2467_v37 = vadd.f32 %v2453_v57, %v2341_v51 }
 0x55b   : > { %v2343_v54 = vpop.f32.mrf.mxu0 }
 0x55c   : > { %v2468_v42 = vadd.f32 %v2453_v57, %v2343_v54 }
 0x55e   : > { %v6372_v55 = vpop.f32.mrf.mxu1  ;;  %v6374_v40 = vpop.f32.mrf.mxu0 }
 0x560   : > { %v2706_v11 = vpop.f32.mrf.mxu1  ;;  %v6376_v6 = vpop.f32.mrf.mxu0 }
 0x562   : > { %v2710_v43 = vpop.f32.mrf.mxu1  ;;  %v6378_v44 = vpop.f32.mrf.mxu0 }
 0x563   : > { %v2733_v2 = vadd.f32 %v2710_v43, %v2461_v62 }
 0x564   : > { %v2712_v56 = vpop.f32.mrf.mxu1  ;;  %v2623_v52 = vpop.f32.mrf.mxu0 }
 0x565   : > { %v2732_v4 = vadd.f32 %v2623_v52, %v2460_v63  ;;  %v2456_v56 = vadd.f32 %v2438_v46, %v6368_v27 }
 0x566   : > { %v2716_v58 = vpop.f32.mrf.mxu1  ;;  %v2627_v33 = vpop.f32.mrf.mxu0 }
 0x567   : > { %v2737_v17 = vadd.f32 %v2716_v58, %v2465_v5  ;;  %v2735_v20 = vadd.f32 %v2627_v33, %v2463_v10  ;;  %v2728_v57 = vadd.f32 %v6376_v6, %v2456_v56  ;;  %v2457_v6 = vadd.f32 %v2438_v46, %v6364_v34 }
 0x568   : > { %v2718_v7 = vpop.f32.mrf.mxu1  ;;  %v2629_v32 = vpop.f32.mrf.mxu0 }
 0x569   : > { %v2736_v31 = vadd.f32 %v2629_v32, %v2464_v25  ;;  %v2459_v32 = vadd.f32 %v2443_v61, %v6370_v30 }
 0x56a   : > { %v2722_v59 = vpop.f32.mrf.mxu1  ;;  %v2633_v8 = vpop.f32.mrf.mxu0 }
 0x56b   : > { %v2739_v52 = vadd.f32 %v2633_v8, %v2467_v37  ;;  %v2741_v51 = vadd.f32 %v2722_v59, %v2469_v38 }
 0x56c   : > { %v2635_v29 = vpop.f32.mrf.mxu0  ;;  %v2724_v49 = vpop.f32.mrf.mxu1 }
 0x56d   : > { %v2740_v54 = vadd.f32 %v2635_v29, %v2468_v42  ;;  %v2455_v29 = vadd.f32 %v2438_v46, %v6366_v18 }
 0x56f   : > { %v6380_v60 = vpop.f32.mrf.mxu0 }
 0x571   : > { %v6382_v22 = vpop.f32.mrf.mxu0  ;;  %v6384_v24 = vpop.f32.mrf.mxu1 }
 0x572   : > { %v3000_v61 = vadd.f32 %v6382_v22, %v2728_v57 }
 0x573   : > { %v6386_v35 = vpop.f32.mrf.mxu0  ;;  %v2978_v26 = vpop.f32.mrf.mxu1 }
 0x574   : > { %v3032_v22 = vmul.f32 0.2, %v3000_v61  ;;  %vm3016_vm15 = vcmp.ge.f32.partialorder %v3000_v61, 0.0 }
 0x575   : > { %v2895_v13 = vpop.f32.mrf.mxu0  ;;  %v2982_v28 = vpop.f32.mrf.mxu1 }
 0x576   : > { %v3004_v15 = vadd.f32 %v2895_v13, %v2732_v4  ;;  %v3005_v16 = vadd.f32 %v2982_v28, %v2733_v2  ;;  %v2731_v4 = vadd.f32 %v6378_v44, %v2459_v32  ;;  %v2729_v28 = vadd.f32 %v6372_v55, %v2457_v6 }
 0x577   : > { %v2899_v45 = vpop.f32.mrf.mxu0  ;;  %v2984_v14 = vpop.f32.mrf.mxu1 }
 0x578   : > { %vm3020_vm7 = vcmp.ge.f32.partialorder %v3004_v15, 0.0  ;;  %v3036_v39 = vmul.f32 0.2, %v3004_v15  ;;  %vm3021_vm8 = vcmp.ge.f32.partialorder %v3005_v16, 0.0  ;;  %v3037_v36 = vmul.f32 0.2, %v3005_v16 }
 0x579   : > { %v3007_v23 = vadd.f32 %v2899_v45, %v2735_v20  ;;  %v2901_v21 = vpop.f32.mrf.mxu0  ;;  %v2988_v41 = vpop.f32.mrf.mxu1  ;;  %v3003_v5 = vadd.f32 %v6386_v35, %v2731_v4  ;;  %v3001_v18 = vadd.f32 %v6384_v24, %v2729_v28  ;;  %v3157_v4 = vld [vmem:[%s6937_s11 + $0x8] sm:$0xff] }
 0x57a   : > { %v3008_v47 = vadd.f32 %v2901_v21, %v2736_v31  ;;  %v3009_v53 = vadd.f32 %v2988_v41, %v2737_v17  ;;  %v3052_v11 = vsel %vm3020_vm7, %v3004_v15, %v3036_v39  ;;  %v3053_v43 = vsel %vm3021_vm8, %v3005_v16, %v3037_v36 }
 0x57b   : > { %vm3023_vm9 = vcmp.ge.f32.partialorder %v3007_v23, 0.0  ;;  %v3039_v58 = vmul.f32 0.2, %v3007_v23  ;;  %v2905_v33 = vpop.f32.mrf.mxu0  ;;  %3089 = vrot.lane.b32.xlu1 %v3052_v11, %s5428_s22  ;;  %3091 = vrot.lane.b32.xlu0 %v3053_v43, %s5428_s22  ;;  %v2990_v48 = vpop.f32.mrf.mxu1  ;;  %v2727_v15 = vadd.f32 %v6374_v40, %v2455_v29  ;;  %v3035_v35 = vmul.f32 0.2, %v3003_v5 }
 0x57c   : > { %vm3025_vm10 = vcmp.ge.f32.partialorder %v3009_v53, 0.0  ;;  %v3041_v7 = vmul.f32 0.2, %v3009_v53  ;;  %v3040_v49 = vmul.f32 0.2, %v3008_v47  ;;  %v3011_v27 = vadd.f32 %v2905_v33, %v2739_v52 }
 0x57d   : > { %v2907_v8 = vpop.f32.mrf.mxu0  ;;  %v2994_v62 = vpop.f32.mrf.mxu1  ;;  %v3055_v0 = vsel %vm3023_vm9, %v3007_v23, %v3039_v58  ;;  %vm3024_vm11 = vcmp.ge.f32.partialorder %v3008_v47, 0.0  ;;  %v2999_v34 = vadd.f32 %v6380_v60, %v2727_v15  ;;  %vm3019_vm1 = vcmp.ge.f32.partialorder %v3003_v5, 0.0 }
 0x57e   : > { %v3012_v63 = vadd.f32 %v2907_v8, %v2740_v54  ;;  %v3013_v26 = vadd.f32 %v2994_v62, %v2741_v51  ;;  %v3057_v2 = vsel %vm3025_vm10, %v3009_v53, %v3041_v7  ;;  %vm3027_vm12 = vcmp.ge.f32.partialorder %v3011_v27, 0.0 }
 0x57f   : > { %v3043_v59 = vmul.f32 0.2, %v3011_v27  ;;  %3095 = vrot.lane.b32.xlu0 %v3055_v0, %s5428_s22  ;;  %3099 = vrot.lane.b32.xlu1 %v3057_v2, %s5428_s22  ;;  %v2996_v30 = vpop.f32.mrf.mxu1  ;;  %v3056_v13 = vsel %vm3024_vm11, %v3008_v47, %v3040_v49  ;;  %v3031_v55 = vmul.f32 0.2, %v2999_v34  ;;  %v3033_v40 = vmul.f32 0.2, %v3001_v18 }
 0x580   : > { %v3044_v10 = vmul.f32 0.2, %v3012_v63  ;;  %v3045_v25 = vmul.f32 0.2, %v3013_v26  ;;  %vm3028_vm13 = vcmp.ge.f32.partialorder %v3012_v63, 0.0  ;;  %vm3029_vm14 = vcmp.ge.f32.partialorder %v3013_v26, 0.0 }
 0x581   : > { %v3059_v44 = vsel %vm3027_vm12, %v3011_v27, %v3043_v59  ;;  %v3051_v20 = vsel %vm3019_vm1, %v3003_v5, %v3035_v35  ;;  %v3048_v31 = vsel %vm3016_vm15, %v3000_v61, %v3032_v22  ;;  %vm3015_vm5 = vcmp.ge.f32.partialorder %v2999_v34, 0.0  ;;  %v3159_v0 = vld [vmem:[%s6937_s11 + $0x18] sm:$0xff]  ;;  %v3156_v2 = vld [vmem:[%s6937_s11] sm:$0xff] }
 0x582   : > { %v3060_v16 = vsel %vm3028_vm13, %v3012_v63, %v3044_v10  ;;  %v3061_v17 = vsel %vm3029_vm14, %v3013_v26, %v3045_v25  ;;  %vm3017_vm6 = vcmp.ge.f32.partialorder %v3001_v18, 0.0  ;;  %v3047_v24 = vsel %vm3015_vm5, %v2999_v34, %v3031_v55  ;;  %v3158_v26 = vld [vmem:[%s6937_s11 + $0x10] sm:$0xff] }
 0x583   : > { %3097 = vrot.lane.b32.xlu0 %v3056_v13, %s5428_s22  ;;  %3103 = vrot.lane.b32.xlu1 %v3059_v44, %s5428_s22  ;;  %v3049_v60 = vsel %vm3017_vm6, %v3001_v18, %v3033_v40  ;;  %vm3111_vm7 = vcmask 31744   ;;  %vm3775_vm8 = vcmask 965632  }
 0x587   : > { %3105 = vrot.lane.b32.xlu1 %v3060_v16, %s5428_s22  ;;  %3107 = vrot.lane.b32.xlu0 %v3061_v17, %s5428_s22 }
 0x58b   : > { %3087 = vrot.lane.b32.xlu1 %v3051_v20, %s5428_s22  ;;  %3081 = vrot.lane.b32.xlu0 %v3048_v31, %s5428_s22 }
 0x58f   : > { %3083 = vrot.lane.b32.xlu1 %v3049_v60, %s5428_s22  ;;  %3079 = vrot.lane.b32.xlu0 %v3047_v24, %s5428_s22  ;;  %s5434_s22 = smov 119  }
 0x593   : > { %5263 = vrot.lane.b32.xlu1 %v5422_v19, %s5426_s14  ;;  %5268 = vrot.lane.b32.xlu0 %v5422_v19, %s5426_s14 }
 0x597   : > { %5273 = vrot.lane.b32.xlu1 %v5422_v19, %s5429_s23 }
 0x5ed   : > { %v3090_v45 = vpop.permute.xlu1 %3089  ;;  %v3092_v14 = vpop.permute.xlu0 %3091 }
 0x5ee   : > { %v3116_v33 = vsel %vm3111_vm7, %v3090_v45, %v3092_v14 }
 0x5ef   : > { %v3146_v51 = vsel %vm647_vm3, %v3116_v33, 0.0 }
 0x5f1   : > { %v3096_v39 = vpop.permute.xlu0 %3095  ;;  %v3100_v36 = vpop.permute.xlu1 %3099 }
 0x5f2   : > { %v3148_v57 = vsel %vm641_vm0, %v3096_v39, 0.0 }
 0x5f5   : > { %v3098_v38 = vpop.permute.xlu0 %3097  ;;  %v3104_v37 = vpop.permute.xlu1 %3103 }
 0x5f6   : > { %v3119_v54 = vsel %vm3111_vm7, %v3098_v38, %v3100_v36  ;;  %v3152_v49 = vsel %vm641_vm0, %v3104_v37, 0.0  ;;  %v3118_v27 = vsel %vm3111_vm7, %v3096_v39, %v3098_v38 }
 0x5f7   : > { %v3150_v32 = vsel %vm647_vm3, %v3119_v54, 0.0 }
 0x5f9   : > { %v3106_v42 = vpop.permute.xlu1 %3105  ;;  %v3108_v23 = vpop.permute.xlu0 %3107 }
 0x5fa   : > { %v3121_v8 = vsel %vm3111_vm7, %v3104_v37, %v3106_v42  ;;  %v3122_v62 = vsel %vm3111_vm7, %v3106_v42, %v3108_v23 }
 0x5fb   : > { %v3154_v63 = vsel %vm647_vm3, %v3122_v62, 0.0 }
 0x5fd   : > { %v3088_v21 = vpop.permute.xlu1 %3087  ;;  %v3082_v41 = vpop.permute.xlu0 %3081 }
 0x5fe   : > { %v3144_v48 = vsel %vm641_vm0, %v3088_v21, 0.0  ;;  %v3115_v7 = vsel %vm3111_vm7, %v3088_v21, %v3090_v45 }
 0x601   : > { %v3084_v46 = vpop.permute.xlu1 %3083  ;;  %v3080_v47 = vpop.permute.xlu0 %3079 }
 0x602   : > { %v3113_v53 = vsel %vm3111_vm7, %v3082_v41, %v3084_v46  ;;  %v3140_v11 = vsel %vm641_vm0, %v3080_v47, 0.0  ;;  %v3112_v52 = vsel %vm3111_vm7, %v3080_v47, %v3082_v41 }
 0x603   : > { %v3142_v43 = vsel %vm647_vm3, %v3113_v53, 0.0  ;;  %3180 = vrot.lane.b32.xlu1 %v3140_v11, %s5426_s14  ;;  %v3160_v53 = vld [vmem:[#allocation3] sm:$0xff] }
 0x604   : > { %3184 = vrot.lane.b32.xlu0 %v3142_v43, %s5426_s14 }
 0x605   : > { %v6426_v56 = vpop.permute.xlu1 %5263  ;;  %v5269_v30 = vpop.permute.xlu0 %5268 }
 0x606   : > { %v5265_v58 = vunpack.i.l.bf16 %v6426_v56  ;;  %v5266_v60 = vunpack.i.h.bf16 %v6426_v56  ;;  %v5270_v39 = vunpack.i.l.bf16 %v5269_v30  ;;  %v5271_v21 = vunpack.i.h.bf16 %v5269_v30 }
 0x607   : > { %3182 = vrot.lane.b32.xlu1 %v3112_v52, %s5426_s14 }
 0x608   : > { %3188 = vrot.lane.b32.xlu0 %v3144_v48, %s5426_s14  ;;  %3365 = vmatprep.subr.mxu1 %v5265_v58 }
 0x609   : > { %v6489_v59 = vpop.permute.xlu1 %5273 }
 0x60b   : > { %3192 = vrot.lane.b32.xlu1 %v3146_v51, %s5426_s14 }
 0x60c   : > { %3479 = vrot.lane.b32.xlu0 %v3144_v48, %s5429_s23 }
 0x60f   : > { %3483 = vrot.lane.b32.xlu1 %v3146_v51, %s5429_s23 }
 0x610   : > { %3190 = vrot.lane.b32.xlu0 %v3115_v7, %s5426_s14 }
 0x613   : > { %3200 = vrot.lane.b32.xlu1 %v3150_v32, %s5426_s14 }
 0x614   : > { %3481 = vrot.lane.b32.xlu0 %v3115_v7, %s5429_s23 }
 0x617   : > { %3491 = vrot.lane.b32.xlu1 %v3150_v32, %s5429_s23 }
 0x618   : > { %3196 = vrot.lane.b32.xlu0 %v3148_v57, %s5426_s14 }
 0x61b   : > { %3204 = vrot.lane.b32.xlu1 %v3152_v49, %s5426_s14 }
 0x61c   : > { %3487 = vrot.lane.b32.xlu0 %v3148_v57, %s5429_s23 }
 0x61f   : > { %3495 = vrot.lane.b32.xlu1 %v3152_v49, %s5429_s23 }
 0x620   : > { %3198 = vrot.lane.b32.xlu0 %v3118_v27, %s5426_s14 }
 0x623   : > { %3206 = vrot.lane.b32.xlu1 %v3121_v8, %s5426_s14 }
 0x624   : > { %3489 = vrot.lane.b32.xlu0 %v3118_v27, %s5429_s23 }
 0x627   : > { %3473 = vrot.lane.b32.xlu1 %v3112_v52, %s5429_s23 }
 0x628   : > { %3208 = vrot.lane.b32.xlu0 %v3154_v63, %s5426_s14 }
 0x62b   : > { %3497 = vrot.lane.b32.xlu1 %v3121_v8, %s5429_s23 }
 0x62c   : > { %3475 = vrot.lane.b32.xlu0 %v3142_v43, %s5429_s23 }
 0x62f   : > { %3471 = vrot.lane.b32.xlu1 %v3140_v11, %s5429_s23 }
 0x630   : > { %5278 = vrot.lane.b32.xlu0 %v5422_v19, %s5429_s23 }
 0x633   : > { %3769 = vrot.lane.b32.xlu1 %v3121_v8, %s5430_s26  ;;  %v5276_v8 = vunpack.i.h.bf16 %v6489_v59 }
 0x634   : > { %3761 = vrot.lane.b32.xlu0 %v3118_v27, %s5430_s26 }
 0x637   : > { %3767 = vrot.lane.b32.xlu1 %v3152_v49, %s5430_s26 }
 0x638   : > { %3499 = vrot.lane.b32.xlu0 %v3154_v63, %s5429_s23 }
 0x63b   : > { %3763 = vrot.lane.b32.xlu1 %v3150_v32, %s5430_s26 }
 0x63c   : > { %3759 = vrot.lane.b32.xlu0 %v3148_v57, %s5430_s26 }
 0x63f   : > { %5283 = vrot.lane.b32.xlu1 %v5422_v19, %s5430_s26 }
 0x640   : > { %3753 = vrot.lane.b32.xlu0 %v3115_v7, %s5430_s26  ;;  %v3162_v7 = vld [vmem:[#allocation3 + $0x10] sm:$0xff] }
 0x643   : > { %3755 = vrot.lane.b32.xlu1 %v3146_v51, %s5430_s26 }
 0x644   : > { %3751 = vrot.lane.b32.xlu0 %v3144_v48, %s5430_s26  ;;  %v3161_v48 = vld [vmem:[#allocation3 + $0x8] sm:$0xff] }
 0x647   : > { %3745 = vrot.lane.b32.xlu1 %v3112_v52, %s5430_s26  ;;  %v5275_v52 = vunpack.i.l.bf16 %v6489_v59 }
 0x648   : > { %3771 = vrot.lane.b32.xlu0 %v3154_v63, %s5430_s26 }
 0x64b   : > { %3743 = vrot.lane.b32.xlu1 %v3140_v11, %s5430_s26 }
 0x64c   : > { %3747 = vrot.lane.b32.xlu0 %v3142_v43, %s5430_s26 }
 0x64f   : > { %3749 = vrot.lane.b32.xlu1 %v5422_v19, %s5430_s26 }
 0x650   : > { %3757 = vrot.lane.b32.xlu0 %v5422_v19, %s5430_s26  ;;  %s4826_s26 = scalar_lea.sflag [#allocation5], %s543_s20 }
 0x653   : > { %3442 = vperm.xlu1 %5211, %v3158_v26  }
 0x654   : > { %3447 = vperm.xlu0 %5210, %v3159_v0   ;;  %v3163_v0 = vld [vmem:[#allocation3 + $0x18] sm:$0xff] }
 0x657   : > { %3432 = vperm.xlu1 %5211, %v3156_v2  }
 0x658   : > { %3437 = vperm.xlu0 %5210, %v3157_v4  }
 0x675   : > { %v3181_v6 = vpop.permute.xlu1 %3180 }
 0x676   : > { %v3185_v29 = vpop.permute.xlu0 %3184 }
 0x677   : > { %v3214_v56 = vsel %vm2508_vm2, %v3185_v29, %v5271_v21 }
 0x679   : > { %v3183_v61 = vpop.permute.xlu1 %3182 }
 0x67a   : > { %v3189_v5 = vpop.permute.xlu0 %3188  ;;  %v3213_v43 = vsel %vm2508_vm2, %v3183_v61, %v3185_v29 }
 0x67d   : > { %v3193_v10 = vpop.permute.xlu1 %3192 }
 0x67e   : > { %v6491_v25 = vpop.permute.xlu0 %3479  ;;  %v3217_v41 = vsel %vm2508_vm2, %v3193_v10, %v5270_v39 }
 0x681   : > { %v6493_v13 = vpop.permute.xlu1 %3483 }
 0x682   : > { %v3191_v44 = vpop.permute.xlu0 %3190 }
 0x683   : > { %v3216_v46 = vsel %vm2508_vm2, %v3191_v44, %v3193_v10  ;;  %v3215_v47 = vsel %vm2508_vm2, %v3189_v5, %v3191_v44 }
 0x685   : > { %v3201_v28 = vpop.permute.xlu1 %3200 }
 0x686   : > { %v6495_v15 = vpop.permute.xlu0 %3481  ;;  %v3220_v36 = vsel %vm2508_vm2, %v3201_v28, %v5266_v60 }
 0x689   : > { %v6497_v34 = vpop.permute.xlu1 %3491 }
 0x68a   : > { %v3197_v18 = vpop.permute.xlu0 %3196 }
 0x68d   : > { %v3205_v22 = vpop.permute.xlu1 %3204 }
 0x68e   : > { %v6499_v35 = vpop.permute.xlu0 %3487 }
 0x691   : > { %v6501_v16 = vpop.permute.xlu1 %3495 }
 0x692   : > { %v3199_v17 = vpop.permute.xlu0 %3198 }
 0x693   : > { %v3219_v37 = vsel %vm2508_vm2, %v3199_v17, %v3201_v28  ;;  %v3218_v42 = vsel %vm2508_vm2, %v3197_v18, %v3199_v17  ;;  %v3467_v18 = vld [vmem:[#allocation3 + $0x20] sm:$0xff] }
 0x695   : > { %v3207_v55 = vpop.permute.xlu1 %3206 }
 0x696   : > { %v6503_v40 = vpop.permute.xlu0 %3489  ;;  %v3221_v14 = vsel %vm2508_vm2, %v3205_v22, %v3207_v55 }
 0x699   : > { %v6505_v20 = vpop.permute.xlu1 %3473 }
 0x69a   : > { %v3209_v31 = vpop.permute.xlu0 %3208 }
 0x69b   : > { %v3223_v24 = vsel %vm2508_vm2, %v3209_v31, %v5265_v58  ;;  %v3222_v45 = vsel %vm2508_vm2, %v3207_v55, %v3209_v31  ;;  %v3212_v58 = vsel %vm2508_vm2, %v3181_v6, %v3183_v61  ;;  %vm3503_vm2 = vcmask 990208   ;;  %v3469_v31 = vld [vmem:[#allocation3 + $0x30] sm:$0xff] }
 0x69c   : > { %3276 = vmatprep.subr.mxu0 %v3222_v45  ;;  %3366 = vmatpush1.msra.mxu1 %v3223_v24  ;;  %v3511_v26 = vsel %vm3503_vm2, %v6503_v40, %v6497_v34  ;;  %v3512_v2 = vsel %vm3503_vm2, %v6497_v34, %v5276_v8  ;;  %v3510_v30 = vsel %vm3503_vm2, %v6499_v35, %v6503_v40  ;;  %v3468_v35 = vld [vmem:[#allocation3 + $0x28] sm:$0xff] }
 0x69d   : > { %v3498_v38 = vpop.permute.xlu1 %3497  ;;  %3277 = vmatpush1.msra.mxu0 %v3221_v14  ;;  %3367 = vmatprep.subr.mxu1 %v5266_v60  ;;  %v3508_v29 = vsel %vm3503_vm2, %v6495_v15, %v6493_v13  ;;  %v3507_v5 = vsel %vm3503_vm2, %v6491_v25, %v6495_v15 }
 0x69e   : > { %3278 = vmatprep.subr.mxu0 %v3219_v37  ;;  %3368 = vmatpush1.msra.mxu1 %v3220_v36  ;;  %v6516_v23 = vpop.permute.xlu0 %3475  ;;  %v3513_v62 = vsel %vm3503_vm2, %v6501_v16, %v3498_v38  ;;  %v3470_v36 = vld [vmem:[#allocation3 + $0x38] sm:$0xff] }
 0x69f   : > { %3279 = vmatpush1.msra.mxu0 %v3218_v42  ;;  %3369 = vmatprep.subr.mxu1 %v5270_v39  ;;  %v3505_v28 = vsel %vm3503_vm2, %v6505_v20, %v6516_v23 }
 0x6a0   : > { %3280 = vmatprep.subr.mxu0 %v3216_v46  ;;  %3370 = vmatpush1.msra.mxu1 %v3217_v41 }
 0x6a1   : > { %v6521_v11 = vpop.permute.xlu1 %3471  ;;  %3281 = vmatpush1.msra.mxu0 %v3215_v47  ;;  %3371 = vmatprep.subr.mxu1 %v5271_v21  ;;  %v3739_v47 = vld [vmem:[#allocation3 + $0x40] sm:$0xff] }
 0x6a2   : > { %3282 = vmatprep.subr.mxu0 %v3213_v43  ;;  %v5279_v33 = vpop.permute.xlu0 %5278  ;;  %3372 = vmatpush1.msra.mxu1 %v3214_v56  ;;  %v3504_v25 = vsel %vm3503_vm2, %v6521_v11, %v6505_v20  ;;  %v3740_v43 = vld [vmem:[#allocation3 + $0x48] sm:$0xff]  ;;  %v3741_v56 = vld [vmem:[#allocation3 + $0x50] sm:$0xff] }
 0x6a3   : > { %3283 = vmatpush1.msra.mxu0 %v3212_v58  ;;  %5042 = vmatmul.mubr.msk.f32.vlgmr.msra.gmra.mxu1 %vm1250_vm4, %v3160_v53  ;;  %v5280_v4 = vunpack.i.l.bf16 %v5279_v33  ;;  %v5281_v6 = vunpack.i.h.bf16 %v5279_v33 }
 0x6a4   : > { %3657 = vmatprep.subr.mxu1 %v5275_v52  ;;  %5038 = vmatmul.mubr.msk.f32.vlgmr.msra.gmra.mxu0 %vm1250_vm4, %v3160_v53 }
 0x6a5   : > { %v6529_v51 = vpop.permute.xlu1 %3769  ;;  %3411 = vmatprep.mubr.f32.mxu1 %v5422_v19  ;;  %3322 = vmatprep.mubr.f32.mxu0 %v5422_v19  ;;  %v3509_v10 = vsel %vm3503_vm2, %v6493_v13, %v5280_v4  ;;  %v3506_v34 = vsel %vm3503_vm2, %v6516_v23, %v5281_v6 }
 0x6a6   : > { %v6533_v54 = vpop.permute.xlu0 %3761 }
 0x6a7   : > { %5043 = vmatmul.mubr.msk.f32.gmra.mxu1 %vm1250_vm4, %v3161_v48 }
 0x6a8   : > { %5039 = vmatmul.mubr.msk.f32.gmra.mxu0 %vm1250_vm4, %v3161_v48  ;;  %3417 = vmatprep.mubr.f32.mxu1 %v5422_v19 }
 0x6a9   : > { %v6538_v32 = vpop.permute.xlu1 %3767  ;;  %3328 = vmatprep.mubr.f32.mxu0 %v5422_v19 }
 0x6aa   : > { %v3500_v57 = vpop.permute.xlu0 %3499  ;;  %v3785_v60 = vsel %vm3775_vm8, %v6538_v32, %v6529_v51 }
 0x6ab   : > { %v3515_v49 = vsel %vm3503_vm2, %v3500_v57, %v5275_v52  ;;  %5044 = vmatmul.mubr.msk.f32.gmra.mxu1 %vm1250_vm4, %v3162_v7  ;;  %v3514_v27 = vsel %vm3503_vm2, %v3498_v38, %v3500_v57  ;;  %v3742_v52 = vld [vmem:[#allocation3 + $0x58] sm:$0xff] }
 0x6ac   : > { %5040 = vmatmul.mubr.msk.f32.gmra.mxu0 %vm1250_vm4, %v3162_v7  ;;  %3568 = vmatprep.subr.mxu0 %v3514_v27 }
 0x6ad   : > { %3658 = vmatpush1.msra.mxu1 %v3515_v49  ;;  %v6548_v63 = vpop.permute.xlu1 %3763  ;;  %3569 = vmatpush1.msra.mxu0 %v3513_v62 }
 0x6ae   : > { %3659 = vmatprep.subr.mxu1 %v5276_v8  ;;  %3570 = vmatprep.subr.mxu0 %v3511_v26  ;;  %v6555_v59 = vpop.permute.xlu0 %3759  ;;  %v3783_v14 = vsel %vm3775_vm8, %v6533_v54, %v6548_v63 }
 0x6af   : > { %3423 = vmatprep.mubr.f32.mxu1 %v5422_v19  ;;  %3660 = vmatpush1.msra.mxu1 %v3512_v2  ;;  %v3782_v38 = vsel %vm3775_vm8, %v6555_v59, %v6533_v54 }
 0x6b0   : > { %3334 = vmatprep.mubr.f32.mxu0 %v5422_v19  ;;  %5045 = vmatmul.mubr.msk.f32.gmra.mxu1 %vm1250_vm4, %v3163_v0 }
 0x6b1   : > { %3571 = vmatpush1.msra.mxu0 %v3510_v30  ;;  %3661 = vmatprep.subr.mxu1 %v5280_v4  ;;  %v5284_v61 = vpop.permute.xlu1 %5283 }
 0x6b2   : > { %5041 = vmatmul.mubr.msk.f32.gmra.mxu0 %vm1250_vm4, %v3163_v0  ;;  %3572 = vmatprep.subr.mxu0 %v3508_v29  ;;  %v3754_v44 = vpop.permute.xlu0 %3753  ;;  %v5285_v15 = vunpack.i.l.bf16 %v5284_v61  ;;  %v5286_v20 = vunpack.i.h.bf16 %v5284_v61 }
 0x6b3   : > { %3662 = vmatpush1.msra.mxu1 %v3509_v10  ;;  %3573 = vmatpush1.msra.mxu0 %v3507_v5 }
 0x6b4   : > { %3663 = vmatprep.subr.mxu1 %v5281_v6  ;;  %3574 = vmatprep.subr.mxu0 %v3505_v28  ;;  %v3784_v39 = vsel %vm3775_vm8, %v6548_v63, %v5286_v20 }
 0x6b5   : > { %3664 = vmatpush1.msra.mxu1 %v3506_v34  ;;  %3697 = vmatprep.mubr.f32.mxu1 %v5422_v19  ;;  %v3756_v13 = vpop.permute.xlu1 %3755 }
 0x6b6   : > { %3575 = vmatpush1.msra.mxu0 %v3504_v25  ;;  %3608 = vmatprep.mubr.f32.mxu0 %v5422_v19  ;;  %v3752_v22 = vpop.permute.xlu0 %3751  ;;  %v3780_v42 = vsel %vm3775_vm8, %v3754_v44, %v3756_v13 }
 0x6b7   : > { %5050 = vmatmul.mubr.msk.f32.vlgmr.msra.gmra.mxu1 %vm1250_vm4, %v3467_v18  ;;  %5046 = vmatmul.mubr.msk.f32.vlgmr.msra.gmra.mxu0 %vm1250_vm4, %v3467_v18  ;;  %v3779_v21 = vsel %vm3775_vm8, %v3752_v22, %v3754_v44 }
 0x6b8   : > { %3703 = vmatprep.mubr.f32.mxu1 %v5422_v19  ;;  %3614 = vmatprep.mubr.f32.mxu0 %v5422_v19 }
 0x6b9   : > { %v3746_v16 = vpop.permute.xlu1 %3745  ;;  %3929 = vmatprep.subr.mxu1 %v5285_v15 }
 0x6ba   : > { %v3772_v17 = vpop.permute.xlu0 %3771 }
 0x6bb   : > { %5051 = vmatmul.mubr.msk.f32.gmra.mxu1 %vm1250_vm4, %v3468_v35  ;;  %5047 = vmatmul.mubr.msk.f32.gmra.mxu0 %vm1250_vm4, %v3468_v35  ;;  %v3787_v55 = vsel %vm3775_vm8, %v3772_v17, %v5285_v15  ;;  %v3786_v40 = vsel %vm3775_vm8, %v6529_v51, %v3772_v17 }
 0x6bc   : > { %3709 = vmatprep.mubr.f32.mxu1 %v5422_v19  ;;  %3620 = vmatprep.mubr.f32.mxu0 %v5422_v19 }
 0x6bd   : > { %3840 = vmatprep.subr.mxu0 %v3786_v40  ;;  %3930 = vmatpush1.msra.mxu1 %v3787_v55  ;;  %v3744_v24 = vpop.permute.xlu1 %3743 }
 0x6be   : > { %3841 = vmatpush1.msra.mxu0 %v3785_v60  ;;  %3931 = vmatprep.subr.mxu1 %v5286_v20  ;;  %v3748_v45 = vpop.permute.xlu0 %3747  ;;  %v3776_v53 = vsel %vm3775_vm8, %v3744_v24, %v3746_v16 }
 0x6bf   : > { %5052 = vmatmul.mubr.msk.f32.gmra.mxu1 %vm1250_vm4, %v3469_v31  ;;  %5048 = vmatmul.mubr.msk.f32.gmra.mxu0 %vm1250_vm4, %v3469_v31  ;;  %v3777_v46 = vsel %vm3775_vm8, %v3746_v16, %v3748_v45 }
 0x6c0   : > { %3842 = vmatprep.subr.mxu0 %v3783_v14  ;;  %3715 = vmatprep.mubr.f32.mxu1 %v5422_v19 }
 0x6c1   : > { %3932 = vmatpush1.msra.mxu1 %v3784_v39  ;;  %3626 = vmatprep.mubr.f32.mxu0 %v5422_v19  ;;  %v3750_v41 = vpop.permute.xlu1 %3749 }
 0x6c2   : > { %3843 = vmatpush1.msra.mxu0 %v3782_v38  ;;  %v3758_v37 = vpop.permute.xlu0 %3757  ;;  %v3778_v11 = vsel %vm3775_vm8, %v3748_v45, %v3750_v41 }
 0x6c3   : > { %5053 = vmatmul.mubr.msk.f32.gmra.mxu1 %vm1250_vm4, %v3470_v36  ;;  %5049 = vmatmul.mubr.msk.f32.gmra.mxu0 %vm1250_vm4, %v3470_v36  ;;  %v3781_v23 = vsel %vm3775_vm8, %v3756_v13, %v3758_v37 }
 0x6c4   : > { %3844 = vmatprep.subr.mxu0 %v3780_v42  ;;  %3880 = vmatprep.mubr.f32.mxu0 %v5422_v19 }
 0x6c5   : > { %3845 = vmatpush1.msra.mxu0 %v3779_v21  ;;  %3933 = vmatprep.subr.mxu1 %v3758_v37 }
 0x6c6   : > { %3846 = vmatprep.subr.mxu0 %v3777_v46  ;;  %3934 = vmatpush1.msra.mxu1 %v3781_v23 }
 0x6c7   : > { %3847 = vmatpush1.msra.mxu0 %v3776_v53  ;;  %3935 = vmatprep.subr.mxu1 %v3750_v41 }
 0x6c8   : > { %5054 = vmatmul.mubr.msk.f32.vlgmr.msra.gmra.mxu0 %vm1250_vm4, %v3739_v47  ;;  %3936 = vmatpush1.msra.mxu1 %v3778_v11 }
 0x6c9   : > { %3969 = vmatprep.mubr.f32.mxu1 %v5422_v19  ;;  %3886 = vmatprep.mubr.f32.mxu0 %v5422_v19 }
 0x6ca   : > { %5058 = vmatmul.mubr.msk.f32.vlgmr.msra.gmra.mxu1 %vm1250_vm4, %v3739_v47  ;;  %5088 = vmatprep.subr.mxu1 %v5422_v19 }
 0x6cb   : > { %3975 = vmatprep.mubr.f32.mxu1 %v5422_v19 }
 0x6cc   : > { %5055 = vmatmul.mubr.msk.f32.gmra.mxu0 %vm1250_vm4, %v3740_v43 }
 0x6cd   : > { %3892 = vmatprep.mubr.f32.mxu0 %v5422_v19 }
 0x6ce   : > { %5059 = vmatmul.mubr.msk.f32.gmra.mxu1 %vm1250_vm4, %v3740_v43  ;;  %v3443_v44 = vpop.permute.xlu1 %3442 }
 0x6cf   : > { %3981 = vmatprep.mubr.f32.mxu1 %v5422_v19  ;;  %v6644_v15 = vpop.permute.xlu0 %3447 }
 0x6d0   : > { %5056 = vmatmul.mubr.msk.f32.gmra.mxu0 %vm1250_vm4, %v3741_v56 }
 0x6d1   : > { %3898 = vmatprep.mubr.f32.mxu0 %v5422_v19 }
 0x6d2   : > { %5060 = vmatmul.mubr.msk.f32.gmra.mxu1 %vm1250_vm4, %v3741_v56  ;;  %v3433_v35 = vpop.permute.xlu1 %3432 }
 0x6d3   : > { %3987 = vmatprep.mubr.f32.mxu1 %v5422_v19  ;;  %v3438_v24 = vpop.permute.xlu0 %3437 }
 0x6d4   : > { %5057 = vmatmul.mubr.msk.f32.gmra.mxu0 %vm1250_vm4, %v3742_v52 }
 0x6d5   : > { %4292 = vmatprep.mubr.f32.mxu0 %v5422_v19 }
 0x6d6   : > { %5061 = vmatmul.mubr.msk.f32.gmra.mxu1 %vm1250_vm4, %v3742_v52 }
 0x763   : > { %v3407_v58 = vpop.f32.mrf.mxu1 }
 0x764   : > { %v3318_v33 = vpop.f32.mrf.mxu0  ;;  %v3452_v40 = vadd.f32 %v3433_v35, %v3407_v58 }
 0x765   : > { %v3409_v48 = vpop.f32.mrf.mxu1  ;;  %v3450_v16 = vadd.f32 %v3433_v35, %v3318_v33 }
 0x766   : > { %v3320_v51 = vpop.f32.mrf.mxu0 }
 0x767   : > { %v3413_v54 = vpop.f32.mrf.mxu1  ;;  %v3451_v20 = vadd.f32 %v3433_v35, %v3320_v51 }
 0x768   : > { %v3324_v7 = vpop.f32.mrf.mxu0  ;;  %v3456_v36 = vadd.f32 %v3438_v24, %v3413_v54 }
 0x769   : > { %v3415_v32 = vpop.f32.mrf.mxu1  ;;  %v3454_v38 = vadd.f32 %v3438_v24, %v3324_v7 }
 0x76a   : > { %v3326_v57 = vpop.f32.mrf.mxu0 }
 0x76b   : > { %v3419_v49 = vpop.f32.mrf.mxu1  ;;  %v3455_v37 = vadd.f32 %v3438_v24, %v3326_v57 }
 0x76c   : > { %v3330_v27 = vpop.f32.mrf.mxu0  ;;  %v3460_v47 = vadd.f32 %v3443_v44, %v3419_v49 }
 0x76d   : > { %v3421_v8 = vpop.f32.mrf.mxu1  ;;  %v3458_v33 = vadd.f32 %v3443_v44, %v3330_v27 }
 0x76e   : > { %v6634_v62 = vpop.f32.mrf.mxu0 }
 0x770   : > { %v6636_v63 = vpop.f32.mrf.mxu1 }
 0x772   : > { %v6638_v26 = vpop.f32.mrf.mxu0  ;;  %v3427_v0 = vpop.f32.mrf.mxu1 }
 0x773   : > { %v3462_v35 = vadd.f32 %v6644_v15, %v6638_v26  ;;  %v3464_v26 = vadd.f32 %v6644_v15, %v6636_v63 }
 0x774   : > { %v6640_v2 = vpop.f32.mrf.mxu0 }
 0x777   : > { %v3699_v4 = vpop.f32.mrf.mxu1  ;;  %v3610_v59 = vpop.f32.mrf.mxu0 }
 0x778   : > { %v3722_v31 = vadd.f32 %v3610_v59, %v3450_v16  ;;  %v3724_v45 = vadd.f32 %v3699_v4, %v3452_v40 }
 0x779   : > { %v3701_v30 = vpop.f32.mrf.mxu1  ;;  %v3612_v6 = vpop.f32.mrf.mxu0 }
 0x77a   : > { %v3723_v14 = vadd.f32 %v3612_v6, %v3451_v20 }
 0x77b   : > { %v3705_v29 = vpop.f32.mrf.mxu1  ;;  %v3616_v61 = vpop.f32.mrf.mxu0 }
 0x77c   : > { %v3726_v53 = vadd.f32 %v3616_v61, %v3454_v38  ;;  %v3728_v56 = vadd.f32 %v3705_v29, %v3456_v36  ;;  %v3459_v29 = vadd.f32 %v3443_v44, %v6634_v62 }
 0x77d   : > { %v3707_v5 = vpop.f32.mrf.mxu1  ;;  %v3618_v10 = vpop.f32.mrf.mxu0 }
 0x77e   : > { %v3727_v52 = vadd.f32 %v3618_v10, %v3455_v37 }
 0x77f   : > { %v3711_v28 = vpop.f32.mrf.mxu1  ;;  %v3622_v34 = vpop.f32.mrf.mxu0 }
 0x780   : > { %v3730_v0 = vadd.f32 %v3622_v34, %v3458_v33  ;;  %v3732_v27 = vadd.f32 %v3711_v28, %v3460_v47 }
 0x781   : > { %v3713_v18 = vpop.f32.mrf.mxu1  ;;  %v6642_v25 = vpop.f32.mrf.mxu0 }
 0x782   : > { %v3731_v28 = vadd.f32 %v6642_v25, %v3459_v29 }
 0x783   : > { %v6646_v13 = vpop.f32.mrf.mxu1  ;;  %v6648_v22 = vpop.f32.mrf.mxu0 }
 0x784   : > { %v3734_v20 = vadd.f32 %v6648_v22, %v3462_v35  ;;  %v3736_v36 = vadd.f32 %v6646_v13, %v3464_v26 }
 0x785   : > { %v6650_v17 = vpop.f32.mrf.mxu0  ;;  %v3719_v55 = vpop.f32.mrf.mxu1 }
 0x788   : > { %v3882_v60 = vpop.f32.mrf.mxu0 }
 0x789   : > { %v3994_v39 = vadd.f32 %v3882_v60, %v3722_v31  ;;  %v3463_v31 = vadd.f32 %v6644_v15, %v6640_v2 }
 0x78a   : > { %v3884_v42 = vpop.f32.mrf.mxu0  ;;  %v3971_v23 = vpop.f32.mrf.mxu1 }
 0x78b   : > { %vm4010_vm9 = vcmp.ge.f32.partialorder %v3994_v39, 0.0  ;;  %v4026_v21 = vmul.f32 0.2, %v3994_v39  ;;  %v3995_v41 = vadd.f32 %v3884_v42, %v3723_v14  ;;  %v3996_v46 = vadd.f32 %v3971_v23, %v3724_v45 }
 0x78c   : > { %v3888_v11 = vpop.f32.mrf.mxu0  ;;  %v3973_v43 = vpop.f32.mrf.mxu1  ;;  %v3735_v63 = vadd.f32 %v6650_v17, %v3463_v31 }
 0x78d   : > { %vm4012_vm10 = vcmp.ge.f32.partialorder %v3996_v46, 0.0  ;;  %v4028_v58 = vmul.f32 0.2, %v3996_v46  ;;  %v4027_v48 = vmul.f32 0.2, %v3995_v41  ;;  %v3998_v51 = vadd.f32 %v3888_v11, %v3726_v53 }
 0x78e   : > { %v4042_v54 = vsel %vm4010_vm9, %v3994_v39, %v4026_v21  ;;  %v3890_v7 = vpop.f32.mrf.mxu0  ;;  %v3977_v32 = vpop.f32.mrf.mxu1  ;;  %vm4011_vm11 = vcmp.ge.f32.partialorder %v3995_v41, 0.0  ;;  %vm4106_vm9 = vcmask 56320  }
 0x78f   : > { %4074 = vrot.lane.b32.xlu1 %v4042_v54, %s5431_s12  ;;  %v3999_v57 = vadd.f32 %v3890_v7, %v3727_v52  ;;  %v4000_v8 = vadd.f32 %v3977_v32, %v3728_v56  ;;  %v4044_v49 = vsel %vm4012_vm10, %v3996_v46, %v4028_v58  ;;  %vm4014_vm12 = vcmp.ge.f32.partialorder %v3998_v51, 0.0 }
 0x790   : > { %v4030_v4 = vmul.f32 0.2, %v3998_v51  ;;  %v3894_v59 = vpop.f32.mrf.mxu0  ;;  %4078 = vrot.lane.b32.xlu0 %v4044_v49, %s5431_s12  ;;  %v3979_v30 = vpop.f32.mrf.mxu1  ;;  %v4043_v5 = vsel %vm4011_vm11, %v3995_v41, %v4027_v48  ;;  %vm5433_vm10 = vmmov 0  }
 0x791   : > { %vm4016_vm13 = vcmp.ge.f32.partialorder %v4000_v8, 0.0  ;;  %v4032_v6 = vmul.f32 0.2, %v4000_v8  ;;  %v4002_v61 = vadd.f32 %v3894_v59, %v3730_v0  ;;  %v4031_v34 = vmul.f32 0.2, %v3999_v57  ;;  %5096 = vmatprep.mubr.msk.f32.mxu1 %vm5433_vm10, %v5422_v19 }
 0x792   : > { %v3896_v10 = vpop.f32.mrf.mxu0  ;;  %v3983_v18 = vpop.f32.mrf.mxu1  ;;  %v4046_v55 = vsel %vm4014_vm12, %v3998_v51, %v4030_v4  ;;  %vm4015_vm14 = vcmp.ge.f32.partialorder %v3999_v57, 0.0 }
 0x793   : > { %4076 = vrot.lane.b32.xlu1 %v4043_v5, %s5431_s12  ;;  %v4004_v16 = vadd.f32 %v3983_v18, %v3732_v27  ;;  %v4048_v44 = vsel %vm4016_vm13, %v4000_v8, %v4032_v6  ;;  %v4034_v60 = vmul.f32 0.2, %v4002_v61  ;;  %v4003_v24 = vadd.f32 %v3896_v10, %v3731_v28 }
 0x794   : > { %v3900_v40 = vpop.f32.mrf.mxu0  ;;  %4082 = vrot.lane.b32.xlu0 %v4046_v55, %s5431_s12  ;;  %v3985_v62 = vpop.f32.mrf.mxu1  ;;  %vm4018_vm15 = vcmp.ge.f32.partialorder %v4002_v61, 0.0  ;;  %v4047_v39 = vsel %vm4015_vm14, %v3999_v57, %v4031_v34 }
 0x795   : > { %v4036_v25 = vmul.f32 0.2, %v4004_v16  ;;  %v4006_v14 = vadd.f32 %v3900_v40, %v3734_v20  ;;  %vm4020_vm1 = vcmp.ge.f32.partialorder %v4004_v16, 0.0  ;;  %v4035_v37 = vmul.f32 0.2, %v4003_v24 }
 0x796   : > { %v3989_v45 = vpop.f32.mrf.mxu1  ;;  %v3902_v38 = vpop.f32.mrf.mxu0  ;;  %v4050_v15 = vsel %vm4018_vm15, %v4002_v61, %v4034_v60  ;;  %vm4019_vm5 = vcmp.ge.f32.partialorder %v4003_v24, 0.0 }
 0x797   : > { %4086 = vrot.lane.b32.xlu1 %v4048_v44, %s5431_s12  ;;  %v4008_v2 = vadd.f32 %v3989_v45, %v3736_v36  ;;  %v4038_v42 = vmul.f32 0.2, %v4006_v14  ;;  %v4007_v23 = vadd.f32 %v3902_v38, %v3735_v63  ;;  %v4052_v21 = vsel %vm4020_vm1, %v4004_v16, %v4036_v25 }
 0x798   : > { %4084 = vrot.lane.b32.xlu0 %v4047_v39, %s5431_s12  ;;  %v3991_v22 = vpop.f32.mrf.mxu1  ;;  %vm4022_vm6 = vcmp.ge.f32.partialorder %v4006_v14, 0.0  ;;  %v4051_v41 = vsel %vm4019_vm5, %v4003_v24, %v4035_v37 }
 0x799   : > { %v4040_v13 = vmul.f32 0.2, %v4008_v2  ;;  %v4039_v46 = vmul.f32 0.2, %v4007_v23  ;;  %vm4024_vm7 = vcmp.ge.f32.partialorder %v4008_v2, 0.0  ;;  %v4054_v47 = vsel %vm4022_vm6, %v4006_v14, %v4038_v42 }
 0x79a   : > { %vm4023_vm8 = vcmp.ge.f32.partialorder %v4007_v23, 0.0 }
 0x79b   : > { %4090 = vrot.lane.b32.xlu1 %v4050_v15, %s5431_s12  ;;  %v4056_v17 = vsel %vm4024_vm7, %v4008_v2, %v4040_v13  ;;  %v4055_v53 = vsel %vm4023_vm8, %v4007_v23, %v4039_v46 }
 0x79c   : > { %4094 = vrot.lane.b32.xlu0 %v4052_v21, %s5431_s12 }
 0x79f   : > { %4092 = vrot.lane.b32.xlu1 %v4051_v41, %s5431_s12 }
 0x7a0   : > { %4098 = vrot.lane.b32.xlu0 %v4054_v47, %s5431_s12 }
 0x7a3   : > { %4102 = vrot.lane.b32.xlu1 %v4056_v17, %s5431_s12 }
 0x7a4   : > { %4100 = vrot.lane.b32.xlu0 %v4055_v53, %s5431_s12  ;;  %s4842_s12 = sshll.u32 %s545_s6, 4  ;;  %s4843_s12 = int_to_ptr.vmem [resolvable:$true] %s4842_s12 }
 0x7a5   : > { %s5333_s14 = scalar_lea.vmem %s4843_s12, 48  ;;  %p5340_p0 = scmp.lt.s32.totalorder %s4843_s12, %s5338_s30 }
 0x7a6   : > { %p5334_p10 = scmp.ne.s32.totalorder %s4843_s12, %s5333_s14  ;;  %p5341_p1 = scmp.lt.s32.totalorder %s5339_s17, %s5333_s14 }
 0x7a7   : > { %5288 = vrot.lane.b32.xlu1 %v5422_v19, %s5429_s23 }
 0x7a8   : > { %p5335_p11 = pnand %p5334_p10, %p5550_p4  ;;  %p5342_p2 = por %p5341_p1, %p5340_p0 }
 0x7aa   : > { %p5336_p13 = pneg %p5335_p11 }
 0x7ab   : > { %5293 = vrot.lane.b32.xlu1 %v5422_v19, %s5429_s23 }
 0x7ac   : > { %p5343_p3 = pnand %p5342_p2, %p5336_p13 }
 0x7af   : > { %5298 = vrot.lane.b32.xlu1 %v5422_v19, %s5432_s29 }
 0x7b3   : > { %5303 = vrot.lane.b32.xlu1 %v5422_v19, %s5432_s29 }
 0x801   : > { %v4075_v11 = vpop.permute.xlu1 %4074 }
 0x802   : > { %v6688_v43 = vsel %vm641_vm0, %v4075_v11, 0.0  ;;  %v4079_v56 = vpop.permute.xlu0 %4078 }
 0x803   : > { %4169 = vrot.lane.b32.xlu0 %v6688_v43, %s5429_s23 }
 0x805   : > { %v4077_v52 = vpop.permute.xlu1 %4076 }
 0x806   : > { %v4108_v58 = vsel %vm4106_vm9, %v4077_v52, %v4079_v56  ;;  %v4083_v33 = vpop.permute.xlu0 %4082  ;;  %v4107_v51 = vsel %vm4106_vm9, %v4075_v11, %v4077_v52 }
 0x807   : > { %v4137_v48 = vsel %vm647_vm3, %v4108_v58, 0.0  ;;  %4383 = vrot.lane.b32.xlu0 %v6688_v43, %s5432_s29  ;;  %v4139_v8 = vsel %vm641_vm0, %v4083_v33, 0.0 }
 0x808   : > { %4173 = vrot.lane.b32.xlu1 %v4137_v48, %s5429_s23 }
 0x809   : > { %v4087_v54 = vpop.permute.xlu1 %4086 }
 0x80a   : > { %v4085_v7 = vpop.permute.xlu0 %4084 }
 0x80b   : > { %4171 = vrot.lane.b32.xlu0 %v4107_v51, %s5429_s23  ;;  %v4111_v32 = vsel %vm4106_vm9, %v4085_v7, %v4087_v54  ;;  %v4110_v59 = vsel %vm4106_vm9, %v4083_v33, %v4085_v7  ;;  %v4152_v33 = vld [vmem:[%s6933_s7] sm:$0x1] }
 0x80c   : > { %4387 = vrot.lane.b32.xlu1 %v4137_v48, %s5432_s29  ;;  %v4141_v57 = vsel %vm647_vm3, %v4111_v32, 0.0 }
 0x80d   : > { %v4091_v49 = vpop.permute.xlu1 %4090 }
 0x80e   : > { %v4143_v0 = vsel %vm641_vm0, %v4091_v49, 0.0  ;;  %v4095_v4 = vpop.permute.xlu0 %4094 }
 0x80f   : > { %4385 = vrot.lane.b32.xlu0 %v4107_v51, %s5432_s29 }
 0x810   : > { %4181 = vrot.lane.b32.xlu1 %v4141_v57, %s5429_s23 }
 0x811   : > { %v4093_v30 = vpop.permute.xlu1 %4092 }
 0x812   : > { %v4099_v27 = vpop.permute.xlu0 %4098  ;;  %v4113_v6 = vsel %vm4106_vm9, %v4091_v49, %v4093_v30  ;;  %v4114_v29 = vsel %vm4106_vm9, %v4093_v30, %v4095_v4 }
 0x813   : > { %4177 = vrot.lane.b32.xlu0 %v4139_v8, %s5429_s23  ;;  %v4145_v61 = vsel %vm647_vm3, %v4114_v29, 0.0  ;;  %v4147_v18 = vsel %vm641_vm0, %v4099_v27, 0.0  ;;  %vm4415_vm0 = vcmask 982016  }
 0x814   : > { %4395 = vrot.lane.b32.xlu1 %v4141_v57, %s5432_s29 }
 0x815   : > { %v4103_v35 = vpop.permute.xlu1 %4102 }
 0x816   : > { %v4101_v5 = vpop.permute.xlu0 %4100 }
 0x817   : > { %4391 = vrot.lane.b32.xlu0 %v4139_v8, %s5432_s29  ;;  %v4116_v10 = vsel %vm4106_vm9, %v4099_v27, %v4101_v5  ;;  %v4117_v34 = vsel %vm4106_vm9, %v4101_v5, %v4103_v35 }
 0x818   : > { %4185 = vrot.lane.b32.xlu1 %v4143_v0, %s5429_s23  ;;  %v4149_v16 = vsel %vm647_vm3, %v4117_v34, 0.0  ;;  %vm4621_vm3 = vcmask 973824  }
 0x819   : > { %v5289_v12 = vpop.permute.xlu1 %5288 }
 0x81a   : > { %v5290_v13 = vunpack.i.l.bf16 %v5289_v12  ;;  %v5291_v47 = vunpack.i.h.bf16 %v5289_v12 }
 0x81b   : > { %4179 = vrot.lane.b32.xlu0 %v4110_v59, %s5429_s23 }
 0x81c   : > { %4399 = vrot.lane.b32.xlu1 %v4143_v0, %s5432_s29 }
 0x81d   : > { %v5294_v55 = vpop.permute.xlu1 %5293 }
 0x81e   : > { %v5296_v53 = vunpack.i.h.bf16 %v5294_v55  ;;  %v5295_v11 = vunpack.i.l.bf16 %v5294_v55 }
 0x81f   : > { %4393 = vrot.lane.b32.xlu0 %v4110_v59, %s5432_s29 }
 0x820   : > { %4187 = vrot.lane.b32.xlu1 %v4113_v6, %s5429_s23 }
 0x821   : > { %v6745_v28 = vpop.permute.xlu1 %5298 }
 0x823   : > { %4189 = vrot.lane.b32.xlu0 %v4145_v61, %s5429_s23 }
 0x824   : > { %4401 = vrot.lane.b32.xlu1 %v4113_v6, %s5432_s29 }
 0x825   : > { %v6747_v40 = vpop.permute.xlu1 %5303 }
 0x827   : > { %4403 = vrot.lane.b32.xlu0 %v4145_v61, %s5432_s29 }
 0x828   : > { %4409 = vrot.lane.b32.xlu1 %v4116_v10, %s5432_s29 }
 0x82b   : > { %4193 = vrot.lane.b32.xlu0 %v4147_v18, %s5429_s23 }
 0x82c   : > { %4615 = vrot.lane.b32.xlu1 %v4116_v10, %s5434_s22 }
 0x82f   : > { %4407 = vrot.lane.b32.xlu0 %v4147_v18, %s5432_s29 }
 0x830   : > { %4197 = vrot.lane.b32.xlu1 %v4149_v16, %s5429_s23 }
 0x833   : > { %4613 = vrot.lane.b32.xlu0 %v4147_v18, %s5434_s22  ;;  %v5305_v18 = vunpack.i.l.bf16 %v6747_v40 }
 0x834   : > { %4607 = vrot.lane.b32.xlu1 %v4113_v6, %s5434_s22 }
 0x837   : > { %4195 = vrot.lane.b32.xlu0 %v4116_v10, %s5429_s23  ;;  %v5301_v10 = vunpack.i.h.bf16 %v6745_v28  ;;  %s4840_s23 = scalar_lea.hbm %s6939_s13, %s5123_s16 }
 0x838   : > { %4605 = vrot.lane.b32.xlu1 %v4143_v0, %s5434_s22 }
 0x83b   : > { %4609 = vrot.lane.b32.xlu0 %v4145_v61, %s5434_s22  ;;  %v5300_v61 = vunpack.i.l.bf16 %v6745_v28 }
 0x83c   : > { %4601 = vrot.lane.b32.xlu1 %v4141_v57, %s5434_s22 }
 0x83f   : > { %4599 = vrot.lane.b32.xlu0 %v4110_v59, %s5434_s22 }
 0x840   : > { %4619 = vrot.lane.b32.xlu1 %v5422_v19, %s5434_s22 }
 0x843   : > { %4411 = vrot.lane.b32.xlu0 %v4149_v16, %s5432_s29 }
 0x844   : > { %4593 = vrot.lane.b32.xlu1 %v4137_v48, %s5434_s22 }
 0x847   : > { %4597 = vrot.lane.b32.xlu0 %v4139_v8, %s5434_s22 }
 0x848   : > { %4611 = vrot.lane.b32.xlu1 %v5422_v19, %s5434_s22 }
 0x84b   : > { %4617 = vrot.lane.b32.xlu0 %v4149_v16, %s5434_s22 }
 0x84c   : > { %4595 = vrot.lane.b32.xlu1 %v5422_v19, %s5434_s22 }
 0x84f   : > { %4591 = vrot.lane.b32.xlu0 %v4107_v51, %s5434_s22 }
 0x853   : > { %4589 = vrot.lane.b32.xlu0 %v6688_v43, %s5434_s22 }
 0x857   : > { %4603 = vrot.lane.b32.xlu0 %v5422_v19, %s5434_s22 }
 0x85b   : > { %4371 = vperm.xlu0 %5210, %v4151_v50   ;;  %v5306_v50 = vunpack.i.h.bf16 %v6747_v40 }
 0x875   : > { %v4170_v62 = vpop.permute.xlu0 %4169 }
 0x879   : > { %v6749_v44 = vpop.permute.xlu0 %4383 }
 0x87a   : > { %v4174_v20 = vpop.permute.xlu1 %4173 }
 0x87b   : > { %v4203_v48 = vsel %vm3503_vm2, %v4174_v20, %v5296_v53 }
 0x87d   : > { %v4172_v26 = vpop.permute.xlu0 %4171 }
 0x87e   : > { %v6751_v31 = vpop.permute.xlu1 %4387  ;;  %v4202_v30 = vsel %vm3503_vm2, %v4172_v26, %v4174_v20  ;;  %v4201_v27 = vsel %vm3503_vm2, %v4170_v62, %v4172_v26 }
 0x881   : > { %v6753_v60 = vpop.permute.xlu0 %4385 }
 0x882   : > { %v4182_v24 = vpop.permute.xlu1 %4181 }
 0x883   : > { %v4206_v58 = vsel %vm3503_vm2, %v4182_v24, %v5295_v11 }
 0x885   : > { %v4178_v45 = vpop.permute.xlu0 %4177 }
 0x886   : > { %v6755_v25 = vpop.permute.xlu1 %4395 }
 0x887   : > { %v4421_v40 = vsel %vm4415_vm0, %v6755_v25, %v5305_v18 }
 0x889   : > { %v6757_v14 = vpop.permute.xlu0 %4391 }
 0x88a   : > { %v4186_v39 = vpop.permute.xlu1 %4185 }
 0x88d   : > { %v4180_v36 = vpop.permute.xlu0 %4179 }
 0x88e   : > { %v6759_v38 = vpop.permute.xlu1 %4399  ;;  %v4205_v4 = vsel %vm3503_vm2, %v4180_v36, %v4182_v24  ;;  %v4204_v59 = vsel %vm3503_vm2, %v4178_v45, %v4180_v36  ;;  %v5064_v45 = vld [vmem:[%s6933_s7 + $0x1] sm:$0x1] }
 0x891   : > { %v6761_v22 = vpop.permute.xlu0 %4393 }
 0x892   : > { %v4188_v63 = vpop.permute.xlu1 %4187  ;;  %v4420_v26 = vsel %vm4415_vm0, %v6761_v22, %v6755_v25  ;;  %v4419_v24 = vsel %vm4415_vm0, %v6757_v14, %v6761_v22  ;;  %v4417_v25 = vsel %vm4415_vm0, %v6753_v60, %v6751_v31  ;;  %v4416_v14 = vsel %vm4415_vm0, %v6749_v44, %v6753_v60 }
 0x893   : > { %v4207_v8 = vsel %vm3503_vm2, %v4186_v39, %v4188_v63  ;;  %v4418_v39 = vsel %vm4415_vm0, %v6751_v31, %v5306_v50 }
 0x895   : > { %v4190_v37 = vpop.permute.xlu0 %4189 }
 0x896   : > { %v6763_v2 = vpop.permute.xlu1 %4401  ;;  %v4209_v43 = vsel %vm3503_vm2, %v4190_v37, %v5291_v47  ;;  %v4208_v57 = vsel %vm3503_vm2, %v4188_v63, %v4190_v37 }
 0x897   : > { %v4422_v62 = vsel %vm4415_vm0, %v6759_v38, %v6763_v2 }
 0x899   : > { %v6765_v15 = vpop.permute.xlu0 %4403 }
 0x89a   : > { %v4410_v42 = vpop.permute.xlu1 %4409  ;;  %v4424_v12 = vsel %vm4415_vm0, %v6765_v15, %v5301_v10  ;;  %v4423_v28 = vsel %vm4415_vm0, %v6763_v2, %v6765_v15 }
 0x89d   : > { %v4194_v23 = vpop.permute.xlu0 %4193 }
 0x89e   : > { %v6767_v21 = vpop.permute.xlu1 %4615 }
 0x8a1   : > { %v4408_v41 = vpop.permute.xlu0 %4407 }
 0x8a2   : > { %v4198_v46 = vpop.permute.xlu1 %4197  ;;  %v4425_v16 = vsel %vm4415_vm0, %v4408_v41, %v4410_v42 }
 0x8a3   : > { %v4212_v17 = vsel %vm3503_vm2, %v4198_v46, %v5290_v13  ;;  %v5067_v13 = vld [vmem:[%s6933_s7 + $0x2] sm:$0x1] }
 0x8a4   : > { %5089 = vmatpush3.msra.mxu1 %v4212_v17 }
 0x8a5   : > { %v6771_v56 = vpop.permute.xlu0 %4613  ;;  %5090 = vmatprep.subr.mxu1 %v5422_v19 }
 0x8a6   : > { %v6774_v52 = vpop.permute.xlu1 %4607  ;;  %5091 = vmatpush3.msra.mxu1 %v4209_v43  ;;  %v4631_v44 = vsel %vm4621_vm3, %v6771_v56, %v6767_v21 }
 0x8a7   : > { %5092 = vmatprep.subr.mxu1 %v5422_v19 }
 0x8a8   : > { %5093 = vmatpush3.msra.mxu1 %v4206_v58 }
 0x8a9   : > { %v4196_v51 = vpop.permute.xlu0 %4195  ;;  %5094 = vmatprep.subr.mxu1 %v5422_v19 }
 0x8aa   : > { %v4210_v54 = vsel %vm3503_vm2, %v4194_v23, %v4196_v51  ;;  %v6784_v7 = vpop.permute.xlu1 %4605  ;;  %5095 = vmatpush3.msra.mxu1 %v4203_v48  ;;  %v4211_v32 = vsel %vm3503_vm2, %v4196_v51, %v4198_v46 }
 0x8ab   : > { %4252 = vmatprep.subr.mxu0 %v4211_v32  ;;  %5097 = vmatmul.mubr.msk.f32.vlgmr.msra.gmra.mxu1 %vm1250_vm4, %v4152_v33  ;;  %v4628_v2 = vsel %vm4621_vm3, %v6784_v7, %v6774_v52  ;;  %v5435_v7 = vmov 1966171168  }
 0x8ac   : > { %4253 = vmatpush1.msra.mxu0 %v4210_v54  ;;  %5099 = vmatprep.subr.mxu1 %v5422_v19  ;;  %v4798_v32 = vunpack.c.l.s4 %v5435_v7 }
 0x8ad   : > { %v6791_v49 = vpop.permute.xlu0 %4609  ;;  %4254 = vmatprep.subr.mxu0 %v4208_v57  ;;  %5107 = vmatprep.mubr.msk.f32.mxu1 %vm5433_vm10, %v5422_v19 }
 0x8ae   : > { %4255 = vmatpush1.msra.mxu0 %v4207_v8  ;;  %v6795_v0 = vpop.permute.xlu1 %4601  ;;  %v4629_v37 = vsel %vm4621_vm3, %v6774_v52, %v6791_v49 }
 0x8af   : > { %4256 = vmatprep.subr.mxu0 %v4205_v4 }
 0x8b0   : > { %4257 = vmatpush1.msra.mxu0 %v4204_v59  ;;  %v4799_v59 = vunpack.c.0.s8 %v4798_v32 }
 0x8b1   : > { %v6801_v6 = vpop.permute.xlu0 %4599  ;;  %4258 = vmatprep.subr.mxu0 %v4202_v30 }
 0x8b2   : > { %4259 = vmatpush1.msra.mxu0 %v4201_v27  ;;  %v4620_v29 = vpop.permute.xlu1 %4619  ;;  %v4626_v15 = vsel %vm4621_vm3, %v6801_v6, %v6795_v0 }
 0x8b3   : > { %5062 = vmatmul.mubr.msk.f32.vlgmr.msra.gmra.mxu0 %vm1250_vm4, %v4152_v33 }
 0x8b4   : > { %4507 = vmatprep.mubr.f32.mxu0 %v5422_v19 }
 0x8b5   : > { %v4412_v5 = vpop.permute.xlu0 %4411 }
 0x8b6   : > { %v4427_v35 = vsel %vm4415_vm0, %v4412_v5, %v5300_v61  ;;  %v4426_v34 = vsel %vm4415_vm0, %v4410_v42, %v4412_v5  ;;  %v6814_v55 = vpop.permute.xlu1 %4593 }
 0x8b7   : > { %4467 = vmatprep.subr.mxu0 %v4426_v34  ;;  %5100 = vmatpush3.msra.mxu1 %v4427_v35 }
 0x8b8   : > { %4468 = vmatpush1.msra.mxu0 %v4425_v16  ;;  %5101 = vmatprep.subr.mxu1 %v5422_v19 }
 0x8b9   : > { %v4598_v20 = vpop.permute.xlu0 %4597  ;;  %4469 = vmatprep.subr.mxu0 %v4423_v28  ;;  %5102 = vmatpush3.msra.mxu1 %v4424_v12 }
 0x8ba   : > { %4470 = vmatpush1.msra.mxu0 %v4422_v62  ;;  %5103 = vmatprep.subr.mxu1 %v5422_v19  ;;  %v4612_v38 = vpop.permute.xlu1 %4611  ;;  %v4625_v42 = vsel %vm4621_vm3, %v4598_v20, %v6801_v6 }
 0x8bb   : > { %4471 = vmatprep.subr.mxu0 %v4420_v26  ;;  %5104 = vmatpush3.msra.mxu1 %v4421_v40  ;;  %v4630_v31 = vsel %vm4621_vm3, %v6791_v49, %v4612_v38 }
 0x8bc   : > { %4472 = vmatpush1.msra.mxu0 %v4419_v24  ;;  %5105 = vmatprep.subr.mxu1 %v5422_v19 }
 0x8bd   : > { %v4618_v36 = vpop.permute.xlu0 %4617  ;;  %4473 = vmatprep.subr.mxu0 %v4417_v25  ;;  %5106 = vmatpush3.msra.mxu1 %v4418_v39 }
 0x8be   : > { %v4633_v22 = vsel %vm4621_vm3, %v4618_v36, %v4620_v29  ;;  %4474 = vmatpush1.msra.mxu0 %v4416_v14  ;;  %5108 = vmatmul.mubr.msk.f32.vlgmr.msra.gmra.mxu1 %vm1250_vm4, %v5064_v45  ;;  %v4632_v63 = vsel %vm4621_vm3, %v6767_v21, %v4618_v36  ;;  %v4596_v46 = vpop.permute.xlu1 %4595 }
 0x8bf   : > { %5110 = vmatprep.subr.mxu1 %v5422_v19  ;;  %5065 = vmatmul.mubr.msk.f32.vlgmr.msra.gmra.mxu0 %vm1250_vm4, %v5064_v45  ;;  %v4624_v53 = vsel %vm4621_vm3, %v6814_v55, %v4596_v46 }
 0x8c0   : > { %4673 = vmatprep.subr.mxu0 %v4632_v63  ;;  %5111 = vmatpush3.msra.mxu1 %v4633_v22 }
 0x8c1   : > { %4674 = vmatpush1.msra.mxu0 %v4631_v44  ;;  %5112 = vmatprep.subr.mxu1 %v5422_v19  ;;  %v4592_v60 = vpop.permute.xlu0 %4591 }
 0x8c2   : > { %4675 = vmatprep.subr.mxu0 %v4629_v37  ;;  %5113 = vmatpush3.msra.mxu1 %v4630_v31  ;;  %v4623_v21 = vsel %vm4621_vm3, %v4592_v60, %v6814_v55 }
 0x8c3   : > { %4676 = vmatpush1.msra.mxu0 %v4628_v2  ;;  %4713 = vmatprep.mubr.f32.mxu0 %v5422_v19 }
 0x8c4   : > { %4677 = vmatprep.subr.mxu0 %v4626_v15  ;;  %5114 = vmatprep.subr.mxu1 %v5422_v19 }
 0x8c5   : > { %4678 = vmatpush1.msra.mxu0 %v4625_v42  ;;  %v4590_v23 = vpop.permute.xlu0 %4589  ;;  %5118 = vmatprep.mubr.msk.f32.mxu1 %vm5433_vm10, %v5422_v19 }
 0x8c6   : > { %v4622_v41 = vsel %vm4621_vm3, %v4590_v23, %v4592_v60  ;;  %4679 = vmatprep.subr.mxu0 %v4623_v21 }
 0x8c7   : > { %4680 = vmatpush1.msra.mxu0 %v4622_v41 }
 0x8c8   : > { %5068 = vmatmul.mubr.msk.f32.vlgmr.msra.gmra.mxu0 %vm1250_vm4, %v5067_v13 }
 0x8c9   : > { %v4604_v47 = vpop.permute.xlu0 %4603 }
 0x8ca   : > { %v4627_v17 = vsel %vm4621_vm3, %v6795_v0, %v4604_v47 }
 0x8cb   : > { %5115 = vmatpush3.msra.mxu1 %v4627_v17 }
 0x8cc   : > { %5116 = vmatprep.subr.mxu1 %v5422_v19 }
 0x8cd   : > { %5117 = vmatpush3.msra.mxu1 %v4624_v53 }
 0x8ce   : > { %5119 = vmatmul.mubr.msk.f32.vlgmr.msra.gmra.mxu1 %vm1250_vm4, %v5067_v13  ;;  %vm4822_vm4 = vcmp.lt.s32.totalorder %v594_v1, 384 }
 0x8d6   : > { %v4372_v48 = vpop.permute.xlu0 %4371 }
 0x8d7   : > { %v4377_v54 = vrot.slane %v4372_v48, %v5606_v9  ;;  %v4802_v9 = vsub.s32 %v4799_v59, %v5589_v3 }
 0x96b   : > { %v4365_v11 = vpop.f32.mrf.mxu1 }
 0x96c   : > { %v4380_v27 = vadd.f32 %v4377_v54, %v4365_v11 }
 0x96d   : > { %v5098_v43 = vpop.f32.mrf.mxu1 }
 0x973   : > { %v4294_v56 = vpop.f32.mrf.mxu0 }
 0x974   : > { %v4378_v8 = vadd.f32 %v4377_v54, %v4294_v56 }
 0x975   : > { %v4296_v58 = vpop.f32.mrf.mxu0 }
 0x976   : > { %v4379_v49 = vadd.f32 %v4377_v54, %v4296_v58 }
 0x97e   : > { %v4580_v52 = vpop.f32.mrf.mxu1 }
 0x97f   : > { %v4509_v51 = vpop.f32.mrf.mxu0  ;;  %v4586_v61 = vadd.f32 %v4580_v52, %v4380_v27 }
 0x980   : > { %v5109_v33 = vpop.f32.mrf.mxu1  ;;  %v4584_v0 = vadd.f32 %v4509_v51, %v4378_v8 }
 0x981   : > { %v4511_v57 = vpop.f32.mrf.mxu0 }
 0x982   : > { %v4585_v4 = vadd.f32 %v4511_v57, %v4379_v49 }
 0x988   : > { %v4715_v19 = vpop.f32.mrf.mxu0 }
 0x989   : > { %v4790_v6 = vadd.f32 %v4715_v19, %v4584_v0 }
 0x98a   : > { %v4717_v30 = vpop.f32.mrf.mxu0 }
 0x98b   : > { %v4791_v29 = vadd.f32 %v4717_v30, %v4585_v4 }
 0x98d   : > { %v4796_v5 = vcombine.low %v4790_v6, %v4791_v29 }
 0x98e   : > { %v4786_v10 = vpop.f32.mrf.mxu1 }
 0x98f   : > { %v4792_v18 = vadd.f32 %v4786_v10, %v4586_v61  ;;  %v4803_v34 = vrot.slane %v4796_v5, %v4802_v9 }
 0x990   : > { %v5120_v35 = vpop.f32.mrf.mxu1 }
 0x991   : > { %v4810_v16 = vrot.slane %v4792_v18, %v4802_v9 }
 0x993   : > { %v4811_v50 = vcombine.low %v4803_v34, %v4810_v16 }
 0x995   : > { %v4818_v12 = vrot.slane %v4811_v50, %v4802_v9 }
 0x997   : > { %4824 = vst.msk [vmem:[%s545_s6] sm:$0x7] %vm4822_vm4, %v4818_v12 }
 0x998   : > { %5346 = shalt.err (!%p5343_p3)
}
 0x999   : > { %s5347_s18 = scalar_lea.hbm %s4840_s23, 48  ;;  %s5351_s16 = scalar_lea.hbm %s6939_s13, 96 }
 0x99a   : > { %p5348_p5 = scmp.ne.s32.totalorder %s4840_s23, %s5347_s18  ;;  %p5352_p9 = scmp.lt.s32.totalorder %s4840_s23, %s6939_s13 }
 0x99b   : > { %p5353_p12 = scmp.lt.s32.totalorder %s5351_s16, %s5347_s18 }
 0x99c   : > { %p5349_p6 = pnand %p5348_p5, %p5550_p4 }
 0x99d   : > { %p5354_p10 = por %p5353_p12, %p5352_p9 }
 0x99e   : > { %p5350_p7 = pneg %p5349_p6 }
 0x9a0   : > { %p5355_p11 = pnand %p5354_p10, %p5350_p7 }
 0x9a2   : > { %5358 = shalt.err (!%p5355_p11)
}
 0x9a3   : > { %5128 = dma.vmem_to_hbm [thread:$0]  (%p5550_p4), %s4843_s12, 48, %s4840_s23, %s4826_s26  }
 0x9a4 PF: > { %p5140_p13 = scmp.ge.s32.totalorder %s5413_s15, 2  ;;  %s4854_s22 = sand.u32 1, %s5393_s27  }
 0x9a5   : > { %s4855_s14 = scalar_lea.sflag [#allocation5], %s4854_s22 }
 0x9a6   : > { %p5135_p0 = pnand %p5140_p13, %p5557_p8 }
 0x9a8   : > { %p5136_p1 = pneg %p5135_p0 }
 0x9aa   : > { %5388 = dma.done.wait (%p5136_p1), %s4855_s14, 48  }
 0x9ab   : > { %5390 = vsyncadd (%p5136_p1), %s4855_s14, 4294967248  ;;  %s29_s15 = sadd.s32 1, %s5413_s15   ;;  %s6953_s24 = sld [smem:[#allocation9_spill]] }
 0x9ac   : > { %p26_p2 = scmp.ge.s32.totalorder %s29_s15, 4   ;;  %s6954_s29 = sld [smem:[#allocation12_spill]] }
 0x9ad   : > { %s6955_s30 = sld [smem:[#allocation10_spill]]  ;;  %s6957_s27 = smov %s5397_s28 }
 0x9ae   : > { %s6956_s14 = sld [smem:[#allocation11_spill]]  ;;  %28 = sbr.rel (!%p26_p2) target bundleno = 8 (0x8), region = 128 }
 0x9b1   : > { %s6958_s28 = smov %s6953_s24 }
 0x9b3   :  { %4860 = vsyncpa [#allocation4], 1 }
 0x9b4   :  { %4862 = vsyncpa [#allocation4 + $0x1], 1 }
 0x9b5   :  { %4863 = vsyncpa [#allocation5], 1 }
 0x9b6   :  { %4865 = vsyncpa [#allocation5 + $0x1], 1 }

</bundles_post_ra>
